<compile_context>
chip_gen: v5e
topology: v5e:2x2
jax: 0.10.0
libtpu: 0.0.40
codegen_flags: <defaults>
</compile_context>

<pallas_src>
import functools

import numpy as np

import jax
import jax.numpy as jnp
from jax.experimental import pallas as pl
from jax.experimental.pallas import tpu as pltpu

NEG_INF = float("-inf")
MASK_VALUE = -1e30  # finite -> no NaN when a query row has zero valid keys


def mha_kernel(q_ref, k_ref, qm_ref, km_ref, pos_ref,
               wq_ref, bq_ref, wk_ref, bk_ref, wv_ref, bv_ref,
               wl_ref, bl_ref, out_ref, attn_scratch, *, Nh, dkh, dvh):
    f32, bf16 = jnp.float32, jnp.bfloat16
    Bt, Lq, d = q_ref.shape
    Lk = k_ref.shape[1]
    dk, dv = Nh * dkh, Nh * dvh

    # ---- Projections: lane-dense (Bt*L, d) bf16 matmuls, f32 accumulation ----
    q2 = q_ref[...].reshape(Bt * Lq, d)          # bf16 (cast in wrapper)
    k2 = k_ref[...].reshape(Bt * Lk, d)

    qp = (jnp.dot(q2, wq_ref[...], preferred_element_type=f32)
          + bq_ref[...]) * (dkh ** -0.5)                                  # [Bt*Lq, dk] f32
    kp = jnp.dot(k2, wk_ref[...], preferred_element_type=f32) + bk_ref[...]
    # NOTE: projv is applied to the *already projected* k (as in the PyTorch code).
    kp_bf = kp.astype(bf16)
    vp = jnp.dot(kp_bf, wv_ref[...], preferred_element_type=f32) + bv_ref[...]

    qp_h = qp.astype(bf16).reshape(Bt, Lq, dk)
    kp_h = kp_bf.reshape(Bt, Lk, dk)
    vp_h = vp.astype(bf16).reshape(Bt, Lk, dv)

    # ---- Additive mask + positional logits, shared across heads (f32) ----
    qm = qm_ref[...]                              # [Bt, Lq, 1]
    km = km_ref[...]                              # [Bt, 1, Lk]
    bias = jnp.where((qm * km) != 0.0, 0.0, MASK_VALUE).astype(f32) \
        + pos_ref[...]                            # [Bt, Lq, Lk]

    # ---- Attention: short static head loop, each einsum batched over Bt ----
    for h in range(Nh):
        qh = qp_h[:, :, h * dkh:(h + 1) * dkh]    # [Bt, Lq, dkh]
        kh = kp_h[:, :, h * dkh:(h + 1) * dkh]    # [Bt, Lk, dkh]
        vh = vp_h[:, :, h * dvh:(h + 1) * dvh]    # [Bt, Lk, dvh]

        logits = jnp.einsum("bqc,bkc->bqk", qh, kh,
                            preferred_element_type=f32) + bias           # [Bt, Lq, Lk]
        m = jnp.max(logits, axis=-1, keepdims=True)
        e = jnp.exp(logits - m)                                          # f32 (EUP)
        denom = jnp.sum(e, axis=-1, keepdims=True)
        w = e * pl.reciprocal(denom, approx=True)                        # EUP, frees VALU
        attn_scratch[:, :, h * dvh:(h + 1) * dvh] = jnp.einsum(
            "bqk,bkc->bqc", w.astype(bf16), vh,
            preferred_element_type=f32)                                  # [Bt, Lq, dvh]

    # ---- Single output linear over the concatenated heads ----
    attn = attn_scratch[...].reshape(Bt * Lq, dv).astype(bf16)
    out = jnp.dot(attn, wl_ref[...], preferred_element_type=f32) + bl_ref[...]
    out_ref[...] = out.reshape(Bt, Lq, d)


def _pick_block_b(B, Lq, Lk, target_rows=256, score_bytes_budget=8 << 20):
    """Largest divisor of B reaching ~target_rows MXU rows, VMEM bounded."""
    best = 1
    for bt in range(1, B + 1):
        if B % bt:
            continue
        if bt * Lq * Lk * 4 * 3 > score_bytes_budget:   # score/mask/pos tiles
            break
        best = bt
        if bt * Lq >= target_rows:
            break
    return best


def mha_forward(q, k, q_mask, k_mask, pos_logits, params, Nh, block_b=None):
    B, Lq, d = q.shape
    Lk = k.shape[1]
    dk = params["wq"].shape[1]
    dv = params["wv"].shape[1]
    dkh, dvh = dk // Nh, dv // Nh

    if block_b is None:
        block_b = _pick_block_b(B, Lq, Lk)
    assert B % block_b == 0

    # bf16 MXU operands (accumulation stays f32 inside the kernel); halves the
    # HBM bytes for q/k/weights as well.
    q_bf = q.astype(jnp.bfloat16)
    k_bf = k.astype(jnp.bfloat16)
    w_bf = {n: params[n].astype(jnp.bfloat16) for n in ("wq", "wk", "wv", "wl")}

    qm = q_mask.astype(jnp.float32).reshape(B, Lq, 1)
    km = k_mask.astype(jnp.float32).reshape(B, 1, Lk)
    pos = pos_logits.astype(jnp.float32)

    kernel = functools.partial(mha_kernel, Nh=Nh, dkh=dkh, dvh=dvh)

    def resident(shape):
        # Constant index map -> block is DMA'd once and stays VMEM-resident
        # across the batch grid (no per-step weight refetch).
        return pl.BlockSpec(shape, lambda b: (0,) * len(shape))

    grid_spec = pltpu.PrefetchScalarGridSpec(
        num_scalar_prefetch=0,
        grid=(B // block_b,),
        in_specs=[
            pl.BlockSpec((block_b, Lq, d), lambda b: (b, 0, 0)),     # q
            pl.BlockSpec((block_b, Lk, d), lambda b: (b, 0, 0)),     # k
            pl.BlockSpec((block_b, Lq, 1), lambda b: (b, 0, 0)),     # q_mask
            pl.BlockSpec((block_b, 1, Lk), lambda b: (b, 0, 0)),     # k_mask
            pl.BlockSpec((block_b, Lq, Lk), lambda b: (b, 0, 0)),    # pos_logits
            resident((d, dk)), resident((1, dk)),                    # projq
            resident((d, dk)), resident((1, dk)),                    # projk
            resident((dk, dv)), resident((1, dv)),                   # projv
            resident((dv, d)), resident((1, d)),                     # output linear
        ],
        out_specs=pl.BlockSpec((block_b, Lq, d), lambda b: (b, 0, 0)),
        scratch_shapes=[pltpu.VMEM((block_b, Lq, dv), jnp.float32)],
    )

    return pl.pallas_call(
        kernel,
        out_shape=jax.ShapeDtypeStruct((B, Lq, d), jnp.float32),
        grid_spec=grid_spec,
        compiler_params=pltpu.CompilerParams(
            dimension_semantics=("parallel",)),       # independent batch tiles
    )(q_bf, k_bf, qm, km, pos,
      w_bf["wq"], params["bq"], w_bf["wk"], params["bk"],
      w_bf["wv"], params["bv"], w_bf["wl"], params["bl"])


def mha_reference(q, k, q_mask, k_mask, pos_logits, params, Nh):
    """Pure-JAX f32 reference mirroring the PyTorch forward exactly."""
    dk = params["wq"].shape[1]
    dv = params["wv"].shape[1]
    dkh, dvh = dk // Nh, dv // Nh
    B, Lq, d = q.shape

    qp = (q @ params["wq"] + params["bq"]) * dkh ** (-0.5)
    kp = k @ params["wk"] + params["bk"]
    vp = kp @ params["wv"] + params["bv"]

    def split(x, dh):
        Bx, L, _ = x.shape
        return x.reshape(Bx, L, Nh, dh).transpose(0, 2, 1, 3)

    qh, kh, vh = split(qp, dkh), split(kp, dkh), split(vp, dvh)

    outer = jnp.einsum("bi,bj->bij", q_mask.astype(jnp.float32),
                       k_mask.astype(jnp.float32))
    attn_mask = jnp.where(outer == 0, NEG_INF, 0.0)[:, None]
    con = jnp.einsum("bhid,bhjd->bhij", qh, kh)
    logits = attn_mask + con + pos_logits[:, None]
    w = jax.nn.softmax(logits, axis=-1)
    attn = jnp.einsum("bhij,bhjd->bhid", w, vh)
    attn = attn.transpose(0, 2, 1, 3).reshape(B, Lq, Nh * dvh)
    return attn @ params["wl"] + params["bl"]


if __name__ == "__main__":
    key = jax.random.PRNGKey(0)
    B, Lq, Lk, d, Nh = 2, 64, 64, 128, 4
    dk = dv = d  # projv(projk(k)) requires dk == d, matching the module's usage

    ks = jax.random.split(key, 12)
    q = jax.random.normal(ks[0], (B, Lq, d), jnp.float32)
    k = jax.random.normal(ks[1], (B, Lk, d), jnp.float32)
    q_mask = jnp.ones((B, Lq), jnp.float32)
    k_mask = (jax.random.uniform(ks[2], (B, Lk)) > 0.25).astype(jnp.float32)
    k_mask = k_mask.at[:, 0].set(1.0)  # keep >=1 valid key (reference uses -inf)
    pos_logits = 0.1 * jax.random.normal(ks[3], (B, Lq, Lk), jnp.float32)

    s = 0.1
    params = {
        "wq": s * jax.random.normal(ks[4], (d, dk), jnp.float32),
        "bq": s * jax.random.normal(ks[5], (1, dk), jnp.float32),
        "wk": s * jax.random.normal(ks[6], (d, dk), jnp.float32),
        "bk": s * jax.random.normal(ks[7], (1, dk), jnp.float32),
        "wv": s * jax.random.normal(ks[8], (dk, dv), jnp.float32),
        "bv": s * jax.random.normal(ks[9], (1, dv), jnp.float32),
        "wl": s * jax.random.normal(ks[10], (dv, d), jnp.float32),
        "bl": s * jax.random.normal(ks[11], (1, d), jnp.float32),
    }

    out = mha_forward(q, k, q_mask, k_mask, pos_logits, params, Nh)
    out = jax.block_until_ready(out)

    ref = mha_reference(q, k, q_mask, k_mask, pos_logits, params, Nh)
    # bf16 MXU operands vs f32 reference -> loose-but-meaningful tolerance.
    np.testing.assert_allclose(np.asarray(out), np.asarray(ref),
                               rtol=5e-2, atol=5e-2)
    print("KERNEL_OK")
</pallas_src>

<mosaic_0001>
module attributes {stable_mosaic.version = 11 : i64} {
  func.func @mha_kernel(%arg0: i32, %arg1: memref<2x64x128xbf16, #tpu.memory_space<vmem>>, %arg2: memref<2x64x128xbf16, #tpu.memory_space<vmem>>, %arg3: memref<2x64x1xf32, #tpu.memory_space<vmem>>, %arg4: memref<2x1x64xf32, #tpu.memory_space<vmem>>, %arg5: memref<2x64x64xf32, #tpu.memory_space<vmem>>, %arg6: memref<128x128xbf16, #tpu.memory_space<vmem>>, %arg7: memref<1x128xf32, #tpu.memory_space<vmem>>, %arg8: memref<128x128xbf16, #tpu.memory_space<vmem>>, %arg9: memref<1x128xf32, #tpu.memory_space<vmem>>, %arg10: memref<128x128xbf16, #tpu.memory_space<vmem>>, %arg11: memref<1x128xf32, #tpu.memory_space<vmem>>, %arg12: memref<128x128xbf16, #tpu.memory_space<vmem>>, %arg13: memref<1x128xf32, #tpu.memory_space<vmem>>, %arg14: memref<2x64x128xf32, #tpu.memory_space<vmem>>, %arg15: memref<2x64x128xf32, #tpu.memory_space<vmem>>) attributes {dimension_semantics = [#tpu.dimension_semantics<parallel>], iteration_bounds = array<i64: 1>, scalar_prefetch = 0 : i64, scratch_operands = 1 : i64, tpu.core_type = #tpu.core_type<tc>, window_params = [{transform_indices = @transform_0, window_bounds = array<i64: 2, 64, 128>}, {transform_indices = @transform_1, window_bounds = array<i64: 2, 64, 128>}, {transform_indices = @transform_2, window_bounds = array<i64: 2, 64, 1>}, {transform_indices = @transform_3, window_bounds = array<i64: 2, 1, 64>}, {transform_indices = @transform_4, window_bounds = array<i64: 2, 64, 64>}, {pipeline_mode = #tpu.pipeline_mode<synchronous>, transform_indices = @transform_5, window_bounds = array<i64: 128, 128>}, {pipeline_mode = #tpu.pipeline_mode<synchronous>, transform_indices = @transform_6, window_bounds = array<i64: 1, 128>}, {pipeline_mode = #tpu.pipeline_mode<synchronous>, transform_indices = @transform_7, window_bounds = array<i64: 128, 128>}, {pipeline_mode = #tpu.pipeline_mode<synchronous>, transform_indices = @transform_8, window_bounds = array<i64: 1, 128>}, {pipeline_mode = #tpu.pipeline_mode<synchronous>, transform_indices = @transform_9, window_bounds = array<i64: 128, 128>}, {pipeline_mode = #tpu.pipeline_mode<synchronous>, transform_indices = @transform_10, window_bounds = array<i64: 1, 128>}, {pipeline_mode = #tpu.pipeline_mode<synchronous>, transform_indices = @transform_11, window_bounds = array<i64: 128, 128>}, {pipeline_mode = #tpu.pipeline_mode<synchronous>, transform_indices = @transform_12, window_bounds = array<i64: 1, 128>}, {transform_indices = @transform_13, window_bounds = array<i64: 2, 64, 128>}]} {
    %c0 = arith.constant 0 : index
    %c0_0 = arith.constant 0 : index
    %c0_1 = arith.constant 0 : index
    %0 = vector.load %arg1[%c0, %c0_0, %c0_1] : memref<2x64x128xbf16, #tpu.memory_space<vmem>>, vector<2x64x128xbf16>
    %1 = vector.shape_cast %0 : vector<2x64x128xbf16> to vector<128x128xbf16>
    %c0_2 = arith.constant 0 : index
    %c0_3 = arith.constant 0 : index
    %c0_4 = arith.constant 0 : index
    %2 = vector.load %arg2[%c0_2, %c0_3, %c0_4] : memref<2x64x128xbf16, #tpu.memory_space<vmem>>, vector<2x64x128xbf16>
    %3 = vector.shape_cast %2 : vector<2x64x128xbf16> to vector<128x128xbf16>
    %c0_5 = arith.constant 0 : index
    %c0_6 = arith.constant 0 : index
    %4 = vector.load %arg6[%c0_5, %c0_6] : memref<128x128xbf16, #tpu.memory_space<vmem>>, vector<128x128xbf16>
    %cst = arith.constant dense<0.000000e+00> : vector<128x128xf32>
    %5 = tpu.matmul %1, %4, %cst {dimension_numbers = #tpu.dot_dimension_numbers<[1], [0], [0], [1], [0, 0, 1, 1], [], []>} : vector<128x128xbf16>, vector<128x128xbf16>, vector<128x128xf32> -> vector<128x128xf32>
    %c0_7 = arith.constant 0 : index
    %c0_8 = arith.constant 0 : index
    %6 = vector.load %arg7[%c0_7, %c0_8] : memref<1x128xf32, #tpu.memory_space<vmem>>, vector<1x128xf32>
    %7 = vector.broadcast %6 : vector<1x128xf32> to vector<128x128xf32>
    %8 = arith.addf %5, %7 : vector<128x128xf32>
    %cst_9 = arith.constant 0.176776692 : f32
    %9 = vector.broadcast %cst_9 : f32 to vector<128x128xf32>
    %10 = arith.mulf %8, %9 : vector<128x128xf32>
    %c0_10 = arith.constant 0 : index
    %c0_11 = arith.constant 0 : index
    %11 = vector.load %arg8[%c0_10, %c0_11] : memref<128x128xbf16, #tpu.memory_space<vmem>>, vector<128x128xbf16>
    %cst_12 = arith.constant dense<0.000000e+00> : vector<128x128xf32>
    %12 = tpu.matmul %3, %11, %cst_12 {dimension_numbers = #tpu.dot_dimension_numbers<[1], [0], [0], [1], [0, 0, 1, 1], [], []>} : vector<128x128xbf16>, vector<128x128xbf16>, vector<128x128xf32> -> vector<128x128xf32>
    %c0_13 = arith.constant 0 : index
    %c0_14 = arith.constant 0 : index
    %13 = vector.load %arg9[%c0_13, %c0_14] : memref<1x128xf32, #tpu.memory_space<vmem>>, vector<1x128xf32>
    %14 = vector.broadcast %13 : vector<1x128xf32> to vector<128x128xf32>
    %15 = arith.addf %12, %14 : vector<128x128xf32>
    %16 = arith.truncf %15 : vector<128x128xf32> to vector<128x128xbf16>
    %c0_15 = arith.constant 0 : index
    %c0_16 = arith.constant 0 : index
    %17 = vector.load %arg10[%c0_15, %c0_16] : memref<128x128xbf16, #tpu.memory_space<vmem>>, vector<128x128xbf16>
    %cst_17 = arith.constant dense<0.000000e+00> : vector<128x128xf32>
    %18 = tpu.matmul %16, %17, %cst_17 {dimension_numbers = #tpu.dot_dimension_numbers<[1], [0], [0], [1], [0, 0, 1, 1], [], []>} : vector<128x128xbf16>, vector<128x128xbf16>, vector<128x128xf32> -> vector<128x128xf32>
    %c0_18 = arith.constant 0 : index
    %c0_19 = arith.constant 0 : index
    %19 = vector.load %arg11[%c0_18, %c0_19] : memref<1x128xf32, #tpu.memory_space<vmem>>, vector<1x128xf32>
    %20 = vector.broadcast %19 : vector<1x128xf32> to vector<128x128xf32>
    %21 = arith.addf %18, %20 : vector<128x128xf32>
    %22 = arith.truncf %10 : vector<128x128xf32> to vector<128x128xbf16>
    %23 = vector.shape_cast %22 : vector<128x128xbf16> to vector<2x64x128xbf16>
    %24 = vector.shape_cast %16 : vector<128x128xbf16> to vector<2x64x128xbf16>
    %25 = arith.truncf %21 : vector<128x128xf32> to vector<128x128xbf16>
    %26 = vector.shape_cast %25 : vector<128x128xbf16> to vector<2x64x128xbf16>
    %c0_20 = arith.constant 0 : index
    %c0_21 = arith.constant 0 : index
    %c0_22 = arith.constant 0 : index
    %27 = vector.load %arg3[%c0_20, %c0_21, %c0_22] : memref<2x64x1xf32, #tpu.memory_space<vmem>>, vector<2x64x1xf32>
    %c0_23 = arith.constant 0 : index
    %c0_24 = arith.constant 0 : index
    %c0_25 = arith.constant 0 : index
    %28 = vector.load %arg4[%c0_23, %c0_24, %c0_25] : memref<2x1x64xf32, #tpu.memory_space<vmem>>, vector<2x1x64xf32>
    %29 = vector.broadcast %27 : vector<2x64x1xf32> to vector<2x64x64xf32>
    %30 = vector.broadcast %28 : vector<2x1x64xf32> to vector<2x64x64xf32>
    %31 = arith.mulf %29, %30 : vector<2x64x64xf32>
    %cst_26 = arith.constant 0.000000e+00 : f32
    %32 = vector.broadcast %cst_26 : f32 to vector<2x64x64xf32>
    %33 = arith.cmpf one, %31, %32 : vector<2x64x64xf32>
    %cst_27 = arith.constant 0.000000e+00 : f32
    %cst_28 = arith.constant -1.000000e+30 : f32
    %34 = vector.broadcast %cst_27 : f32 to vector<2x64x64xf32>
    %35 = vector.broadcast %cst_28 : f32 to vector<2x64x64xf32>
    %36 = arith.select %33, %34, %35 : vector<2x64x64xi1>, vector<2x64x64xf32>
    %c0_29 = arith.constant 0 : index
    %c0_30 = arith.constant 0 : index
    %c0_31 = arith.constant 0 : index
    %37 = vector.load %arg5[%c0_29, %c0_30, %c0_31] : memref<2x64x64xf32, #tpu.memory_space<vmem>>, vector<2x64x64xf32>
    %38 = arith.addf %36, %37 : vector<2x64x64xf32>
    %39 = vector.extract_strided_slice %23 {offsets = [0, 0, 0], sizes = [2, 64, 32], strides = [1, 1, 1]} : vector<2x64x128xbf16> to vector<2x64x32xbf16>
    %40 = vector.extract_strided_slice %24 {offsets = [0, 0, 0], sizes = [2, 64, 32], strides = [1, 1, 1]} : vector<2x64x128xbf16> to vector<2x64x32xbf16>
    %41 = vector.extract_strided_slice %26 {offsets = [0, 0, 0], sizes = [2, 64, 32], strides = [1, 1, 1]} : vector<2x64x128xbf16> to vector<2x64x32xbf16>
    "tpu.trace_start"() <{level = 10 : i32, message = "bqc,bkc->bqk"}> : () -> ()
    %cst_32 = arith.constant dense<0.000000e+00> : vector<2x64x64xf32>
    %42 = tpu.matmul %39, %40, %cst_32 {dimension_numbers = #tpu.dot_dimension_numbers<[2], [2], [1], [1], [0, 0, 0, 1, 1, 1], [0], [0]>} : vector<2x64x32xbf16>, vector<2x64x32xbf16>, vector<2x64x64xf32> -> vector<2x64x64xf32>
    "tpu.trace_stop"() : () -> ()
    %43 = arith.addf %42, %38 : vector<2x64x64xf32>
    %cst_33 = arith.constant dense<0xFF800000> : vector<2x64xf32>
    %44 = vector.multi_reduction <maximumf>, %43, %cst_33 [2] : vector<2x64x64xf32> to vector<2x64xf32>
    %45 = vector.shape_cast %44 : vector<2x64xf32> to vector<2x64x1xf32>
    %46 = vector.broadcast %45 : vector<2x64x1xf32> to vector<2x64x64xf32>
    %47 = arith.subf %43, %46 : vector<2x64x64xf32>
    %48 = math.exp %47 : vector<2x64x64xf32>
    %cst_34 = arith.constant dense<0.000000e+00> : vector<2x64xf32>
    %49 = vector.multi_reduction <add>, %48, %cst_34 [2] : vector<2x64x64xf32> to vector<2x64xf32>
    %50 = vector.shape_cast %49 : vector<2x64xf32> to vector<2x64x1xf32>
    %51 = tpu.reciprocal %50 {approx = true} : vector<2x64x1xf32> -> vector<2x64x1xf32>
    %52 = vector.broadcast %51 : vector<2x64x1xf32> to vector<2x64x64xf32>
    %53 = arith.mulf %48, %52 : vector<2x64x64xf32>
    %54 = arith.truncf %53 : vector<2x64x64xf32> to vector<2x64x64xbf16>
    "tpu.trace_start"() <{level = 10 : i32, message = "bqk,bkc->bqc"}> : () -> ()
    %cst_35 = arith.constant dense<0.000000e+00> : vector<2x64x32xf32>
    %55 = tpu.matmul %54, %41, %cst_35 {dimension_numbers = #tpu.dot_dimension_numbers<[2], [1], [1], [2], [0, 0, 0, 1, 1, 2], [0], [0]>} : vector<2x64x64xbf16>, vector<2x64x32xbf16>, vector<2x64x32xf32> -> vector<2x64x32xf32>
    "tpu.trace_stop"() : () -> ()
    %c0_36 = arith.constant 0 : index
    %c0_37 = arith.constant 0 : index
    %c0_38 = arith.constant 0 : index
    %56 = vector.load %arg15[%c0_36, %c0_37, %c0_38] : memref<2x64x128xf32, #tpu.memory_space<vmem>>, vector<2x64x32xf32>
    tpu.vector_store %arg15[%c0_36, %c0_37, %c0_38], %55 {strides = array<i32>} : memref<2x64x128xf32, #tpu.memory_space<vmem>>, vector<2x64x32xf32>,
    %57 = vector.extract_strided_slice %23 {offsets = [0, 0, 32], sizes = [2, 64, 32], strides = [1, 1, 1]} : vector<2x64x128xbf16> to vector<2x64x32xbf16>
    %58 = vector.extract_strided_slice %24 {offsets = [0, 0, 32], sizes = [2, 64, 32], strides = [1, 1, 1]} : vector<2x64x128xbf16> to vector<2x64x32xbf16>
    %59 = vector.extract_strided_slice %26 {offsets = [0, 0, 32], sizes = [2, 64, 32], strides = [1, 1, 1]} : vector<2x64x128xbf16> to vector<2x64x32xbf16>
    "tpu.trace_start"() <{level = 10 : i32, message = "bqc,bkc->bqk"}> : () -> ()
    %cst_39 = arith.constant dense<0.000000e+00> : vector<2x64x64xf32>
    %60 = tpu.matmul %57, %58, %cst_39 {dimension_numbers = #tpu.dot_dimension_numbers<[2], [2], [1], [1], [0, 0, 0, 1, 1, 1], [0], [0]>} : vector<2x64x32xbf16>, vector<2x64x32xbf16>, vector<2x64x64xf32> -> vector<2x64x64xf32>
    "tpu.trace_stop"() : () -> ()
    %61 = arith.addf %60, %38 : vector<2x64x64xf32>
    %cst_40 = arith.constant dense<0xFF800000> : vector<2x64xf32>
    %62 = vector.multi_reduction <maximumf>, %61, %cst_40 [2] : vector<2x64x64xf32> to vector<2x64xf32>
    %63 = vector.shape_cast %62 : vector<2x64xf32> to vector<2x64x1xf32>
    %64 = vector.broadcast %63 : vector<2x64x1xf32> to vector<2x64x64xf32>
    %65 = arith.subf %61, %64 : vector<2x64x64xf32>
    %66 = math.exp %65 : vector<2x64x64xf32>
    %cst_41 = arith.constant dense<0.000000e+00> : vector<2x64xf32>
    %67 = vector.multi_reduction <add>, %66, %cst_41 [2] : vector<2x64x64xf32> to vector<2x64xf32>
    %68 = vector.shape_cast %67 : vector<2x64xf32> to vector<2x64x1xf32>
    %69 = tpu.reciprocal %68 {approx = true} : vector<2x64x1xf32> -> vector<2x64x1xf32>
    %70 = vector.broadcast %69 : vector<2x64x1xf32> to vector<2x64x64xf32>
    %71 = arith.mulf %66, %70 : vector<2x64x64xf32>
    %72 = arith.truncf %71 : vector<2x64x64xf32> to vector<2x64x64xbf16>
    "tpu.trace_start"() <{level = 10 : i32, message = "bqk,bkc->bqc"}> : () -> ()
    %cst_42 = arith.constant dense<0.000000e+00> : vector<2x64x32xf32>
    %73 = tpu.matmul %72, %59, %cst_42 {dimension_numbers = #tpu.dot_dimension_numbers<[2], [1], [1], [2], [0, 0, 0, 1, 1, 2], [0], [0]>} : vector<2x64x64xbf16>, vector<2x64x32xbf16>, vector<2x64x32xf32> -> vector<2x64x32xf32>
    "tpu.trace_stop"() : () -> ()
    %c0_43 = arith.constant 0 : index
    %c0_44 = arith.constant 0 : index
    %c32 = arith.constant 32 : index
    %74 = vector.load %arg15[%c0_43, %c0_44, %c32] : memref<2x64x128xf32, #tpu.memory_space<vmem>>, vector<2x64x32xf32>
    tpu.vector_store %arg15[%c0_43, %c0_44, %c32], %73 {strides = array<i32>} : memref<2x64x128xf32, #tpu.memory_space<vmem>>, vector<2x64x32xf32>,
    %75 = vector.extract_strided_slice %23 {offsets = [0, 0, 64], sizes = [2, 64, 32], strides = [1, 1, 1]} : vector<2x64x128xbf16> to vector<2x64x32xbf16>
    %76 = vector.extract_strided_slice %24 {offsets = [0, 0, 64], sizes = [2, 64, 32], strides = [1, 1, 1]} : vector<2x64x128xbf16> to vector<2x64x32xbf16>
    %77 = vector.extract_strided_slice %26 {offsets = [0, 0, 64], sizes = [2, 64, 32], strides = [1, 1, 1]} : vector<2x64x128xbf16> to vector<2x64x32xbf16>
    "tpu.trace_start"() <{level = 10 : i32, message = "bqc,bkc->bqk"}> : () -> ()
    %cst_45 = arith.constant dense<0.000000e+00> : vector<2x64x64xf32>
    %78 = tpu.matmul %75, %76, %cst_45 {dimension_numbers = #tpu.dot_dimension_numbers<[2], [2], [1], [1], [0, 0, 0, 1, 1, 1], [0], [0]>} : vector<2x64x32xbf16>, vector<2x64x32xbf16>, vector<2x64x64xf32> -> vector<2x64x64xf32>
    "tpu.trace_stop"() : () -> ()
    %79 = arith.addf %78, %38 : vector<2x64x64xf32>
    %cst_46 = arith.constant dense<0xFF800000> : vector<2x64xf32>
    %80 = vector.multi_reduction <maximumf>, %79, %cst_46 [2] : vector<2x64x64xf32> to vector<2x64xf32>
    %81 = vector.shape_cast %80 : vector<2x64xf32> to vector<2x64x1xf32>
    %82 = vector.broadcast %81 : vector<2x64x1xf32> to vector<2x64x64xf32>
    %83 = arith.subf %79, %82 : vector<2x64x64xf32>
    %84 = math.exp %83 : vector<2x64x64xf32>
    %cst_47 = arith.constant dense<0.000000e+00> : vector<2x64xf32>
    %85 = vector.multi_reduction <add>, %84, %cst_47 [2] : vector<2x64x64xf32> to vector<2x64xf32>
    %86 = vector.shape_cast %85 : vector<2x64xf32> to vector<2x64x1xf32>
    %87 = tpu.reciprocal %86 {approx = true} : vector<2x64x1xf32> -> vector<2x64x1xf32>
    %88 = vector.broadcast %87 : vector<2x64x1xf32> to vector<2x64x64xf32>
    %89 = arith.mulf %84, %88 : vector<2x64x64xf32>
    %90 = arith.truncf %89 : vector<2x64x64xf32> to vector<2x64x64xbf16>
    "tpu.trace_start"() <{level = 10 : i32, message = "bqk,bkc->bqc"}> : () -> ()
    %cst_48 = arith.constant dense<0.000000e+00> : vector<2x64x32xf32>
    %91 = tpu.matmul %90, %77, %cst_48 {dimension_numbers = #tpu.dot_dimension_numbers<[2], [1], [1], [2], [0, 0, 0, 1, 1, 2], [0], [0]>} : vector<2x64x64xbf16>, vector<2x64x32xbf16>, vector<2x64x32xf32> -> vector<2x64x32xf32>
    "tpu.trace_stop"() : () -> ()
    %c0_49 = arith.constant 0 : index
    %c0_50 = arith.constant 0 : index
    %c64 = arith.constant 64 : index
    %92 = vector.load %arg15[%c0_49, %c0_50, %c64] : memref<2x64x128xf32, #tpu.memory_space<vmem>>, vector<2x64x32xf32>
    tpu.vector_store %arg15[%c0_49, %c0_50, %c64], %91 {strides = array<i32>} : memref<2x64x128xf32, #tpu.memory_space<vmem>>, vector<2x64x32xf32>,
    %93 = vector.extract_strided_slice %23 {offsets = [0, 0, 96], sizes = [2, 64, 32], strides = [1, 1, 1]} : vector<2x64x128xbf16> to vector<2x64x32xbf16>
    %94 = vector.extract_strided_slice %24 {offsets = [0, 0, 96], sizes = [2, 64, 32], strides = [1, 1, 1]} : vector<2x64x128xbf16> to vector<2x64x32xbf16>
    %95 = vector.extract_strided_slice %26 {offsets = [0, 0, 96], sizes = [2, 64, 32], strides = [1, 1, 1]} : vector<2x64x128xbf16> to vector<2x64x32xbf16>
    "tpu.trace_start"() <{level = 10 : i32, message = "bqc,bkc->bqk"}> : () -> ()
    %cst_51 = arith.constant dense<0.000000e+00> : vector<2x64x64xf32>
    %96 = tpu.matmul %93, %94, %cst_51 {dimension_numbers = #tpu.dot_dimension_numbers<[2], [2], [1], [1], [0, 0, 0, 1, 1, 1], [0], [0]>} : vector<2x64x32xbf16>, vector<2x64x32xbf16>, vector<2x64x64xf32> -> vector<2x64x64xf32>
    "tpu.trace_stop"() : () -> ()
    %97 = arith.addf %96, %38 : vector<2x64x64xf32>
    %cst_52 = arith.constant dense<0xFF800000> : vector<2x64xf32>
    %98 = vector.multi_reduction <maximumf>, %97, %cst_52 [2] : vector<2x64x64xf32> to vector<2x64xf32>
    %99 = vector.shape_cast %98 : vector<2x64xf32> to vector<2x64x1xf32>
    %100 = vector.broadcast %99 : vector<2x64x1xf32> to vector<2x64x64xf32>
    %101 = arith.subf %97, %100 : vector<2x64x64xf32>
    %102 = math.exp %101 : vector<2x64x64xf32>
    %cst_53 = arith.constant dense<0.000000e+00> : vector<2x64xf32>
    %103 = vector.multi_reduction <add>, %102, %cst_53 [2] : vector<2x64x64xf32> to vector<2x64xf32>
    %104 = vector.shape_cast %103 : vector<2x64xf32> to vector<2x64x1xf32>
    %105 = tpu.reciprocal %104 {approx = true} : vector<2x64x1xf32> -> vector<2x64x1xf32>
    %106 = vector.broadcast %105 : vector<2x64x1xf32> to vector<2x64x64xf32>
    %107 = arith.mulf %102, %106 : vector<2x64x64xf32>
    %108 = arith.truncf %107 : vector<2x64x64xf32> to vector<2x64x64xbf16>
    "tpu.trace_start"() <{level = 10 : i32, message = "bqk,bkc->bqc"}> : () -> ()
    %cst_54 = arith.constant dense<0.000000e+00> : vector<2x64x32xf32>
    %109 = tpu.matmul %108, %95, %cst_54 {dimension_numbers = #tpu.dot_dimension_numbers<[2], [1], [1], [2], [0, 0, 0, 1, 1, 2], [0], [0]>} : vector<2x64x64xbf16>, vector<2x64x32xbf16>, vector<2x64x32xf32> -> vector<2x64x32xf32>
    "tpu.trace_stop"() : () -> ()
    %c0_55 = arith.constant 0 : index
    %c0_56 = arith.constant 0 : index
    %c96 = arith.constant 96 : index
    %110 = vector.load %arg15[%c0_55, %c0_56, %c96] : memref<2x64x128xf32, #tpu.memory_space<vmem>>, vector<2x64x32xf32>
    tpu.vector_store %arg15[%c0_55, %c0_56, %c96], %109 {strides = array<i32>} : memref<2x64x128xf32, #tpu.memory_space<vmem>>, vector<2x64x32xf32>,
    %c0_57 = arith.constant 0 : index
    %c0_58 = arith.constant 0 : index
    %c0_59 = arith.constant 0 : index
    %111 = vector.load %arg15[%c0_57, %c0_58, %c0_59] : memref<2x64x128xf32, #tpu.memory_space<vmem>>, vector<2x64x128xf32>
    %112 = vector.shape_cast %111 : vector<2x64x128xf32> to vector<128x128xf32>
    %113 = arith.truncf %112 : vector<128x128xf32> to vector<128x128xbf16>
    %c0_60 = arith.constant 0 : index
    %c0_61 = arith.constant 0 : index
    %114 = vector.load %arg12[%c0_60, %c0_61] : memref<128x128xbf16, #tpu.memory_space<vmem>>, vector<128x128xbf16>
    %cst_62 = arith.constant dense<0.000000e+00> : vector<128x128xf32>
    %115 = tpu.matmul %113, %114, %cst_62 {dimension_numbers = #tpu.dot_dimension_numbers<[1], [0], [0], [1], [0, 0, 1, 1], [], []>} : vector<128x128xbf16>, vector<128x128xbf16>, vector<128x128xf32> -> vector<128x128xf32>
    %c0_63 = arith.constant 0 : index
    %c0_64 = arith.constant 0 : index
    %116 = vector.load %arg13[%c0_63, %c0_64] : memref<1x128xf32, #tpu.memory_space<vmem>>, vector<1x128xf32>
    %117 = vector.broadcast %116 : vector<1x128xf32> to vector<128x128xf32>
    %118 = arith.addf %115, %117 : vector<128x128xf32>
    %119 = vector.shape_cast %118 : vector<128x128xf32> to vector<2x64x128xf32>
    %c0_65 = arith.constant 0 : index
    %c0_66 = arith.constant 0 : index
    %c0_67 = arith.constant 0 : index
    %120 = vector.load %arg14[%c0_65, %c0_66, %c0_67] : memref<2x64x128xf32, #tpu.memory_space<vmem>>, vector<2x64x128xf32>
    tpu.vector_store %arg14[%c0_65, %c0_66, %c0_67], %119 {strides = array<i32>} : memref<2x64x128xf32, #tpu.memory_space<vmem>>, vector<2x64x128xf32>,
    return
  }
  func.func @transform_0(%arg0: i32) -> (i32, i32, i32) {
    %c0_i32 = arith.constant 0 : i32
    %c0_i32_0 = arith.constant 0 : i32
    %c0_i32_1 = arith.constant 0 : i32
    return %arg0, %c0_i32, %c0_i32_0 : i32, i32, i32
  }
  func.func @transform_1(%arg0: i32) -> (i32, i32, i32) {
    %c0_i32 = arith.constant 0 : i32
    %c0_i32_0 = arith.constant 0 : i32
    %c0_i32_1 = arith.constant 0 : i32
    return %arg0, %c0_i32, %c0_i32_0 : i32, i32, i32
  }
  func.func @transform_2(%arg0: i32) -> (i32, i32, i32) {
    %c0_i32 = arith.constant 0 : i32
    %c0_i32_0 = arith.constant 0 : i32
    %c0_i32_1 = arith.constant 0 : i32
    return %arg0, %c0_i32, %c0_i32_0 : i32, i32, i32
  }
  func.func @transform_3(%arg0: i32) -> (i32, i32, i32) {
    %c0_i32 = arith.constant 0 : i32
    %c0_i32_0 = arith.constant 0 : i32
    %c0_i32_1 = arith.constant 0 : i32
    return %arg0, %c0_i32, %c0_i32_0 : i32, i32, i32
  }
  func.func @transform_4(%arg0: i32) -> (i32, i32, i32) {
    %c0_i32 = arith.constant 0 : i32
    %c0_i32_0 = arith.constant 0 : i32
    %c0_i32_1 = arith.constant 0 : i32
    return %arg0, %c0_i32, %c0_i32_0 : i32, i32, i32
  }
  func.func @transform_5(%arg0: i32) -> (i32, i32) {
    %c0_i32 = arith.constant 0 : i32
    %c0_i32_0 = arith.constant 0 : i32
    %c0_i32_1 = arith.constant 0 : i32
    return %c0_i32, %c0_i32_0 : i32, i32
  }
  func.func @transform_6(%arg0: i32) -> (i32, i32) {
    %c0_i32 = arith.constant 0 : i32
    %c0_i32_0 = arith.constant 0 : i32
    %c0_i32_1 = arith.constant 0 : i32
    return %c0_i32, %c0_i32_0 : i32, i32
  }
  func.func @transform_7(%arg0: i32) -> (i32, i32) {
    %c0_i32 = arith.constant 0 : i32
    %c0_i32_0 = arith.constant 0 : i32
    %c0_i32_1 = arith.constant 0 : i32
    return %c0_i32, %c0_i32_0 : i32, i32
  }
  func.func @transform_8(%arg0: i32) -> (i32, i32) {
    %c0_i32 = arith.constant 0 : i32
    %c0_i32_0 = arith.constant 0 : i32
    %c0_i32_1 = arith.constant 0 : i32
    return %c0_i32, %c0_i32_0 : i32, i32
  }
  func.func @transform_9(%arg0: i32) -> (i32, i32) {
    %c0_i32 = arith.constant 0 : i32
    %c0_i32_0 = arith.constant 0 : i32
    %c0_i32_1 = arith.constant 0 : i32
    return %c0_i32, %c0_i32_0 : i32, i32
  }
  func.func @transform_10(%arg0: i32) -> (i32, i32) {
    %c0_i32 = arith.constant 0 : i32
    %c0_i32_0 = arith.constant 0 : i32
    %c0_i32_1 = arith.constant 0 : i32
    return %c0_i32, %c0_i32_0 : i32, i32
  }
  func.func @transform_11(%arg0: i32) -> (i32, i32) {
    %c0_i32 = arith.constant 0 : i32
    %c0_i32_0 = arith.constant 0 : i32
    %c0_i32_1 = arith.constant 0 : i32
    return %c0_i32, %c0_i32_0 : i32, i32
  }
  func.func @transform_12(%arg0: i32) -> (i32, i32) {
    %c0_i32 = arith.constant 0 : i32
    %c0_i32_0 = arith.constant 0 : i32
    %c0_i32_1 = arith.constant 0 : i32
    return %c0_i32, %c0_i32_0 : i32, i32
  }
  func.func @transform_13(%arg0: i32) -> (i32, i32, i32) {
    %c0_i32 = arith.constant 0 : i32
    %c0_i32_0 = arith.constant 0 : i32
    %c0_i32_1 = arith.constant 0 : i32
    return %arg0, %c0_i32, %c0_i32_0 : i32, i32, i32
  }
}

</mosaic_0001>

<bundles_post_ra>
// kernel: tpu_custom_call.1
= control target key start
LH: loop header
LB: loop body
LE: loop exit
PB: predicated region body
PF: predicated region fallthrough
CT: control target
= control target key end

     0   :  { %18 = vsyncpa [#allocation4], 0  ;;  %s5837_s0 = inlined_call_operand.hbm [shape: bf16[2,64,128], index: 0, kind: input, shape index: {}]   ;;  %s5838_s1 = inlined_call_operand.hbm [shape: bf16[2,64,128], index: 1, kind: input, shape index: {}]   ;;  %s5839_s2 = inlined_call_operand.vmem [shape: f32[2,64,1], index: 2, kind: input, shape index: {}]   ;;  %s5840_s3 = inlined_call_operand.vmem [shape: f32[2,1,64], index: 3, kind: input, shape index: {}]   ;;  %s5841_s4 = inlined_call_operand.vmem [shape: f32[2,64,64], index: 4, kind: input, shape index: {}]   ;;  %s5842_s5 = inlined_call_operand.hbm [shape: bf16[128,128], index: 5, kind: input, shape index: {}]   ;;  %s5843_s6 = inlined_call_operand.vmem [shape: f32[1,128], index: 6, kind: input, shape index: {}]   ;;  %s5844_s7 = inlined_call_operand.hbm [shape: bf16[128,128], index: 7, kind: input, shape index: {}]   ;;  %s5845_s8 = inlined_call_operand.vmem [shape: f32[1,128], index: 8, kind: input, shape index: {}]   ;;  %s5846_s9 = inlined_call_operand.hbm [shape: bf16[128,128], index: 9, kind: input, shape index: {}]   ;;  %s5847_s10 = inlined_call_operand.vmem [shape: f32[1,128], index: 10, kind: input, shape index: {}]   ;;  %s5848_s11 = inlined_call_operand.hbm [shape: bf16[128,128], index: 11, kind: input, shape index: {}]   ;;  %s5849_s12 = inlined_call_operand.vmem [shape: f32[1,128], index: 12, kind: input, shape index: {}]   ;;  %s5850_s13 = inlined_call_operand.hbm [shape: f32[2,64,128], index: 13, kind: output, shape index: {}]  }
   0x1   :  { %19 = vsyncpa [#allocation7], 0 }
   0x2   :  { %20 = vsyncpa [#allocation10], 0 }
   0x3   :  { %21 = vsyncpa [#allocation13], 0 }
   0x4   :  { %22 = vsyncpa [#allocation5], 0  ;;  %s40_s27 = sshll.u32 %s5838_s1, 4  ;;  %s4061_s28 = smov [#allocation6]   ;;  %s41_s27 = int_to_ptr.hbm [resolvable:$true] %s40_s27 }
   0x5   :  { %s42_s29 = sshll.u32 %s4061_s28, 4  ;;  %s74_s15 = sshll.u32 %s5844_s7, 4  ;;  %s43_s29 = int_to_ptr.vmem [resolvable:$true] %s42_s29  ;;  %s75_s15 = int_to_ptr.hbm [resolvable:$true] %s74_s15 }
   0x6   :  { %s4062_s16 = smov 64   ;;  %s4063_s17 = smov 4  }
   0x7   :  { %48 = dma.hbm_to_vmem [thread:$0]  %s41_s27, 1024, %s43_s29, [#allocation7], %s4062_s16, %s4062_s16, %s4063_s17  }
   0x8   :  { %s4064_s18 = smov [#allocation9]   ;;  %s27_s1 = sshll.u32 %s5837_s0, 4  ;;  %s28_s1 = int_to_ptr.hbm [resolvable:$true] %s27_s1 }
   0x9   :  { %s76_s19 = sshll.u32 %s4064_s18, 4  ;;  %s59_s23 = sshll.u32 %s5842_s5, 4  ;;  %s77_s19 = int_to_ptr.vmem [resolvable:$true] %s76_s19  ;;  %s60_s23 = int_to_ptr.hbm [resolvable:$true] %s59_s23 }
   0xa   :  { %82 = dma.hbm_to_vmem [thread:$0]  %s75_s15, 1024, %s77_s19, [#allocation10], %s4062_s16, %s4062_s16, %s4063_s17  }
   0xb   :  { %s4065_s24 = smov [#allocation3]   ;;  %s4066_s26 = smov [#allocation8]  }
   0xc   :  { %s29_s25 = sshll.u32 %s4065_s24, 4  ;;  %s61_s0 = sshll.u32 %s4066_s26, 4  ;;  %s30_s25 = int_to_ptr.vmem [resolvable:$true] %s29_s25  ;;  %s62_s0 = int_to_ptr.vmem [resolvable:$true] %s61_s0 }
   0xd   :  { %35 = dma.hbm_to_vmem [thread:$0]  %s28_s1, 1024, %s30_s25, [#allocation4], %s4062_s16, %s4062_s16, %s4063_s17  }
   0xe   :  { %s89_s29 = sshll.u32 %s5846_s9, 4  ;;  %s104_s14 = sshll.u32 %s5848_s11, 4  ;;  %s90_s29 = int_to_ptr.hbm [resolvable:$true] %s89_s29  ;;  %s105_s14 = int_to_ptr.hbm [resolvable:$true] %s104_s14 }
   0xf   :  { %67 = dma.hbm_to_vmem [thread:$0]  %s60_s23, 1024, %s62_s0, [#allocation7], %s4062_s16, %s4062_s16, %s4063_s17  }
  0x10   :  { %s4067_s15 = smov [#allocation11]   ;;  %s4068_s19 = smov [#allocation12]  }
  0x11   :  { %s91_s18 = sshll.u32 %s4067_s15, 4  ;;  %s106_s9 = sshll.u32 %s4068_s19, 4  ;;  %s92_s18 = int_to_ptr.vmem [resolvable:$true] %s91_s18  ;;  %s107_s9 = int_to_ptr.vmem [resolvable:$true] %s106_s9 }
  0x12   :  { %97 = dma.hbm_to_vmem [thread:$0]  %s90_s29, 1024, %s92_s18, [#allocation10], %s4062_s16, %s4062_s16, %s4063_s17  }
  0x13   :  { %112 = dma.hbm_to_vmem [thread:$0]  %s105_s14, 1024, %s107_s9, [#allocation13], %s4062_s16, %s4062_s16, %s4063_s17  }
  0x14   :  { %4051 = dma.done.wait [#allocation4], 1024  }
  0x15   :  { %4052 = vsyncadd [#allocation4], 4294966272 }
  0x16   :  { %4053 = dma.done.wait [#allocation7], 2048  }
  0x17   :  { %4054 = vsyncadd [#allocation7], 4294965248 }
  0x18   :  { %4055 = dma.done.wait [#allocation10], 2048  }
  0x19   :  { %4056 = vsyncadd [#allocation10], 4294965248 }
  0x1a   :  { %4057 = dma.done.wait [#allocation13], 1024  }
  0x1b   :  { %4058 = vsyncadd [#allocation13], 4294966272  ;;  %v3578_v0 = vld [vmem:[#allocation9 + $0x38] sm:$0xff]  ;;  %v3577_v2 = vld [vmem:[#allocation9 + $0x30] sm:$0xff]  ;;  %v4069_v25 = vmov 0   ;;  %vm935_vm0 = vcmask 261120  }
  0x1c   :  { %v3570_v1 = vld [vmem:[#allocation8 + $0x38] sm:$0xff]  ;;  %469 = vmatpush.bf16.msra.mxu1 %v3578_v0  ;;  %v3569_v3 = vld [vmem:[#allocation8 + $0x30] sm:$0xff]  ;;  %v3576_v4 = vld [vmem:[#allocation9 + $0x28] sm:$0xff]  ;;  %3620 = vset.pattern.permute.xlu2 %v4069_v25  ;;  %vm1062_vm2 = vcmask 523264   ;;  %s3275_s1 = sshll.u32 %s5850_s13, 4  ;;  %s4074_s7 = smov 128   ;;  %s3276_s1 = int_to_ptr.hbm [resolvable:$true] %s3275_s1 }
  0x1d   :  { %288 = vmatpush.bf16.msra.mxu0 %v3570_v1  ;;  %v3568_v5 = vld [vmem:[#allocation8 + $0x28] sm:$0xff]  ;;  %v3575_v6 = vld [vmem:[#allocation9 + $0x20] sm:$0xff]  ;;  %v3574_v8 = vld [vmem:[#allocation9 + $0x18] sm:$0xff]  ;;  %3619 = vset.pattern.permute.xlu1 %v4069_v25  ;;  %s4075_s22 = smov 8  }
  0x1e   :  { %v3567_v7 = vld [vmem:[#allocation8 + $0x20] sm:$0xff]  ;;  %v3566_v9 = vld [vmem:[#allocation8 + $0x18] sm:$0xff]  ;;  %v3573_v10 = vld [vmem:[#allocation9 + $0x10] sm:$0xff]  ;;  %3618 = vset.pattern.permute.xlu0 %v4069_v25 }
  0x1f   :  { %v3565_v11 = vld [vmem:[#allocation8 + $0x10] sm:$0xff]  ;;  %v3572_v12 = vld [vmem:[#allocation9 + $0x8] sm:$0xff]  ;;  %v3571_v14 = vld [vmem:[#allocation9] sm:$0xff] }
  0x20   :  { %470 = vmatpush.bf16.msra.mxu1 %v3577_v2  ;;  %v3564_v13 = vld [vmem:[#allocation8 + $0x8] sm:$0xff]  ;;  %v3563_v15 = vld [vmem:[#allocation8] sm:$0xff]  ;;  %v3557_v20 = vld [vmem:[#allocation6 + $0x10] sm:$0xff] }
  0x21   :  { %289 = vmatpush.bf16.msra.mxu0 %v3569_v3  ;;  %v3555_v16 = vld [vmem:[#allocation6] sm:$0xff]  ;;  %v3556_v18 = vld [vmem:[#allocation6 + $0x8] sm:$0xff]  ;;  %v3549_v21 = vld [vmem:[#allocation3 + $0x10] sm:$0xff] }
  0x22   :  { %v3547_v17 = vld [vmem:[#allocation3] sm:$0xff]  ;;  %v3548_v19 = vld [vmem:[#allocation3 + $0x8] sm:$0xff]  ;;  %v3558_v22 = vld [vmem:[#allocation6 + $0x18] sm:$0xff] }
  0x23   :  { %v3550_v23 = vld [vmem:[#allocation3 + $0x18] sm:$0xff]  ;;  %v737_v26 = vld [vmem:[%s5839_s2 + $0x30] sm:$0xff]  ;;  %v3559_v27 = vld [vmem:[#allocation6 + $0x20] sm:$0xff] }
  0x24   :  { %471 = vmatpush.bf16.msra.mxu1 %v3576_v4  ;;  %v734_v24 = vld [vmem:[%s5839_s2 + $0x18] sm:$0xff]  ;;  %v3551_v28 = vld [vmem:[#allocation3 + $0x20] sm:$0xff]  ;;  %v733_v30 = vld [vmem:[%s5839_s2 + $0x10] sm:$0xff] }
  0x25   :  { %290 = vmatpush.bf16.msra.mxu0 %v3568_v5  ;;  %766 = vperm.xlu2 %3620, %v734_v24   ;;  %v739_v29 = vld [vmem:[%s5839_s2 + $0x40] sm:$0xff]  ;;  %v3586_v31 = vld [vmem:[#allocation11 + $0x38] sm:$0xff]  ;;  %v741_v33 = vld [vmem:[%s5839_s2 + $0x50] sm:$0xff] }
  0x26   :  { %761 = vperm.xlu1 %3619, %v733_v30   ;;  %650 = vmatpush.bf16.msra.mxu2 %v3586_v31  ;;  %v735_v32 = vld [vmem:[%s5839_s2 + $0x20] sm:$0xff]  ;;  %v3560_v34 = vld [vmem:[#allocation6 + $0x28] sm:$0xff]  ;;  %v3585_v36 = vld [vmem:[#allocation11 + $0x30] sm:$0xff] }
  0x27   :  { %3595 = vmatpush.bf16.msra.mxu3 %v3586_v31  ;;  %v3552_v35 = vld [vmem:[#allocation3 + $0x28] sm:$0xff]  ;;  %v742_v37 = vld [vmem:[%s5839_s2 + $0x58] sm:$0xff]  ;;  %v731_v40 = vld [vmem:[%s5839_s2] sm:$0xff] }
  0x28   :  { %472 = vmatpush.bf16.msra.mxu1 %v3575_v6  ;;  %v746_v38 = vld [vmem:[%s5839_s2 + $0x78] sm:$0xff]  ;;  %v3584_v39 = vld [vmem:[#allocation11 + $0x28] sm:$0xff]  ;;  %751 = vperm.xlu0 %3618, %v731_v40   ;;  %v3583_v41 = vld [vmem:[#allocation11 + $0x20] sm:$0xff] }
  0x29   :  { %291 = vmatpush.bf16.msra.mxu0 %v3567_v7  ;;  %v732_v42 = vld [vmem:[%s5839_s2 + $0x8] sm:$0xff]  ;;  %v3561_v43 = vld [vmem:[#allocation6 + $0x30] sm:$0xff]  ;;  %v743_v44 = vld [vmem:[%s5839_s2 + $0x60] sm:$0xff] }
  0x2a   :  { %651 = vmatpush.bf16.msra.mxu2 %v3585_v36  ;;  %v3582_v45 = vld [vmem:[#allocation11 + $0x18] sm:$0xff]  ;;  %v3581_v46 = vld [vmem:[#allocation11 + $0x10] sm:$0xff]  ;;  %v736_v47 = vld [vmem:[%s5839_s2 + $0x28] sm:$0xff] }
  0x2b   :  { %3596 = vmatpush.bf16.msra.mxu3 %v3585_v36  ;;  %v745_v48 = vld [vmem:[%s5839_s2 + $0x70] sm:$0xff]  ;;  %v3580_v49 = vld [vmem:[#allocation11 + $0x8] sm:$0xff]  ;;  %v3579_v50 = vld [vmem:[#allocation11] sm:$0xff] }
  0x2c   :  { %473 = vmatpush.bf16.msra.mxu1 %v3574_v8  ;;  %v3562_v51 = vld [vmem:[#allocation6 + $0x38] sm:$0xff]  ;;  %v3553_v52 = vld [vmem:[#allocation3 + $0x30] sm:$0xff]  ;;  %v740_v54 = vld [vmem:[%s5839_s2 + $0x48] sm:$0xff] }
  0x2d   :  { %292 = vmatpush.bf16.msra.mxu0 %v3566_v9  ;;  %781 = vperm.xlu2 %3620, %v737_v26   ;;  %v738_v53 = vld [vmem:[%s5839_s2 + $0x38] sm:$0xff]  ;;  %v744_v55 = vld [vmem:[%s5839_s2 + $0x68] sm:$0xff]  ;;  %v4233_v58 = vld [vmem:[%s5845_s8] ss:$0 sm:$0xff]  ;;  %s4070_s2 = smov 96  }
  0x2e   :  { %771 = vperm.xlu1 %3619, %v735_v32   ;;  %652 = vmatpush.bf16.msra.mxu2 %v3584_v39  ;;  %v3554_v62 = vld [vmem:[#allocation3 + $0x38] sm:$0xff]  ;;  %v4240_v1 = vld [vmem:[%s5843_s6] ss:$0 sm:$0xff]  ;;  %s4071_s6 = smov 32  }
  0x2f   :  { %3597 = vmatpush.bf16.msra.mxu3 %v3584_v39 }
  0x30   :  { %474 = vmatpush.bf16.msra.mxu1 %v3573_v10  ;;  %756 = vperm.xlu0 %3618, %v732_v42  }
  0x31   :  { %293 = vmatpush.bf16.msra.mxu0 %v3565_v11 }
  0x32   :  { %653 = vmatpush.bf16.msra.mxu2 %v3583_v41 }
  0x33   :  { %3598 = vmatpush.bf16.msra.mxu3 %v3583_v41 }
  0x34   :  { %475 = vmatpush.bf16.msra.mxu1 %v3572_v12 }
  0x35   :  { %294 = vmatpush.bf16.msra.mxu0 %v3564_v13  ;;  %791 = vperm.xlu2 %3620, %v739_v29  }
  0x36   :  { %826 = vperm.xlu1 %3619, %v746_v38   ;;  %654 = vmatpush.bf16.msra.mxu2 %v3582_v45 }
  0x37   :  { %3599 = vmatpush.bf16.msra.mxu3 %v3582_v45 }
  0x38   :  { %476 = vmatpush.bf16.msra.mxu1 %v3571_v14  ;;  %776 = vperm.xlu0 %3618, %v736_v47  }
  0x39   :  { %295 = vmatpush.bf16.msra.mxu0 %v3563_v15 }
  0x3a   :  { %655 = vmatpush.bf16.msra.mxu2 %v3581_v46 }
  0x3b   :  { %477 = vmatmul.bf16.vlgmr.msra.gmra.mxu1 %v3555_v16  ;;  %3600 = vmatpush.bf16.msra.mxu3 %v3581_v46 }
  0x3c   :  { %296 = vmatmul.bf16.vlgmr.msra.gmra.mxu0 %v3547_v17 }
  0x3d   :  { %801 = vperm.xlu2 %3620, %v741_v33  }
  0x3e   :  { %656 = vmatpush.bf16.msra.mxu2 %v3580_v49 }
  0x3f   :  { %3601 = vmatpush.bf16.msra.mxu3 %v3580_v49 }
  0x40   :  { %786 = vperm.xlu0 %3618, %v738_v53  }
  0x42   :  { %657 = vmatpush.bf16.msra.mxu2 %v3579_v50 }
  0x43   :  { %3602 = vmatpush.bf16.msra.mxu3 %v3579_v50 }
  0x45   :  { %806 = vperm.xlu2 %3620, %v742_v37  }
  0x48   :  { %796 = vperm.xlu0 %3618, %v740_v54  }
  0x4b   :  { %482 = vmatmul.bf16.gmra.mxu1 %v3556_v18 }
  0x4c   :  { %301 = vmatmul.bf16.gmra.mxu0 %v3548_v19 }
  0x4d   :  { %811 = vperm.xlu2 %3620, %v743_v44  }
  0x50   :  { %816 = vperm.xlu0 %3618, %v744_v55  }
  0x55   :  { %821 = vperm.xlu2 %3620, %v745_v48  }
  0x5b   :  { %487 = vmatmul.bf16.gmra.mxu1 %v3557_v20 }
  0x5c   :  { %306 = vmatmul.bf16.gmra.mxu0 %v3549_v21 }
  0x6b   :  { %492 = vmatmul.bf16.gmra.mxu1 %v3558_v22 }
  0x6c   :  { %311 = vmatmul.bf16.gmra.mxu0 %v3550_v23 }
  0x7b   :  { %497 = vmatmul.bf16.gmra.mxu1 %v3559_v27 }
  0x7c   :  { %316 = vmatmul.bf16.gmra.mxu0 %v3551_v28 }
  0x8b   :  { %502 = vmatmul.bf16.gmra.mxu1 %v3560_v34 }
  0x8c   :  { %321 = vmatmul.bf16.gmra.mxu0 %v3552_v35 }
  0x9b   :  { %507 = vmatmul.bf16.gmra.mxu1 %v3561_v43 }
  0x9c   :  { %326 = vmatmul.bf16.gmra.mxu0 %v3553_v52 }
  0xab   :  { %512 = vmatmul.bf16.gmra.mxu1 %v3562_v51 }
  0xac   :  { %331 = vmatmul.bf16.gmra.mxu0 %v3554_v62 }
  0xb8   :  { %v478_v56 = vpop.f32.mrf.mxu1 }
  0xb9   :  { %v297_v57 = vpop.f32.mrf.mxu0  ;;  %v479_v59 = vadd.f32 %v4233_v58, %v478_v56 }
  0xba   :  { %v298_v5 = vadd.f32 %v4240_v1, %v297_v57 }
  0xbb   :  { %v518_v63 = vpack.c.bf16 %v479_v59, %v479_v59 }
  0xbc   :  { %v337_v10 = vmul.f32 0.17677669, %v298_v5  ;;  %v4289_v5 = vpop.permute.xlu2 %766 }
  0xbd   :  { %v570_v3 = vunpack.c.l.b16 %v518_v63 }
  0xbe   :  { %v699_v14 = vpack.c.bf16 %v337_v10, %v337_v10 }
  0xc0   :  { %v480_v60 = vpop.f32.mrf.mxu1  ;;  %v923_v22 = vunpack.c.l.b16 %v699_v14 }
  0xc1   :  { %v299_v61 = vpop.f32.mrf.mxu0  ;;  %v481_v0 = vadd.f32 %v4233_v58, %v480_v60 }
  0xc2   :  { %v300_v7 = vadd.f32 %v4240_v1, %v299_v61 }
  0xc3   :  { %v519_v2 = vpack.c.bf16 %v481_v0, %v481_v0 }
  0xc4   :  { %v338_v11 = vmul.f32 0.17677669, %v300_v7 }
  0xc5   :  { %v571_v4 = vunpack.c.l.b16 %v519_v2 }
  0xc6   :  { %v700_v15 = vpack.c.bf16 %v338_v11, %v338_v11 }
  0xc7   :  { %v4243_v6 = vpack.c.b16 %v571_v4, %v570_v3 }
  0xc8   :  { %v483_v8 = vpop.f32.mrf.mxu1  ;;  %v924_v23 = vunpack.c.l.b16 %v700_v15 }
  0xc9   :  { %v302_v9 = vpop.f32.mrf.mxu0  ;;  %2006 = vrot.lane.b32.xlu1 %v4243_v6, %s4062_s16  ;;  %1449 = vrot.lane.b32.xlu2 %v4243_v6, %s4070_s2  ;;  %v484_v12 = vadd.f32 %v4233_v58, %v483_v8 }
  0xca   :  { %658 = vmatmul.bf16.vlgmr.msra.gmra.mxu2 %v4243_v6  ;;  %v303_v13 = vadd.f32 %v4240_v1, %v302_v9  ;;  %v4257_v30 = vpack.c.b16 %v924_v23, %v923_v22 }
  0xcb   :  { %v520_v16 = vpack.c.bf16 %v484_v12, %v484_v12 }
  0xcc   :  { %v339_v20 = vmul.f32 0.17677669, %v303_v13 }
  0xcd   :  { %v572_v24 = vunpack.c.l.b16 %v520_v16 }
  0xce   :  { %v701_v28 = vpack.c.bf16 %v339_v20, %v339_v20  ;;  %v4306_v20 = vpop.permute.xlu2 %781 }
  0xd0   :  { %v485_v17 = vpop.f32.mrf.mxu1  ;;  %v925_v34 = vunpack.c.l.b16 %v701_v28 }
  0xd1   :  { %v304_v18 = vpop.f32.mrf.mxu0  ;;  %v486_v19 = vadd.f32 %v4233_v58, %v485_v17  ;;  %2563 = vrot.lane.b32.xlu1 %v4243_v6, %s4071_s6 }
  0xd2   :  { %v305_v21 = vadd.f32 %v4240_v1, %v304_v18 }
  0xd3   :  { %v521_v25 = vpack.c.bf16 %v486_v19, %v486_v19 }
  0xd4   :  { %v340_v26 = vmul.f32 0.17677669, %v305_v21 }
  0xd5   :  { %v573_v27 = vunpack.c.l.b16 %v521_v25 }
  0xd6   :  { %v702_v29 = vpack.c.bf16 %v340_v26, %v340_v26 }
  0xd7   :  { %v4259_v31 = vpack.c.b16 %v573_v27, %v572_v24 }
  0xd8   :  { %v488_v32 = vpop.f32.mrf.mxu1  ;;  %v926_v35 = vunpack.c.l.b16 %v702_v29 }
  0xd9   :  { %v307_v33 = vpop.f32.mrf.mxu0  ;;  %1441 = vrot.lane.b32.xlu1 %v4257_v30, %s4070_s2  ;;  %1451 = vrot.lane.b32.xlu0 %v4259_v31, %s4070_s2  ;;  %v489_v36 = vadd.f32 %v4233_v58, %v488_v32 }
  0xda   :  { %663 = vmatmul.bf16.gmra.mxu2 %v4259_v31  ;;  %2008 = vrot.lane.b32.xlu2 %v4259_v31, %s4062_s16  ;;  %v4269_v37 = vpack.c.b16 %v926_v35, %v925_v34  ;;  %v308_v45 = vadd.f32 %v4240_v1, %v307_v33 }
  0xdb   :  { %v522_v38 = vpack.c.bf16 %v489_v36, %v489_v36 }
  0xdc   :  { %v341_v50 = vmul.f32 0.17677669, %v308_v45  ;;  %v4329_v45 = vpop.permute.xlu2 %791 }
  0xdd   :  { %v574_v42 = vunpack.c.l.b16 %v522_v38 }
  0xde   :  { %v703_v53 = vpack.c.bf16 %v341_v50, %v341_v50 }
  0xe0   :  { %v490_v39 = vpop.f32.mrf.mxu1  ;;  %v927_v60 = vunpack.c.l.b16 %v703_v53 }
  0xe1   :  { %v309_v40 = vpop.f32.mrf.mxu0  ;;  %v491_v41 = vadd.f32 %v4233_v58, %v490_v39  ;;  %1998 = vrot.lane.b32.xlu1 %v4257_v30, %s4062_s16  ;;  %2557 = vrot.lane.b32.xlu0 %v4269_v37, %s4071_s6 }
  0xe2   :  { %v310_v46 = vadd.f32 %v4240_v1, %v309_v40 }
  0xe3   :  { %v523_v43 = vpack.c.bf16 %v491_v41, %v491_v41 }
  0xe4   :  { %v342_v51 = vmul.f32 0.17677669, %v310_v46 }
  0xe5   :  { %v575_v44 = vunpack.c.l.b16 %v523_v43 }
  0xe6   :  { %v704_v54 = vpack.c.bf16 %v342_v51, %v342_v51  ;;  %v949_v51 = vsel %vm935_vm0, %v4243_v6, 0 }
  0xe7   :  { %v588_v47 = vpack.c.b16 %v575_v44, %v574_v42  ;;  %v952_v42 = vsel %vm935_vm0, %v4259_v31, 0 }
  0xe8   :  { %v493_v48 = vpop.f32.mrf.mxu1  ;;  %v928_v62 = vunpack.c.l.b16 %v704_v54 }
  0xe9   :  { %v312_v49 = vpop.f32.mrf.mxu0  ;;  %2555 = vrot.lane.b32.xlu1 %v4257_v30, %s4071_s6  ;;  %1453 = vrot.lane.b32.xlu2 %v588_v47, %s4070_s2  ;;  %v494_v52 = vadd.f32 %v4233_v58, %v493_v48  ;;  %v955_v26 = vsel %vm935_vm0, %v588_v47, 0 }
  0xea   :  { %668 = vmatmul.bf16.gmra.mxu2 %v588_v47  ;;  %2567 = vrot.lane.b32.xlu0 %v588_v47, %s4071_s6  ;;  %v313_v56 = vadd.f32 %v4240_v1, %v312_v49  ;;  %v4291_v8 = vpack.c.b16 %v928_v62, %v927_v60 }
  0xeb   :  { %v524_v55 = vpack.c.bf16 %v494_v52, %v494_v52 }
  0xec   :  { %v343_v3 = vmul.f32 0.17677669, %v313_v56 }
  0xed   :  { %v576_v0 = vunpack.c.l.b16 %v524_v55 }
  0xee   :  { %v705_v10 = vpack.c.bf16 %v343_v3, %v343_v3 }
  0xf0   :  { %v495_v57 = vpop.f32.mrf.mxu1  ;;  %v929_v17 = vunpack.c.l.b16 %v705_v10 }
  0xf1   :  { %v314_v59 = vpop.f32.mrf.mxu0  ;;  %v496_v61 = vadd.f32 %v4233_v58, %v495_v57  ;;  %2565 = vrot.lane.b32.xlu1 %v4259_v31, %s4071_s6  ;;  %2010 = vrot.lane.b32.xlu2 %v588_v47, %s4062_s16  ;;  %v4344_v57 = vpop.permute.xlu2 %801 }
  0xf2   :  { %v315_v63 = vadd.f32 %v4240_v1, %v314_v59 }
  0xf3   :  { %v525_v2 = vpack.c.bf16 %v496_v61, %v496_v61 }
  0xf4   :  { %v344_v4 = vmul.f32 0.17677669, %v315_v63 }
  0xf5   :  { %v577_v7 = vunpack.c.l.b16 %v525_v2 }
  0xf6   :  { %v706_v11 = vpack.c.bf16 %v344_v4, %v344_v4  ;;  %v4360_v4 = vpop.permute.xlu1 %761 }
  0xf7   :  { %v4293_v9 = vpack.c.b16 %v577_v7, %v576_v0 }
  0xf8   :  { %v498_v12 = vpop.f32.mrf.mxu1  ;;  %v930_v18 = vunpack.c.l.b16 %v706_v11 }
  0xf9   :  { %v317_v13 = vpop.f32.mrf.mxu0  ;;  %1443 = vrot.lane.b32.xlu1 %v4269_v37, %s4070_s2  ;;  %v958_v14 = vsel %vm935_vm0, %v4293_v9, 0  ;;  %2002 = vrot.lane.b32.xlu2 %v4291_v8, %s4062_s16  ;;  %v499_v16 = vadd.f32 %v4233_v58, %v498_v12  ;;  %v4358_v3 = vpop.permute.xlu2 %806 }
  0xfa   :  { %673 = vmatmul.bf16.gmra.mxu2 %v4293_v9  ;;  %964 = vmatpush.bf16.xpose.msrb.mxu3 %v958_v14  ;;  %v318_v15 = vadd.f32 %v4240_v1, %v317_v13  ;;  %v4308_v22 = vpack.c.b16 %v930_v18, %v929_v17 }
  0xfb   :  { %2012 = vrot.lane.b32.xlu0 %v4293_v9, %s4062_s16  ;;  %v526_v21 = vpack.c.bf16 %v499_v16, %v499_v16 }
  0xfc   :  { %v345_v19 = vmul.f32 0.17677669, %v318_v15 }
  0xfd   :  { %v578_v29 = vunpack.c.l.b16 %v526_v21 }
  0xfe   :  { %v707_v27 = vpack.c.bf16 %v345_v19, %v345_v19  ;;  %v4371_v18 = vpop.permute.xlu1 %771  ;;  %v4381_v19 = vpop.permute.xlu0 %751 }
 0x100   :  { %v500_v23 = vpop.f32.mrf.mxu1  ;;  %v997_v35 = vunpack.c.l.b16 %v707_v27 }
 0x101   :  { %v319_v24 = vpop.f32.mrf.mxu0  ;;  %v501_v25 = vadd.f32 %v4233_v58, %v500_v23  ;;  %2000 = vrot.lane.b32.xlu1 %v4269_v37, %s4062_s16  ;;  %2004 = vrot.lane.b32.xlu2 %v4308_v22, %s4062_s16  ;;  %v4369_v16 = vpop.permute.xlu2 %811 }
 0x102   :  { %v320_v28 = vadd.f32 %v4240_v1, %v319_v24  ;;  %965 = vmatpush.bf16.xpose.msrb.mxu3 %v955_v26 }
 0x103   :  { %v527_v32 = vpack.c.bf16 %v501_v25, %v501_v25  ;;  %1447 = vrot.lane.b32.xlu0 %v4308_v22, %s4070_s2 }
 0x104   :  { %v346_v33 = vmul.f32 0.17677669, %v320_v28 }
 0x105   :  { %v579_v34 = vunpack.c.l.b16 %v527_v32 }
 0x106   :  { %v708_v36 = vpack.c.bf16 %v346_v33, %v346_v33  ;;  %v4390_v27 = vpop.permute.xlu1 %826 }
 0x107   :  { %v4319_v38 = vpack.c.b16 %v579_v34, %v578_v29  ;;  %v4394_v34 = vpop.permute.xlu0 %756 }
 0x108   :  { %v998_v39 = vunpack.c.l.b16 %v708_v36  ;;  %v503_v40 = vpop.f32.mrf.mxu1 }
 0x109   :  { %v322_v41 = vpop.f32.mrf.mxu0  ;;  %678 = vmatmul.bf16.vlgmr.msra.gmra.mxu3 %v4319_v38  ;;  %1445 = vrot.lane.b32.xlu1 %v4291_v8, %s4070_s2  ;;  %v504_v46 = vadd.f32 %v4233_v58, %v503_v40  ;;  %v4386_v26 = vpop.permute.xlu2 %821 }
 0x10a   :  { %v4326_v43 = vpack.c.b16 %v998_v39, %v997_v35  ;;  %v323_v44 = vadd.f32 %v4240_v1, %v322_v41  ;;  %966 = vmatpush.bf16.xpose.msrb.mxu3 %v952_v42 }
 0x10b   :  { %2561 = vrot.lane.b32.xlu0 %v4308_v22, %s4071_s6  ;;  %v528_v48 = vpack.c.bf16 %v504_v46, %v504_v46 }
 0x10c   :  { %2624 = vrot.lane.b32.xlu2 %v4326_v43, %s4071_s6  ;;  %v347_v47 = vmul.f32 0.17677669, %v323_v44 }
 0x10d   :  { %v580_v54 = vunpack.c.l.b16 %v528_v48 }
 0x10e   :  { %v709_v52 = vpack.c.bf16 %v347_v47, %v347_v47 }
 0x10f   :  { %v4405_v41 = vpop.permute.xlu0 %776 }
 0x110   :  { %v505_v49 = vpop.f32.mrf.mxu1  ;;  %v999_v60 = vunpack.c.l.b16 %v709_v52 }
 0x111   :  { %v324_v50 = vpop.f32.mrf.mxu0  ;;  %v506_v31 = vadd.f32 %v4233_v58, %v505_v49  ;;  %2559 = vrot.lane.b32.xlu1 %v4291_v8, %s4071_s6 }
 0x112   :  { %v325_v53 = vadd.f32 %v4240_v1, %v324_v50  ;;  %967 = vmatpush.bf16.xpose.msrb.mxu3 %v949_v51 }
 0x113   :  { %v529_v55 = vpack.c.bf16 %v506_v31, %v506_v31  ;;  %1518 = vrot.lane.b32.xlu0 %v4319_v38, %s4070_s2 }
 0x114   :  { %v348_v56 = vmul.f32 0.17677669, %v325_v53 }
 0x115   :  { %v581_v59 = vunpack.c.l.b16 %v529_v55 }
 0x116   :  { %v710_v61 = vpack.c.bf16 %v348_v56, %v348_v56 }
 0x117   :  { %v4346_v62 = vpack.c.b16 %v581_v59, %v580_v54  ;;  %v4426_v56 = vpop.permute.xlu0 %786 }
 0x118   :  { %v1000_v63 = vunpack.c.l.b16 %v710_v61  ;;  %v508_v0 = vpop.f32.mrf.mxu1 }
 0x119   :  { %683 = vmatmul.bf16.gmra.mxu3 %v4346_v62  ;;  %1455 = vrot.lane.b32.xlu1 %v4293_v9, %s4070_s2  ;;  %v509_v2 = vadd.f32 %v4233_v58, %v508_v0  ;;  %v327_v21 = vpop.f32.mrf.mxu0  ;;  %v1025_v31 = vsel %vm935_vm0, %v4346_v62, 0 }
 0x11a   :  { %v4351_v6 = vpack.c.b16 %v1000_v63, %v999_v60  ;;  %v328_v48 = vadd.f32 %v4240_v1, %v327_v21 }
 0x11b   :  { %1510 = vrot.lane.b32.xlu0 %v4326_v43, %s4070_s2  ;;  %v530_v7 = vpack.c.bf16 %v509_v2, %v509_v2 }
 0x11c   :  { %2069 = vrot.lane.b32.xlu2 %v4351_v6, %s4062_s16  ;;  %v349_v52 = vmul.f32 0.17677669, %v328_v48 }
 0x11d   :  { %v582_v12 = vunpack.c.l.b16 %v530_v7 }
 0x11e   :  { %v711_v63 = vpack.c.bf16 %v349_v52, %v349_v52 }
 0x120   :  { %v510_v10 = vpop.f32.mrf.mxu1 }
 0x121   :  { %v511_v11 = vadd.f32 %v4233_v58, %v510_v10  ;;  %2569 = vrot.lane.b32.xlu1 %v4293_v9, %s4071_s6 }
 0x123   :  { %v531_v13 = vpack.c.bf16 %v511_v11, %v511_v11  ;;  %2077 = vrot.lane.b32.xlu0 %v4346_v62, %s4062_s16  ;;  %v4403_v39 = vpop.permute.xlu2 %1449  ;;  %v1001_v11 = vunpack.c.l.b16 %v711_v63 }
 0x125   :  { %v583_v14 = vunpack.c.l.b16 %v531_v13 }
 0x127   :  { %v4367_v15 = vpack.c.b16 %v583_v14, %v582_v12  ;;  %v4442_v14 = vpop.permute.xlu0 %796 }
 0x128   :  { %v513_v17 = vpop.f32.mrf.mxu1 }
 0x129   :  { %688 = vmatmul.bf16.gmra.mxu3 %v4367_v15  ;;  %2075 = vrot.lane.b32.xlu1 %v4319_v38, %s4062_s16  ;;  %v514_v9 = vadd.f32 %v4233_v58, %v513_v17  ;;  %v1028_v42 = vsel %vm935_vm0, %v4367_v15, 0 }
 0x12a   :  { %2079 = vrot.lane.b32.xlu2 %v4367_v15, %s4062_s16 }
 0x12b   :  { %1512 = vrot.lane.b32.xlu0 %v4351_v6, %s4070_s2  ;;  %v532_v23 = vpack.c.bf16 %v514_v9, %v514_v9 }
 0x12d   :  { %v584_v28 = vunpack.c.l.b16 %v532_v23 }
 0x130   :  { %v515_v24 = vpop.f32.mrf.mxu1 }
 0x131   :  { %v516_v25 = vadd.f32 %v4233_v58, %v515_v24  ;;  %2632 = vrot.lane.b32.xlu1 %v4319_v38, %s4071_s6  ;;  %v329_v58 = vpop.f32.mrf.mxu0  ;;  %v4456_v24 = vpop.permute.xlu0 %816 }
 0x132   :  { %2636 = vrot.lane.b32.xlu2 %v4367_v15, %s4071_s6  ;;  %v330_v49 = vadd.f32 %v4240_v1, %v329_v58 }
 0x133   :  { %v533_v29 = vpack.c.bf16 %v516_v25, %v516_v25  ;;  %2626 = vrot.lane.b32.xlu0 %v4351_v6, %s4071_s6  ;;  %v4461_v25 = vld [vmem:[%s5847_s10] ss:$0 sm:$0xff] }
 0x134   :  { %v4415_v47 = vpop.permute.xlu2 %2008  ;;  %v350_v53 = vmul.f32 0.17677669, %v330_v49 }
 0x135   :  { %v585_v32 = vunpack.c.l.b16 %v533_v29 }
 0x136   :  { %v712_v2 = vpack.c.bf16 %v350_v53, %v350_v53 }
 0x137   :  { %v593_v33 = vpack.c.b16 %v585_v32, %v584_v28 }
 0x139   :  { %693 = vmatmul.bf16.gmra.mxu3 %v593_v33  ;;  %2067 = vrot.lane.b32.xlu1 %v4326_v43, %s4062_s16  ;;  %v1031_v35 = vsel %vm935_vm0, %v593_v33, 0  ;;  %v332_v40 = vpop.f32.mrf.mxu0 }
 0x13a   :  { %1037 = vmatpush.bf16.xpose.msra.mxu3 %v1031_v35  ;;  %1524 = vrot.lane.b32.xlu2 %v593_v33, %s4070_s2  ;;  %v333_v44 = vadd.f32 %v4240_v1, %v332_v40 }
 0x13b   :  { %v4400_v36 = vpop.permute.xlu1 %2006  ;;  %2081 = vrot.lane.b32.xlu0 %v593_v33, %s4062_s16 }
 0x13c   :  { %v351_v50 = vmul.f32 0.17677669, %v333_v44 }
 0x13e   :  { %v713_v54 = vpack.c.bf16 %v351_v50, %v351_v50 }
 0x140   :  { %v1003_v7 = vunpack.c.l.b16 %v713_v54 }
 0x141   :  { %1520 = vrot.lane.b32.xlu1 %v4346_v62, %s4070_s2  ;;  %v334_v51 = vpop.f32.mrf.mxu0 }
 0x142   :  { %1038 = vmatpush.bf16.xpose.msra.mxu3 %v1028_v42  ;;  %v335_v55 = vadd.f32 %v4240_v1, %v334_v51  ;;  %v1022_v1 = vsel %vm935_vm0, %v4319_v38, 0 }
 0x143   :  { %v4412_v46 = vpop.permute.xlu1 %2563  ;;  %2638 = vrot.lane.b32.xlu0 %v593_v33, %s4071_s6  ;;  %v4430_v61 = vpop.permute.xlu2 %1453 }
 0x144   :  { %v352_v60 = vmul.f32 0.17677669, %v335_v55 }
 0x149   :  { %2634 = vrot.lane.b32.xlu1 %v4346_v62, %s4071_s6  ;;  %3451 = vmatmul.msk.bf16.vlgmr.msrb.gmra.mxu3 %vm935_vm0, %v4257_v30  ;;  %v714_v62 = vpack.c.bf16 %v352_v60, %v352_v60  ;;  %v1002_v30 = vunpack.c.l.b16 %v712_v2 }
 0x14a   :  { %1039 = vmatpush.bf16.xpose.msra.mxu3 %v1025_v31 }
 0x14b   :  { %v4428_v59 = vpop.permute.xlu1 %1441  ;;  %v1004_v10 = vunpack.c.l.b16 %v714_v62  ;;  %v4444_v17 = vpack.c.b16 %v1002_v30, %v1001_v11  ;;  %v4446_v21 = vpop.permute.xlu2 %2010 }
 0x14c   :  { %v4471_v40 = vpop.permute.xlu0 %1451 }
 0x14d   :  { %v659_v0 = vpop.f32.mrf.mxu2  ;;  %v4436_v12 = vpack.c.b16 %v1004_v10, %v1003_v7 }
 0x14e   :  { %v660_v54 = vadd.f32 %v4461_v25, %v659_v0 }
 0x14f   :  { %2630 = vrot.lane.b32.xlu0 %v4436_v12, %s4071_s6 }
 0x150   :  { %v715_v62 = vpack.c.bf16 %v660_v54, %v660_v54 }
 0x151   :  { %1522 = vrot.lane.b32.xlu1 %v4367_v15, %s4070_s2 }
 0x152   :  { %1040 = vmatpush.bf16.xpose.msra.mxu3 %v1022_v1 }
 0x153   :  { %v4438_v13 = vpop.permute.xlu1 %1998  ;;  %v4454_v23 = vpop.permute.xlu2 %2002 }
 0x155   :  { %v661_v9 = vpop.f32.mrf.mxu2 }
 0x156   :  { %v662_v52 = vadd.f32 %v4461_v25, %v661_v9 }
 0x158   :  { %v716_v2 = vpack.c.bf16 %v662_v52, %v662_v52 }
 0x159   :  { %1514 = vrot.lane.b32.xlu1 %v4444_v17, %s4070_s2  ;;  %3452 = vmatmul.msk.bf16.gmra.mxu3 %vm935_vm0, %v4269_v37 }
 0x15a   :  { %v1284_v1 = vunpack.c.l.b16 %v716_v2 }
 0x15b   :  { %v4452_v38 = vpop.permute.xlu1 %2555  ;;  %v4469_v58 = vpop.permute.xlu2 %2004 }
 0x15d   :  { %v664_v15 = vpop.f32.mrf.mxu2 }
 0x15e   :  { %v665_v28 = vadd.f32 %v4461_v25, %v664_v15  ;;  %v1283_v15 = vunpack.c.l.b16 %v715_v62 }
 0x160   :  { %v717_v32 = vpack.c.bf16 %v665_v28, %v665_v28 }
 0x161   :  { %2071 = vrot.lane.b32.xlu1 %v4444_v17, %s4062_s16 }
 0x162   :  { %v1285_v42 = vunpack.c.l.b16 %v717_v32 }
 0x163   :  { %v4466_v29 = vpop.permute.xlu1 %2565 }
 0x165   :  { %v666_v37 = vpop.f32.mrf.mxu2 }
 0x166   :  { %v667_v33 = vadd.f32 %v4461_v25, %v666_v37  ;;  %v4483_v31 = vpop.permute.xlu2 %2624 }
 0x168   :  { %v718_v35 = vpack.c.bf16 %v667_v33, %v667_v33 }
 0x169   :  { %2628 = vrot.lane.b32.xlu1 %v4444_v17, %s4071_s6  ;;  %3453 = vmatmul.msk.bf16.gmra.mxu3 %vm935_vm0, %v4291_v8  ;;  %v4489_v8 = vpop.permute.xlu0 %2557 }
 0x16a   :  { %v1286_v44 = vunpack.c.l.b16 %v718_v35 }
 0x16b   :  { %v4477_v48 = vpop.permute.xlu1 %1443 }
 0x16c   :  { %v4479_v49 = vpack.c.b16 %v1286_v44, %v1285_v42 }
 0x16d   :  { %v669_v50 = vpop.f32.mrf.mxu2 }
 0x16e   :  { %5881 = vst [vmem:[#allocation20_spill] sm:$0xff] %v4479_v49  ;;  %1793 = vrot.lane.b32.xlu2 %v4479_v49, %s4070_s2  ;;  %v670_v51 = vadd.f32 %v4461_v25, %v669_v50 }
 0x170   :  { %v719_v60 = vpack.c.bf16 %v670_v51, %v670_v51 }
 0x171   :  { %1516 = vrot.lane.b32.xlu1 %v4436_v12, %s4070_s2  ;;  %v4505_v28 = vpop.permute.xlu0 %2567 }
 0x172   :  { %v1287_v10 = vunpack.c.l.b16 %v719_v60 }
 0x173   :  { %v4491_v53 = vpop.permute.xlu1 %2000 }
 0x175   :  { %v671_v55 = vpop.f32.mrf.mxu2 }
 0x176   :  { %v672_v63 = vadd.f32 %v4461_v25, %v671_v55  ;;  %v4499_v30 = vpop.permute.xlu2 %2069 }
 0x178   :  { %v720_v7 = vpack.c.bf16 %v672_v63, %v672_v63 }
 0x179   :  { %2073 = vrot.lane.b32.xlu1 %v4436_v12, %s4062_s16  ;;  %3454 = vmatmul.msk.bf16.gmra.mxu3 %vm935_vm0, %v4308_v22  ;;  %v4511_v22 = vpack.c.b16 %v1284_v1, %v1283_v15  ;;  %v2013_v42 = vpop.permute.xlu0 %2012  ;;  %v1476_v1 = vsel %vm935_vm0, %v4430_v61, 0 }
 0x17a   :  { %v1288_v11 = vunpack.c.l.b16 %v720_v7 }
 0x17b   :  { %v4501_v9 = vpop.permute.xlu1 %1445  ;;  %5883 = vst [vmem:[#allocation22_spill] sm:$0xff] %v4511_v22 }
 0x17c   :  { %v4503_v0 = vpack.c.b16 %v1288_v11, %v1287_v10 }
 0x17d   :  { %v674_v37 = vpop.f32.mrf.mxu2 }
 0x17e   :  { %5882 = vst [vmem:[#allocation21_spill] sm:$0xff] %v4503_v0  ;;  %2352 = vrot.lane.b32.xlu0 %v4503_v0, %s4062_s16  ;;  %1795 = vrot.lane.b32.xlu2 %v4503_v0, %s4070_s2  ;;  %v675_v32 = vadd.f32 %v4461_v25, %v674_v37 }
 0x180   :  { %v721_v50 = vpack.c.bf16 %v675_v32, %v675_v32 }
 0x181   :  { %1791 = vrot.lane.b32.xlu1 %v4511_v22, %s4070_s2  ;;  %v4535_v10 = vpop.permute.xlu0 %1447 }
 0x182   :  { %v1289_v54 = vunpack.c.l.b16 %v721_v50  ;;  %v1473_v50 = vsel %vm935_vm0, %v4471_v40, 0 }
 0x183   :  { %v4516_v33 = vpop.permute.xlu1 %2559 }
 0x184   :  { %v4518_v35 = vpop.permute.xlu2 %2079 }
 0x185   :  { %v676_v44 = vpop.f32.mrf.mxu2 }
 0x186   :  { %v677_v51 = vadd.f32 %v4461_v25, %v676_v44 }
 0x188   :  { %v722_v52 = vpack.c.bf16 %v677_v51, %v677_v51 }
 0x189   :  { %2350 = vrot.lane.b32.xlu1 %v4479_v49, %s4062_s16  ;;  %3455 = vmatmul.msk.bf16.vlgmr.msra.gmra.mxu3 %vm935_vm0, %v4326_v43  ;;  %v4548_v32 = vpop.permute.xlu0 %2561 }
 0x18a   :  { %v1290_v55 = vunpack.c.l.b16 %v722_v52 }
 0x18b   :  { %v1456_v60 = vpop.permute.xlu1 %1455 }
 0x18c   :  { %v4525_v63 = vpack.c.b16 %v1290_v55, %v1289_v54  ;;  %v4527_v2 = vpop.f32.mrf.mxu3  ;;  %v1479_v7 = vsel %vm935_vm0, %v1456_v60, 0  ;;  %v4530_v62 = vpop.permute.xlu2 %2636  ;;  %v2036_v60 = vsel %vm935_vm0, %v2013_v42, 0  ;;  %v2033_v42 = vsel %vm935_vm0, %v4446_v21, 0 }
 0x18d   :  { %1485 = vmatpush.bf16.xpose.msrb.mxu2 %v1479_v7 }
 0x18e   :  { %5884 = vst [vmem:[#allocation23_spill] sm:$0xff] %v4525_v63  ;;  %1315 = vmatpush.bf16.msrb.mxu0 %v4525_v63  ;;  %1797 = vrot.lane.b32.xlu0 %v4525_v63, %s4070_s2 }
 0x191   :  { %v4556_v52 = vpop.permute.xlu0 %1518 }
 0x192   :  { %1316 = vmatpush.bf16.msrb.mxu0 %v4503_v0 }
 0x193   :  { %v2570_v43 = vpop.permute.xlu1 %2569 }
 0x194   :  { %v4538_v11 = vpop.f32.mrf.mxu3  ;;  %v1525_v15 = vpop.permute.xlu2 %1524 }
 0x195   :  { %1486 = vmatpush.bf16.xpose.msrb.mxu2 %v1476_v1  ;;  %v1548_v37 = vsel %vm935_vm0, %v1525_v15, 0 }
 0x196   :  { %1317 = vmatpush.bf16.msrb.mxu0 %v4479_v49  ;;  %2354 = vrot.lane.b32.xlu0 %v4525_v63, %s4062_s16 }
 0x197   :  { %1554 = vmatpush.bf16.xpose.msrb.mxu3 %v1548_v37 }
 0x199   :  { %3456 = vmatmul.msk.bf16.gmra.mxu3 %vm935_vm0, %v4351_v6  ;;  %v1470_v6 = vsel %vm935_vm0, %v4403_v39, 0  ;;  %v4572_v39 = vpop.permute.xlu0 %1510 }
 0x19a   :  { %1318 = vmatpush.bf16.msrb.mxu0 %v4511_v22 }
 0x19b   :  { %v4551_v44 = vpop.permute.xlu1 %2075 }
 0x19c   :  { %v684_v61 = vpop.f32.mrf.mxu3 }
 0x19d   :  { %1487 = vmatpush.bf16.xpose.msrb.mxu2 %v1473_v50  ;;  %v685_v51 = vadd.f32 %v4461_v25, %v684_v61 }
 0x19f   :  { %v725_v7 = vpack.c.bf16 %v685_v51, %v685_v51 }
 0x1a1   :  { %v1370_v40 = vunpack.c.l.b16 %v725_v7  ;;  %v2030_v7 = vsel %vm935_vm0, %v4415_v47, 0  ;;  %v2027_v47 = vsel %vm935_vm0, %v4400_v36, 0  ;;  %v4607_v36 = vld [vmem:[%s5840_s3] ss:$0 sm:$0xff] }
 0x1a3   :  { %v4558_v54 = vpop.permute.xlu1 %2632 }
 0x1a4   :  { %v686_v55 = vpop.f32.mrf.mxu3 }
 0x1a5   :  { %v687_v1 = vadd.f32 %v4461_v25, %v686_v55  ;;  %1488 = vmatpush.bf16.xpose.msrb.mxu2 %v1470_v6 }
 0x1a7   :  { %v726_v15 = vpack.c.bf16 %v687_v1, %v687_v1 }
 0x1a9   :  { %v1371_v37 = vunpack.c.l.b16 %v726_v15  ;;  %3457 = vmatmul.msk.bf16.gmra.mxu3 %vm935_vm0, %v4444_v17 }
 0x1ab   :  { %v4566_v61 = vpack.c.b16 %v1371_v37, %v1370_v40  ;;  %v4568_v50 = vpop.permute.xlu1 %2067 }
 0x1ac   :  { %v689_v49 = vpop.f32.mrf.mxu3  ;;  %3467 = vmatmul.msk.bf16.vlgmr.msrb.gmra.mxu2 %vm935_vm0, %v4428_v59  ;;  %v4582_v59 = vpop.permute.xlu0 %2077 }
 0x1ad   :  { %2042 = vmatpush.bf16.xpose.msra.mxu2 %v2036_v60  ;;  %5885 = vst [vmem:[#allocation24_spill] sm:$0xff] %v4566_v61  ;;  %1866 = vrot.lane.b32.xlu2 %v4566_v61, %s4070_s2  ;;  %v690_v51 = vadd.f32 %v4461_v25, %v689_v49 }
 0x1af   :  { %v727_v6 = vpack.c.bf16 %v690_v51, %v690_v51 }
 0x1b1   :  { %v1372_v15 = vunpack.c.l.b16 %v727_v6 }
 0x1b3   :  { %v1521_v17 = vpop.permute.xlu1 %1520 }
 0x1b4   :  { %v691_v55 = vpop.f32.mrf.mxu3  ;;  %v4597_v51 = vpop.permute.xlu0 %1512 }
 0x1b5   :  { %2043 = vmatpush.bf16.xpose.msra.mxu2 %v2033_v42  ;;  %v692_v60 = vadd.f32 %v4461_v25, %v691_v55  ;;  %v2593_v42 = vsel %vm935_vm0, %v2570_v43, 0 }
 0x1b7   :  { %v728_v1 = vpack.c.bf16 %v692_v60, %v692_v60 }
 0x1b9   :  { %v1373_v21 = vunpack.c.l.b16 %v728_v1  ;;  %3458 = vmatmul.msk.bf16.gmra.mxu3 %vm935_vm0, %v4436_v12  ;;  %v2590_v1 = vsel %vm935_vm0, %v4505_v28, 0 }
 0x1bb   :  { %v4586_v40 = vpack.c.b16 %v1373_v21, %v1372_v15  ;;  %v4588_v49 = vpop.permute.xlu1 %2634  ;;  %v836_v15 = vmul.f32 %v4607_v36, %v4394_v34  ;;  %v1542_v34 = vsel %vm935_vm0, %v1521_v17, 0 }
 0x1bc   :  { %v694_v37 = vpop.f32.mrf.mxu3  ;;  %3468 = vmatmul.msk.bf16.gmra.mxu2 %vm935_vm0, %v4477_v48 }
 0x1bd   :  { %2044 = vmatpush.bf16.xpose.msra.mxu2 %v2030_v7  ;;  %5886 = vst [vmem:[#allocation25_spill] sm:$0xff] %v4586_v40  ;;  %1868 = vrot.lane.b32.xlu1 %v4586_v40, %s4070_s2  ;;  %v695_v12 = vadd.f32 %v4461_v25, %v694_v37  ;;  %vm852_vm1 = vcmp.ne.f32.partialorder %v836_v15, 0.0  ;;  %v1539_v15 = vsel %vm935_vm0, %v4556_v52, 0 }
 0x1bf   :  { %v729_v7 = vpack.c.bf16 %v695_v12, %v695_v12 }
 0x1c1   :  { %v1374_v21 = vunpack.c.l.b16 %v729_v7 }
 0x1c3   :  { %v1523_v55 = vpop.permute.xlu1 %1522 }
 0x1c4   :  { %v696_v6 = vpop.f32.mrf.mxu3  ;;  %v1545_v60 = vsel %vm935_vm0, %v1523_v55, 0  ;;  %v680_v55 = vadd.f32 %v4461_v25, %v4527_v2 }
 0x1c5   :  { %2045 = vmatpush.bf16.xpose.msra.mxu2 %v2027_v47  ;;  %v697_v48 = vadd.f32 %v4461_v25, %v696_v6  ;;  %1555 = vmatpush.bf16.xpose.msrb.mxu3 %v1545_v60  ;;  %v682_v47 = vadd.f32 %v4461_v25, %v4538_v11  ;;  %v2587_v11 = vsel %vm935_vm0, %v4466_v29, 0  ;;  %v4072_v60 = vmov -1e+30  }
 0x1c6   :  { %v868_v25 = vsel %vm852_vm1, 0.0, %v4072_v60  ;;  %v723_v2 = vpack.c.bf16 %v680_v55, %v680_v55 }
 0x1c7   :  { %v730_v43 = vpack.c.bf16 %v697_v48, %v697_v48  ;;  %v724_v6 = vpack.c.bf16 %v682_v47, %v682_v47  ;;  %v2584_v47 = vsel %vm935_vm0, %v4412_v46, 0  ;;  %v885_v46 = vld [vmem:[%s5841_s4 + $0x10] sm:$0xff] }
 0x1c9   :  { %v1375_v37 = vunpack.c.l.b16 %v730_v43  ;;  %v1369_v48 = vunpack.c.l.b16 %v724_v6  ;;  %v2102_v6 = vsel %vm935_vm0, %v4518_v35, 0  ;;  %v2099_v35 = vsel %vm935_vm0, %v4582_v59, 0 }
 0x1cb   :  { %v4615_v12 = vpack.c.b16 %v1375_v37, %v1374_v21  ;;  %v837_v21 = vmul.f32 %v4607_v36, %v4360_v4  ;;  %v4652_v52 = vpop.permute.xlu1 %1514 }
 0x1cc   :  { %v4617_v28 = vpop.f32.mrf.mxu3  ;;  %3469 = vmatmul.msk.bf16.gmra.mxu2 %vm935_vm0, %v4501_v9  ;;  %v884_v9 = vld [vmem:[%s5841_s4 + $0x8] sm:$0xff] }
 0x1cd   :  { %2599 = vmatpush.bf16.xpose.msrb.mxu2 %v2593_v42  ;;  %v4613_v42 = vpop.permute.xlu0 %2626  ;;  %5887 = vst [vmem:[#allocation26_spill] sm:$0xff] %v4615_v12  ;;  %1400 = vmatpush.bf16.msrb.mxu1 %v4615_v12  ;;  %v4634_v7 = vadd.f32 %v884_v9, %v868_v25  ;;  %vm853_vm3 = vcmp.ne.f32.partialorder %v837_v21, 0.0  ;;  %v839_v25 = vmul.f32 %v4607_v36, %v4371_v18  ;;  %v887_v18 = vld [vmem:[%s5841_s4 + $0x20] sm:$0xff] }
 0x1ce   :  { %1870 = vrot.lane.b32.xlu2 %v4615_v12, %s4070_s2  ;;  %1556 = vmatpush.bf16.xpose.msrb.mxu3 %v1542_v34 }
 0x1cf   :  { %vm855_vm4 = vcmp.ne.f32.partialorder %v839_v25, 0.0 }
 0x1d1   :  { %1401 = vmatpush.bf16.msrb.mxu1 %v4586_v40 }
 0x1d4   :  { %v971_v17 = vpop.f32.mrf.mxu3 }
 0x1d5   :  { %2600 = vmatpush.bf16.xpose.msrb.mxu2 %v2590_v1  ;;  %v1368_v1 = vunpack.c.l.b16 %v723_v2  ;;  %v2082_v43 = vpop.permute.xlu0 %2081  ;;  %v4637_v29 = vadd.f32 %v971_v17, %v4634_v7  ;;  %1402 = vmatpush.bf16.msrb.mxu1 %v4566_v61  ;;  %v4671_v2 = vpop.permute.xlu1 %2071  ;;  %v835_v17 = vmul.f32 %v4607_v36, %v4381_v19  ;;  %v883_v19 = vld [vmem:[%s5841_s4] sm:$0xff] }
 0x1d6   :  { %v2105_v37 = vsel %vm935_vm0, %v2082_v43, 0  ;;  %1557 = vmatpush.bf16.xpose.msrb.mxu3 %v1539_v15  ;;  %v871_v43 = vsel %vm855_vm4, 0.0, %v4072_v60  ;;  %vm2538_vm4 = vcmask 785920  }
 0x1d7   :  { %v4647_v55 = vpack.c.b16 %v1369_v48, %v1368_v1  ;;  %v1066_v34 = vsel %vm1062_vm2, %v4637_v29, -inf  ;;  %vm851_vm5 = vcmp.ne.f32.partialorder %v835_v17, 0.0  ;;  %v4683_v15 = vadd.f32 %v887_v18, %v871_v43 }
 0x1d8   :  { %1067 = vmax.xlane.f32.xlu0 %v1066_v34  ;;  %v867_v59 = vsel %vm851_vm5, 0.0, %v4072_v60  ;;  %v840_v17 = vmul.f32 %v4607_v36, %v4405_v41  ;;  %v842_v43 = vmul.f32 %v4607_v36, %v4426_v56  ;;  %v888_v41 = vld [vmem:[%s5841_s4 + $0x28] sm:$0xff]  ;;  %vm3095_vm5 = vcmask 1048320  }
 0x1d9   :  { %1403 = vmatpush.bf16.msrb.mxu1 %v4647_v55 }
 0x1da   :  { %vm856_vm7 = vcmp.ne.f32.partialorder %v840_v17, 0.0  ;;  %vm858_vm8 = vcmp.ne.f32.partialorder %v842_v43, 0.0 }
 0x1dc   :  { %v974_v4 = vpop.f32.mrf.mxu3  ;;  %3470 = vmatmul.msk.bf16.gmra.mxu2 %vm935_vm0, %v4535_v10 }
 0x1dd   :  { %2601 = vmatpush.bf16.xpose.msrb.mxu2 %v2587_v11  ;;  %v869_v11 = vsel %vm853_vm3, 0.0, %v4072_v60  ;;  %3471 = vmatmul.msk.bf16.vlgmr.msrb.gmra.mxu3 %vm935_vm0, %v4572_v39  ;;  %v2639_v39 = vpop.permute.xlu0 %2638  ;;  %v4698_v34 = vpop.permute.xlu1 %2628 }
 0x1de   :  { %2111 = vmatpush.bf16.xpose.msra.mxu3 %v2105_v37  ;;  %v4664_v9 = vadd.f32 %v885_v46, %v869_v11  ;;  %v838_v37 = vmul.f32 %v4607_v36, %v4289_v5  ;;  %v4704_v11 = vadd.f32 %v883_v19, %v867_v59  ;;  %v872_v59 = vsel %vm856_vm7, 0.0, %v4072_v60 }
 0x1e0   :  { %v4669_v10 = vadd.f32 %v974_v4, %v4664_v9  ;;  %v2096_v4 = vsel %vm935_vm0, %v4551_v44, 0  ;;  %vm854_vm6 = vcmp.ne.f32.partialorder %v838_v37, 0.0  ;;  %v886_v44 = vld [vmem:[%s5841_s4 + $0x18] sm:$0xff] }
 0x1e2   :  { %v1069_v1 = vsel %vm1062_vm2, %v4669_v10, -inf }
 0x1e4   :  { %v976_v48 = vpop.f32.mrf.mxu3 }
 0x1e5   :  { %2602 = vmatpush.bf16.xpose.msrb.mxu2 %v2584_v47  ;;  %v4702_v46 = vpop.permute.xlu0 %2630 }
 0x1e6   :  { %2112 = vmatpush.bf16.xpose.msra.mxu3 %v2102_v6  ;;  %v870_v6 = vsel %vm854_vm6, 0.0, %v4072_v60 }
 0x1e7   :  { %1070 = vmax.xlane.f32.xlu1 %v1069_v1  ;;  %v1517_v1 = vpop.permute.xlu1 %1516 }
 0x1ec   :  { %v979_v21 = vpop.f32.mrf.mxu3  ;;  %3483 = vmatmul.msk.bf16.vlgmr.msra.gmra.mxu2 %vm935_vm0, %v4438_v13  ;;  %v2662_v13 = vsel %vm935_vm0, %v2639_v39, 0 }
 0x1ed   :  { %v4694_v47 = vadd.f32 %v979_v21, %v4683_v15  ;;  %3472 = vmatmul.msk.bf16.gmra.mxu3 %vm935_vm0, %v4597_v51  ;;  %v4711_v51 = vadd.f32 %v4617_v28, %v4704_v11  ;;  %v2659_v28 = vsel %vm935_vm0, %v4530_v62, 0  ;;  %v1794_v21 = vpop.permute.xlu2 %1793  ;;  %v841_v62 = vmul.f32 %v4607_v36, %v4306_v20  ;;  %v890_v20 = vld [vmem:[%s5841_s4 + $0x38] sm:$0xff] }
 0x1ee   :  { %2113 = vmatpush.bf16.xpose.msra.mxu3 %v2099_v35  ;;  %v4721_v35 = vadd.f32 %v886_v44, %v870_v6  ;;  %v874_v36 = vsel %vm858_vm8, 0.0, %v4072_v60 }
 0x1ef   :  { %v1075_v5 = vsel %vm1062_vm2, %v4694_v47, -inf  ;;  %v1063_v39 = vsel %vm1062_vm2, %v4711_v51, -inf  ;;  %vm857_vm9 = vcmp.ne.f32.partialorder %v841_v62, 0.0  ;;  %v4762_v44 = vpop.permute.xlu1 %2073  ;;  %v4764_v6 = vadd.f32 %v890_v20, %v874_v36  ;;  %v891_v62 = vld [vmem:[%s5841_s4 + $0x40] sm:$0xff] }
 0x1f0   :  { %1076 = vmax.xlane.f32.xlu0 %v1075_v5  ;;  %5888 = vst [vmem:[#allocation27_spill] sm:$0xff] %v4721_v35  ;;  %v4725_v18 = vpop.permute.xlu0 %2352  ;;  %v4730_v19 = vadd.f32 %v976_v48, %v4721_v35  ;;  %v4747_v48 = vld [vmem:[%s5840_s3 + $0x1] ss:$0 sm:$0xff]  ;;  %v873_v17 = vsel %vm857_vm9, 0.0, %v4072_v60 }
 0x1f2   :  { %v1072_v56 = vsel %vm1062_vm2, %v4730_v19, -inf }
 0x1f4   :  { %v981_v25 = vpop.f32.mrf.mxu3 }
 0x1f6   :  { %2114 = vmatpush.bf16.xpose.msra.mxu3 %v2096_v4  ;;  %v4749_v4 = vadd.f32 %v888_v41, %v872_v59  ;;  %v2653_v41 = vsel %vm935_vm0, %v4558_v54, 0 }
 0x1f7   :  { %1064 = vmax.xlane.f32.xlu2 %v1063_v39  ;;  %v1796_v39 = vpop.permute.xlu2 %1795  ;;  %v1792_v54 = vpop.permute.xlu1 %1791 }
 0x1f8   :  { %5889 = vst [vmem:[#allocation28_spill] sm:$0xff] %v4749_v4  ;;  %v4760_v5 = vadd.f32 %v981_v25, %v4749_v4 }
 0x1fc   :  { %v984_v37 = vpop.f32.mrf.mxu3  ;;  %3484 = vmatmul.msk.bf16.gmra.mxu2 %vm935_vm0, %v4491_v53  ;;  %v2656_v53 = vsel %vm935_vm0, %v4588_v49, 0  ;;  %v889_v49 = vld [vmem:[%s5841_s4 + $0x30] sm:$0xff] }
 0x1fd   :  { %3473 = vmatmul.msk.bf16.gmra.mxu3 %vm935_vm0, %v4652_v52  ;;  %v4775_v25 = vadd.f32 %v889_v49, %v873_v17 }
 0x1fe   :  { %2668 = vmatpush.bf16.xpose.msrb.mxu3 %v2662_v13  ;;  %v843_v13 = vmul.f32 %v4747_v48, %v4329_v45  ;;  %v1078_v45 = vsel %vm1062_vm2, %v4760_v5, -inf }
 0x1ff   :  { %1073 = vmax.xlane.f32.xlu2 %v1072_v56  ;;  %5890 = vst [vmem:[#allocation29_spill] sm:$0xff] %v4775_v25  ;;  %v4788_v20 = vadd.f32 %v984_v37, %v4775_v25  ;;  %v892_v37 = vld [vmem:[%s5841_s4 + $0x48] sm:$0xff] }
 0x200   :  { %v1798_v52 = vpop.permute.xlu0 %1797  ;;  %vm859_vm10 = vcmp.ne.f32.partialorder %v843_v13, 0.0 }
 0x201   :  { %1819 = vmatpush.bf16.msra.mxu0 %v1798_v52  ;;  %v875_v56 = vsel %vm859_vm10, 0.0, %v4072_v60 }
 0x202   :  { %v4790_v36 = vadd.f32 %v891_v62, %v875_v56  ;;  %v847_v56 = vmul.f32 %v4747_v48, %v4369_v16 }
 0x204   :  { %5891 = vst [vmem:[#allocation30_spill] sm:$0xff] %v4790_v36  ;;  %vm863_vm13 = vcmp.ne.f32.partialorder %v847_v56, 0.0 }
 0x205   :  { %1820 = vmatpush.bf16.msra.mxu0 %v1796_v39 }
 0x206   :  { %2669 = vmatpush.bf16.xpose.msrb.mxu3 %v2659_v28  ;;  %v986_v28 = vpop.f32.mrf.mxu3 }
 0x207   :  { %v4771_v43 = vadd.f32 %v986_v28, %v4764_v6  ;;  %1079 = vmax.xlane.f32.xlu2 %v1078_v45  ;;  %v846_v28 = vmul.f32 %v4747_v48, %v4358_v3 }
 0x209   :  { %v1084_v59 = vsel %vm1062_vm2, %v4771_v43, -inf  ;;  %1821 = vmatpush.bf16.msra.mxu0 %v1794_v21  ;;  %vm862_vm12 = vcmp.ne.f32.partialorder %v846_v28, 0.0 }
 0x20a   :  { %1085 = vmax.xlane.f32.xlu1 %v1084_v59  ;;  %v894_v59 = vld [vmem:[%s5841_s4 + $0x58] sm:$0xff]  ;;  %v878_v62 = vsel %vm862_vm12, 0.0, %v4072_v60 }
 0x20c   :  { %3485 = vmatmul.msk.bf16.gmra.mxu2 %vm935_vm0, %v4454_v23 }
 0x20d   :  { %3474 = vmatmul.msk.bf16.gmra.mxu3 %vm935_vm0, %v1517_v1  ;;  %1822 = vmatpush.bf16.msra.mxu0 %v1792_v54  ;;  %v4830_v54 = vpop.permute.xlu1 %2350 }
 0x20e   :  { %2670 = vmatpush.bf16.xpose.msrb.mxu3 %v2656_v53  ;;  %v844_v53 = vmul.f32 %v4747_v48, %v4442_v14  ;;  %v1042_v52 = vpop.f32.mrf.mxu3  ;;  %v1081_v14 = vsel %vm1062_vm2, %v4788_v20, -inf }
 0x20f   :  { %v4795_v13 = vadd.f32 %v1042_v52, %v4790_v36  ;;  %1082 = vmax.xlane.f32.xlu2 %v1081_v14  ;;  %v895_v14 = vld [vmem:[%s5841_s4 + $0x60] sm:$0xff] }
 0x210   :  { %vm860_vm11 = vcmp.ne.f32.partialorder %v844_v53, 0.0  ;;  %v4825_v53 = vadd.f32 %v894_v59, %v878_v62  ;;  %v845_v62 = vmul.f32 %v4747_v48, %v4344_v57 }
 0x211   :  { %v1087_v21 = vsel %vm1062_vm2, %v4795_v13, -inf  ;;  %v876_v23 = vsel %vm860_vm11, 0.0, %v4072_v60 }
 0x212   :  { %1088 = vmax.xlane.f32.xlu0 %v1087_v21  ;;  %v4806_v49 = vadd.f32 %v892_v37, %v876_v23  ;;  %5893 = vst [vmem:[#allocation32_spill] sm:$0xff] %v4825_v53  ;;  %v879_v21 = vsel %vm863_vm13, 0.0, %v4072_v60  ;;  %vm861_vm14 = vcmp.ne.f32.partialorder %v845_v62, 0.0 }
 0x213   :  { %v4838_v16 = vadd.f32 %v895_v14, %v879_v21 }
 0x214   :  { %5892 = vst [vmem:[#allocation31_spill] sm:$0xff] %v4806_v49 }
 0x215   :  { %5894 = vst [vmem:[#allocation33_spill] sm:$0xff] %v4838_v16 }
 0x216   :  { %2671 = vmatpush.bf16.xpose.msrb.mxu3 %v2653_v41  ;;  %v1044_v17 = vpop.f32.mrf.mxu3  ;;  %v1867_v41 = vpop.permute.xlu2 %1866 }
 0x217   :  { %v4809_v1 = vadd.f32 %v1044_v17, %v4806_v49 }
 0x219   :  { %v1090_v39 = vsel %vm1062_vm2, %v4809_v1, -inf }
 0x21a   :  { %1091 = vmax.xlane.f32.xlu1 %v1090_v39 }
 0x21c   :  { %3486 = vmatmul.msk.bf16.gmra.mxu2 %vm935_vm0, %v4469_v58 }
 0x21d   :  { %3487 = vmatmul.msk.bf16.vlgmr.msra.gmra.mxu3 %vm935_vm0, %v4568_v50 }
 0x21e   :  { %v1047_v45 = vpop.f32.mrf.mxu3 }
 0x226   :  { %v1049_v3 = vpop.f32.mrf.mxu3 }
 0x227   :  { %v4828_v58 = vadd.f32 %v1049_v3, %v4825_v53  ;;  %v893_v3 = vld [vmem:[%s5841_s4 + $0x50] sm:$0xff] }
 0x228   :  { %v1871_v52 = vpop.permute.xlu2 %1870 }
 0x229   :  { %v1096_v50 = vsel %vm1062_vm2, %v4828_v58, -inf  ;;  %1892 = vmatpush.bf16.msra.mxu1 %v1871_v52 }
 0x22a   :  { %1097 = vmax.xlane.f32.xlu1 %v1096_v50  ;;  %v877_v50 = vsel %vm861_vm14, 0.0, %v4072_v60 }
 0x22b   :  { %v4865_v57 = vadd.f32 %v893_v3, %v877_v50 }
 0x22c   :  { %3499 = vmatmul.msk.bf16.vlgmr.msrb.gmra.mxu2 %vm935_vm0, %v4452_v38 }
 0x22d   :  { %3488 = vmatmul.msk.bf16.gmra.mxu3 %vm935_vm0, %v4499_v30  ;;  %5895 = vst [vmem:[#allocation34_spill] sm:$0xff] %v4865_v57 }
 0x22e   :  { %v1052_v37 = vpop.f32.mrf.mxu3 }
 0x22f   :  { %v4843_v23 = vadd.f32 %v1052_v37, %v4838_v16  ;;  %v1490_v17 = vpop.f32.mrf.mxu2  ;;  %v1869_v39 = vpop.permute.xlu1 %1868 }
 0x230   :  { %v4850_v59 = vadd.f32 %v1490_v17, %v4704_v11  ;;  %1893 = vmatpush.bf16.msra.mxu1 %v1869_v39 }
 0x231   :  { %v1099_v28 = vsel %vm1062_vm2, %v4843_v23, -inf }
 0x232   :  { %1100 = vmax.xlane.f32.xlu1 %v1099_v28  ;;  %v1579_v38 = vsel %vm1062_vm2, %v4850_v59, -inf  ;;  %v848_v28 = vmul.f32 %v4747_v48, %v4456_v24  ;;  %v896_v24 = vld [vmem:[%s5841_s4 + $0x68] sm:$0xff] }
 0x233   :  { %1580 = vmax.xlane.f32.xlu2 %v1579_v38 }
 0x234   :  { %1894 = vmatpush.bf16.msra.mxu1 %v1867_v41  ;;  %v4872_v41 = vadd.f32 %v1047_v45, %v4865_v57  ;;  %vm864_vm15 = vcmp.ne.f32.partialorder %v848_v28, 0.0 }
 0x236   :  { %v1093_v21 = vsel %vm1062_vm2, %v4872_v41, -inf  ;;  %v1054_v37 = vpop.f32.mrf.mxu3 }
 0x237   :  { %v1492_v30 = vpop.f32.mrf.mxu2 }
 0x238   :  { %v4857_v56 = vadd.f32 %v1492_v30, %v4634_v7  ;;  %v880_v30 = vsel %vm864_vm15, 0.0, %v4072_v60 }
 0x239   :  { %v4903_v50 = vadd.f32 %v896_v24, %v880_v30 }
 0x23a   :  { %v1582_v52 = vsel %vm1062_vm2, %v4857_v56, -inf }
 0x23b   :  { %1583 = vmax.xlane.f32.xlu0 %v1582_v52  ;;  %v4906_v52 = vadd.f32 %v1054_v37, %v4903_v50 }
 0x23c   :  { %3500 = vmatmul.msk.bf16.gmra.mxu2 %vm935_vm0, %v4489_v8 }
 0x23d   :  { %3489 = vmatmul.msk.bf16.gmra.mxu3 %vm935_vm0, %v4671_v2 }
 0x23e   :  { %v1057_v2 = vpop.f32.mrf.mxu3 }
 0x23f   :  { %v1495_v14 = vpop.f32.mrf.mxu2 }
 0x240   :  { %v4877_v17 = vadd.f32 %v1495_v14, %v4664_v9 }
 0x242   :  { %v1585_v8 = vsel %vm1062_vm2, %v4877_v17, -inf }
 0x243   :  { %1094 = vmax.xlane.f32.xlu0 %v1093_v21 }
 0x246   :  { %v1059_v21 = vpop.f32.mrf.mxu3 }
 0x247   :  { %v1497_v39 = vpop.f32.mrf.mxu2 }
 0x248   :  { %v4888_v45 = vadd.f32 %v1497_v39, %v4721_v35 }
 0x24a   :  { %v1588_v3 = vsel %vm1062_vm2, %v4888_v45, -inf }
 0x24b   :  { %1586 = vmax.xlane.f32.xlu0 %v1585_v8  ;;  %v1102_v8 = vsel %vm1062_vm2, %v4906_v52, -inf }
 0x24c   :  { %3501 = vmatmul.msk.bf16.gmra.mxu2 %vm935_vm0, %v4516_v33  ;;  %v849_v33 = vmul.f32 %v4747_v48, %v4386_v26  ;;  %v897_v26 = vld [vmem:[%s5841_s4 + $0x70] sm:$0xff] }
 0x24d   :  { %3490 = vmatmul.msk.bf16.gmra.mxu3 %vm935_vm0, %v4762_v44 }
 0x24e   :  { %vm865_vm1 = vcmp.ne.f32.partialorder %v849_v33, 0.0 }
 0x24f   :  { %v1500_v62 = vpop.f32.mrf.mxu2  ;;  %v881_v28 = vsel %vm865_vm1, 0.0, %v4072_v60 }
 0x250   :  { %v4891_v38 = vadd.f32 %v1500_v62, %v4683_v15  ;;  %v4919_v37 = vadd.f32 %v897_v26, %v881_v28  ;;  %v898_v28 = vld [vmem:[%s5841_s4 + $0x78] sm:$0xff] }
 0x252   :  { %v1591_v44 = vsel %vm1062_vm2, %v4891_v38, -inf  ;;  %5896 = vst [vmem:[#allocation35_spill] sm:$0xff] %v4919_v37  ;;  %v4926_v24 = vadd.f32 %v1057_v2, %v4919_v37 }
 0x253   :  { %1592 = vmax.xlane.f32.xlu1 %v1591_v44  ;;  %1589 = vmax.xlane.f32.xlu0 %v1588_v3  ;;  %v850_v44 = vmul.f32 %v4747_v48, %v4390_v27 }
 0x254   :  { %v1105_v3 = vsel %vm1062_vm2, %v4926_v24, -inf }
 0x255   :  { %vm866_vm3 = vcmp.ne.f32.partialorder %v850_v44, 0.0 }
 0x256   :  { %v882_v27 = vsel %vm866_vm3, 0.0, %v4072_v60 }
 0x257   :  { %v1502_v14 = vpop.f32.mrf.mxu2 }
 0x258   :  { %v4909_v39 = vadd.f32 %v1502_v14, %v4749_v4  ;;  %v4932_v14 = vpop.permute.xlu0 %2354 }
 0x25a   :  { %v1594_v62 = vsel %vm1062_vm2, %v4909_v39, -inf  ;;  %v1071_v0 = vpop.xlane.xlu1 %1070 }
 0x25b   :  { %1103 = vmax.xlane.f32.xlu0 %v1102_v8  ;;  %1595 = vmax.xlane.f32.xlu2 %v1594_v62 }
 0x25c   :  { %3502 = vmatmul.msk.bf16.gmra.mxu2 %vm935_vm0, %v4548_v32 }
 0x25d   :  { %3503 = vmatmul.msk.bf16.vlgmr.msrb.gmra.mxu3 %vm935_vm0, %v4483_v31 }
 0x25f   :  { %v1505_v30 = vpop.f32.mrf.mxu2 }
 0x260   :  { %v1559_v33 = vpop.f32.mrf.mxu3  ;;  %v4935_v32 = vadd.f32 %v1505_v30, %v4775_v25 }
 0x262   :  { %v1597_v44 = vsel %vm1062_vm2, %v4935_v32, -inf }
 0x263   :  { %1106 = vmax.xlane.f32.xlu2 %v1105_v3 }
 0x267   :  { %v1507_v26 = vpop.f32.mrf.mxu2 }
 0x268   :  { %v4938_v31 = vadd.f32 %v1507_v26, %v4764_v6  ;;  %v1561_v2 = vpop.f32.mrf.mxu3  ;;  %v4954_v26 = vadd.f32 %v898_v28, %v882_v27  ;;  %v1113_v27 = vsub.f32 %v4669_v10, %v1071_v0 }
 0x269   :  { %v4945_v48 = vadd.f32 %v1561_v2, %v4806_v49  ;;  %v1068_v2 = vpop.xlane.xlu0 %1067 }
 0x26a   :  { %v1065_v8 = vpop.xlane.xlu2 %1064  ;;  %v1600_v30 = vsel %vm1062_vm2, %v4938_v31, -inf  ;;  %5897 = vst [vmem:[#allocation36_spill] sm:$0xff] %v4954_v26  ;;  %v1112_v61 = vsub.f32 %v4637_v29, %v1068_v2  ;;  %v4976_v2 = vadd.f32 %v1559_v33, %v4790_v36 }
 0x26b   :  { %v1111_v62 = vsub.f32 %v4711_v51, %v1065_v8  ;;  %v1606_v3 = vsel %vm1062_vm2, %v4945_v48, -inf  ;;  %1601 = vmax.xlane.f32.xlu0 %v1600_v30  ;;  %1598 = vmax.xlane.f32.xlu2 %v1597_v44  ;;  %v4959_v51 = vadd.f32 %v1059_v21, %v4954_v26 }
 0x26c   :  { %1607 = vmax.xlane.f32.xlu1 %v1606_v3  ;;  %v1131_v3 = vmul.f32 1.442695, %v1113_v27 }
 0x26d   :  { %v1127_v60 = vmul.f32 1.442695, %v1111_v62  ;;  %3504 = vmatmul.msk.bf16.gmra.mxu3 %vm935_vm0, %v4613_v42  ;;  %v1108_v30 = vsel %vm1062_vm2, %v4959_v51, -inf  ;;  %v1129_v62 = vmul.f32 1.442695, %v1112_v61 }
 0x26f   :  { %3627 = vpow2.f32 %v1127_v60  ;;  %v2047_v8 = vpop.f32.mrf.mxu2 }
 0x270   :  { %v1564_v40 = vpop.f32.mrf.mxu3  ;;  %v4970_v21 = vadd.f32 %v2047_v8, %v4704_v11  ;;  %3629 = vpow2.f32 %v1129_v62  ;;  %v1603_v8 = vsel %vm1062_vm2, %v4976_v2, -inf }
 0x271   :  { %3631 = vpow2.f32 %v1131_v3 }
 0x272   :  { %v2136_v61 = vsel %vm1062_vm2, %v4970_v21, -inf }
 0x273   :  { %1109 = vmax.xlane.f32.xlu2 %v1108_v30  ;;  %v1074_v30 = vpop.xlane.xlu2 %1073 }
 0x274   :  { %v1114_v10 = vsub.f32 %v4730_v19, %v1074_v30 }
 0x275   :  { %v4964_v28 = vpop.eup %3627 }
 0x276   :  { %v1159_v42 = vsel %vm1062_vm2, %v4964_v28, 0.0  ;;  %v4987_v33 = vpop.eup %3629  ;;  %v1133_v62 = vmul.f32 1.442695, %v1114_v10  ;;  %v5001_v10 = vadd.f32 %v1564_v40, %v4865_v57 }
 0x277   :  { %1160 = vadd.xlane.f32.xlu0 %v1159_v42  ;;  %v2049_v44 = vpop.f32.mrf.mxu2  ;;  %v1162_v19 = vsel %vm1062_vm2, %v4987_v33, 0.0 }
 0x278   :  { %v1566_v29 = vpop.f32.mrf.mxu3  ;;  %v4973_v60 = vadd.f32 %v2049_v44, %v4634_v7  ;;  %3633 = vpow2.f32 %v1133_v62  ;;  %v1609_v12 = vsel %vm1062_vm2, %v5001_v10, -inf }
 0x27a   :  { %v2139_v0 = vsel %vm1062_vm2, %v4973_v60, -inf }
 0x27b   :  { %2140 = vmax.xlane.f32.xlu1 %v2139_v0  ;;  %2137 = vmax.xlane.f32.xlu2 %v2136_v61  ;;  %v4992_v0 = vpop.eup %3631  ;;  %v1080_v3 = vpop.xlane.xlu2 %1079 }
 0x27c   :  { %v1165_v30 = vsel %vm1062_vm2, %v4992_v0, 0.0  ;;  %v1077_v61 = vpop.xlane.xlu0 %1076 }
 0x27d   :  { %3505 = vmatmul.msk.bf16.gmra.mxu3 %vm935_vm0, %v4698_v34 }
 0x27e   :  { %v5004_v63 = vpop.eup %3633 }
 0x27f   :  { %1604 = vmax.xlane.f32.xlu0 %v1603_v8  ;;  %v2052_v27 = vpop.f32.mrf.mxu2 }
 0x280   :  { %v1569_v42 = vpop.f32.mrf.mxu3  ;;  %v5013_v40 = vadd.f32 %v2052_v27, %v4664_v9 }
 0x281   :  { %v4990_v44 = vadd.f32 %v1569_v42, %v4838_v16  ;;  %v1115_v42 = vsub.f32 %v4694_v47, %v1077_v61  ;;  %v5016_v61 = vadd.f32 %v1566_v29, %v4825_v53 }
 0x283   :  { %v1615_v34 = vsel %vm1062_vm2, %v4990_v44, -inf  ;;  %1163 = vadd.xlane.f32.xlu2 %v1162_v19  ;;  %v1135_v62 = vmul.f32 1.442695, %v1115_v42  ;;  %v1168_v19 = vsel %vm1062_vm2, %v5004_v63, 0.0  ;;  %v2142_v42 = vsel %vm1062_vm2, %v5013_v40, -inf }
 0x284   :  { %1616 = vmax.xlane.f32.xlu1 %v1615_v34  ;;  %v1083_v34 = vpop.xlane.xlu2 %1082  ;;  %v1612_v16 = vsel %vm1062_vm2, %v5016_v61, -inf }
 0x285   :  { %3635 = vpow2.f32 %v1135_v62 }
 0x287   :  { %1166 = vadd.xlane.f32.xlu0 %v1165_v30  ;;  %v2054_v8 = vpop.f32.mrf.mxu2 }
 0x288   :  { %v1571_v30 = vpop.f32.mrf.mxu3  ;;  %v5029_v29 = vadd.f32 %v2054_v8, %v4721_v35 }
 0x28b   :  { %1610 = vmax.xlane.f32.xlu2 %v1609_v12  ;;  %v1117_v12 = vsub.f32 %v4788_v20, %v1083_v34  ;;  %v5023_v27 = vpop.eup %3635 }
 0x28c   :  { %v1171_v34 = vsel %vm1062_vm2, %v5023_v27, 0.0 }
 0x28d   :  { %3506 = vmatmul.msk.bf16.gmra.mxu3 %vm935_vm0, %v4702_v46  ;;  %v1139_v46 = vmul.f32 1.442695, %v1117_v12  ;;  %v1086_v12 = vpop.xlane.xlu1 %1085 }
 0x28f   :  { %1169 = vadd.xlane.f32.xlu0 %v1168_v19  ;;  %v2057_v47 = vpop.f32.mrf.mxu2  ;;  %3637 = vpow2.f32 %v1139_v46  ;;  %v5039_v46 = vadd.f32 %v1571_v30, %v4903_v50 }
 0x290   :  { %v1574_v20 = vpop.f32.mrf.mxu3 }
 0x293   :  { %2143 = vmax.xlane.f32.xlu2 %v2142_v42  ;;  %v2145_v42 = vsel %vm1062_vm2, %v5029_v29, -inf }
 0x295   :  { %v5041_v8 = vpop.eup %3637 }
 0x297   :  { %1613 = vmax.xlane.f32.xlu0 %v1612_v16  ;;  %v2059_v19 = vpop.f32.mrf.mxu2  ;;  %v1116_v16 = vsub.f32 %v4760_v5, %v1080_v3  ;;  %v1618_v5 = vsel %vm1062_vm2, %v5039_v46, -inf  ;;  %v1177_v3 = vsel %vm1062_vm2, %v5041_v8, 0.0 }
 0x298   :  { %v5026_v57 = vadd.f32 %v2059_v19, %v4749_v4  ;;  %v1089_v19 = vpop.xlane.xlu0 %1088 }
 0x299   :  { %v1137_v4 = vmul.f32 1.442695, %v1116_v16  ;;  %v1119_v35 = vsub.f32 %v4795_v13, %v1089_v19  ;;  %v1092_v13 = vpop.xlane.xlu1 %1091 }
 0x29a   :  { %5898 = vst [vmem:[#allocation37_spill] sm:$0xff] %v5026_v57  ;;  %v2151_v62 = vsel %vm1062_vm2, %v5026_v57, -inf  ;;  %v1118_v57 = vsub.f32 %v4771_v43, %v1086_v12  ;;  %v1120_v19 = vsub.f32 %v4809_v1, %v1092_v13  ;;  %v5074_v1 = vadd.f32 %v1574_v20, %v4919_v37 }
 0x29b   :  { %2152 = vmax.xlane.f32.xlu1 %v2151_v62  ;;  %1172 = vadd.xlane.f32.xlu2 %v1171_v34  ;;  %v5046_v62 = vadd.f32 %v2057_v47, %v4683_v15  ;;  %v1576_v34 = vpop.f32.mrf.mxu3  ;;  %3639 = vpow2.f32 %v1137_v4  ;;  %v1143_v16 = vmul.f32 1.442695, %v1119_v35 }
 0x29c   :  { %v5055_v47 = vadd.f32 %v1576_v34, %v4954_v26 }
 0x29d   :  { %v2148_v43 = vsel %vm1062_vm2, %v5046_v62, -inf }
 0x29e   :  { %v1624_v4 = vsel %vm1062_vm2, %v5055_v47, -inf }
 0x29f   :  { %2146 = vmax.xlane.f32.xlu0 %v2145_v42  ;;  %v2062_v30 = vpop.f32.mrf.mxu2  ;;  %v1141_v42 = vmul.f32 1.442695, %v1118_v57  ;;  %v1145_v57 = vmul.f32 1.442695, %v1120_v19 }
 0x2a0   :  { %v5058_v12 = vadd.f32 %v2062_v30, %v4775_v25 }
 0x2a1   :  { %3641 = vpow2.f32 %v1141_v42 }
 0x2a2   :  { %3643 = vpow2.f32 %v1143_v16  ;;  %v2154_v35 = vsel %vm1062_vm2, %v5058_v12, -inf }
 0x2a3   :  { %1619 = vmax.xlane.f32.xlu2 %v1618_v5  ;;  %1178 = vadd.xlane.f32.xlu1 %v1177_v3  ;;  %v5061_v5 = vpop.eup %3639  ;;  %3645 = vpow2.f32 %v1145_v57  ;;  %v1621_v57 = vsel %vm1062_vm2, %v5074_v1, -inf }
 0x2a4   :  { %v1174_v3 = vsel %vm1062_vm2, %v5061_v5, 0.0 }
 0x2a6   :  { %v1581_v16 = vpop.xlane.xlu2 %1580 }
 0x2a7   :  { %2149 = vmax.xlane.f32.xlu0 %v2148_v43  ;;  %v5069_v34 = vpop.eup %3641  ;;  %v2064_v20 = vpop.f32.mrf.mxu2 }
 0x2a8   :  { %v5071_v42 = vpop.eup %3643  ;;  %v1180_v13 = vsel %vm1062_vm2, %v5069_v34, 0.0  ;;  %v5088_v25 = vadd.f32 %v2064_v20, %v4764_v6 }
 0x2a9   :  { %v1183_v19 = vsel %vm1062_vm2, %v5071_v42, 0.0  ;;  %v5084_v37 = vpop.eup %3645 }
 0x2ab   :  { %2155 = vmax.xlane.f32.xlu2 %v2154_v35  ;;  %1625 = vmax.xlane.f32.xlu1 %v1624_v4  ;;  %v1098_v35 = vpop.xlane.xlu1 %1097  ;;  %v1627_v4 = vsub.f32 %v4850_v59, %v1581_v16  ;;  %v1186_v59 = vsel %vm1062_vm2, %v5084_v37, 0.0 }
 0x2ac   :  { %v1122_v16 = vsub.f32 %v4828_v58, %v1098_v35 }
 0x2ae   :  { %v1584_v30 = vpop.xlane.xlu0 %1583 }
 0x2af   :  { %1175 = vadd.xlane.f32.xlu0 %v1174_v3  ;;  %v1628_v43 = vsub.f32 %v4857_v56, %v1584_v30  ;;  %v1643_v30 = vmul.f32 1.442695, %v1627_v4  ;;  %v1149_v4 = vmul.f32 1.442695, %v1122_v16 }
 0x2b1   :  { %v1645_v3 = vmul.f32 1.442695, %v1628_v43  ;;  %v2157_v43 = vsel %vm1062_vm2, %v5088_v25, -inf }
 0x2b3   :  { %1181 = vadd.xlane.f32.xlu2 %v1180_v13  ;;  %1184 = vadd.xlane.f32.xlu1 %v1183_v19  ;;  %3647 = vpow2.f32 %v1645_v3  ;;  %v1101_v19 = vpop.xlane.xlu1 %1100 }
 0x2b4   :  { %v1123_v20 = vsub.f32 %v4843_v23, %v1101_v19 }
 0x2b6   :  { %v1095_v26 = vpop.xlane.xlu0 %1094 }
 0x2b7   :  { %1622 = vmax.xlane.f32.xlu0 %v1621_v57  ;;  %v1121_v56 = vsub.f32 %v4872_v41, %v1095_v26 }
 0x2b9   :  { %v1147_v13 = vmul.f32 1.442695, %v1121_v56  ;;  %v5095_v41 = vpop.eup %3647 }
 0x2ba   :  { %v1678_v58 = vsel %vm1062_vm2, %v5095_v41, 0.0 }
 0x2bb   :  { %3649 = vpow2.f32 %v1147_v13  ;;  %1187 = vadd.xlane.f32.xlu2 %v1186_v59 }
 0x2bc   :  { %3651 = vpow2.f32 %v1643_v30  ;;  %v1151_v30 = vmul.f32 1.442695, %v1123_v20 }
 0x2be   :  { %v1587_v57 = vpop.xlane.xlu0 %1586 }
 0x2bf   :  { %2158 = vmax.xlane.f32.xlu0 %v2157_v43  ;;  %v1629_v26 = vsub.f32 %v4877_v17, %v1587_v57 }
 0x2c1   :  { %v5098_v3 = vpop.eup %3649  ;;  %v1647_v56 = vmul.f32 1.442695, %v1629_v26 }
 0x2c2   :  { %v5101_v13 = vpop.eup %3651  ;;  %v1189_v35 = vsel %vm1062_vm2, %v5098_v3, 0.0 }
 0x2c3   :  { %3653 = vpow2.f32 %v1647_v56  ;;  %1679 = vadd.xlane.f32.xlu2 %v1678_v58  ;;  %1190 = vadd.xlane.f32.xlu1 %v1189_v35  ;;  %v1675_v17 = vsel %vm1062_vm2, %v5101_v13, 0.0 }
 0x2c4   :  { %3655 = vpow2.f32 %v1149_v4 }
 0x2c5   :  { %3657 = vpow2.f32 %v1151_v30 }
 0x2c6   :  { %v1593_v59 = vpop.xlane.xlu1 %1592  ;;  %v1590_v16 = vpop.xlane.xlu0 %1589 }
 0x2c7   :  { %1676 = vadd.xlane.f32.xlu0 %v1675_v17  ;;  %v1630_v23 = vsub.f32 %v4888_v45, %v1590_v16  ;;  %v1631_v19 = vsub.f32 %v4891_v38, %v1593_v59 }
 0x2c9   :  { %v5110_v43 = vpop.eup %3653  ;;  %v1649_v57 = vmul.f32 1.442695, %v1630_v23  ;;  %v1651_v20 = vmul.f32 1.442695, %v1631_v19 }
 0x2ca   :  { %v5113_v26 = vpop.eup %3655  ;;  %v1681_v4 = vsel %vm1062_vm2, %v5110_v43, 0.0 }
 0x2cb   :  { %1682 = vadd.xlane.f32.xlu2 %v1681_v4  ;;  %3659 = vpow2.f32 %v1649_v57  ;;  %v1192_v56 = vsel %vm1062_vm2, %v5113_v26, 0.0  ;;  %v5119_v35 = vpop.eup %3657 }
 0x2cc   :  { %3661 = vpow2.f32 %v1651_v20  ;;  %v1195_v59 = vsel %vm1062_vm2, %v5119_v35, 0.0  ;;  %v2116_v20 = vpop.f32.mrf.mxu3 }
 0x2ce   :  { %v1104_v58 = vpop.xlane.xlu0 %1103  ;;  %v1596_v45 = vpop.xlane.xlu2 %1595 }
 0x2cf   :  { %1193 = vadd.xlane.f32.xlu0 %v1192_v56  ;;  %v1124_v30 = vsub.f32 %v4906_v52, %v1104_v58  ;;  %v1632_v16 = vsub.f32 %v4909_v39, %v1596_v45 }
 0x2d1   :  { %v1153_v38 = vmul.f32 1.442695, %v1124_v30  ;;  %v5122_v17 = vpop.eup %3659  ;;  %v1653_v4 = vmul.f32 1.442695, %v1632_v16 }
 0x2d2   :  { %v1684_v23 = vsel %vm1062_vm2, %v5122_v17, 0.0  ;;  %v5129_v57 = vpop.eup %3661 }
 0x2d3   :  { %1196 = vadd.xlane.f32.xlu2 %v1195_v59  ;;  %3663 = vpow2.f32 %v1153_v38  ;;  %v1687_v30 = vsel %vm1062_vm2, %v5129_v57, 0.0 }
 0x2d6   :  { %v1107_v19 = vpop.xlane.xlu2 %1106 }
 0x2d7   :  { %1685 = vadd.xlane.f32.xlu0 %v1684_v23  ;;  %v1125_v52 = vsub.f32 %v4926_v24, %v1107_v19 }
 0x2d9   :  { %v1155_v56 = vmul.f32 1.442695, %v1125_v52  ;;  %v5132_v58 = vpop.eup %3663 }
 0x2da   :  { %v1198_v39 = vsel %vm1062_vm2, %v5132_v58, 0.0 }
 0x2db   :  { %3665 = vpow2.f32 %v1155_v56  ;;  %1688 = vadd.xlane.f32.xlu2 %v1687_v30  ;;  %v2118_v56 = vpop.f32.mrf.mxu3 }
 0x2dc   :  { %3667 = vpow2.f32 %v1653_v4 }
 0x2de   :  { %v1602_v45 = vpop.xlane.xlu0 %1601  ;;  %v1599_v38 = vpop.xlane.xlu2 %1598 }
 0x2df   :  { %1199 = vadd.xlane.f32.xlu0 %v1198_v39  ;;  %v1633_v59 = vsub.f32 %v4935_v32, %v1599_v38  ;;  %v1634_v16 = vsub.f32 %v4938_v31, %v1602_v45  ;;  %v1608_v4 = vpop.xlane.xlu1 %1607  ;;  %v5149_v32 = vadd.f32 %v2118_v56, %v4806_v49 }
 0x2e0   :  { %v1636_v45 = vsub.f32 %v4945_v48, %v1608_v4 }
 0x2e1   :  { %v5139_v24 = vpop.eup %3665  ;;  %v1655_v23 = vmul.f32 1.442695, %v1633_v59  ;;  %v1657_v30 = vmul.f32 1.442695, %v1634_v16  ;;  %v5154_v59 = vadd.f32 %v2116_v20, %v4790_v36  ;;  %v2163_v16 = vsel %vm1062_vm2, %v5149_v32, -inf }
 0x2e2   :  { %5899 = vst [vmem:[#allocation38_spill] sm:$0xff] %v5139_v24  ;;  %v5142_v19 = vpop.eup %3667  ;;  %v1201_v52 = vsel %vm1062_vm2, %v5139_v24, 0.0  ;;  %v1661_v56 = vmul.f32 1.442695, %v1636_v45 }
 0x2e3   :  { %1202 = vadd.xlane.f32.xlu2 %v1201_v52  ;;  %3669 = vpow2.f32 %v1655_v23  ;;  %v1690_v39 = vsel %vm1062_vm2, %v5142_v19, 0.0  ;;  %v2160_v48 = vsel %vm1062_vm2, %v5154_v59, -inf }
 0x2e4   :  { %3671 = vpow2.f32 %v1657_v30 }
 0x2e6   :  { %v1110_v38 = vpop.xlane.xlu2 %1109 }
 0x2e7   :  { %1691 = vadd.xlane.f32.xlu0 %v1690_v39  ;;  %v1126_v31 = vsub.f32 %v4959_v51, %v1110_v38  ;;  %v2604_v51 = vpop.f32.mrf.mxu2 }
 0x2e8   :  { %v5168_v38 = vadd.f32 %v2604_v51, %v4704_v11 }
 0x2e9   :  { %v1157_v52 = vmul.f32 1.442695, %v1126_v31  ;;  %v5158_v23 = vpop.eup %3669 }
 0x2ea   :  { %v1161_v24 = vpop.xlane.xlu0 %1160  ;;  %v1693_v39 = vsel %vm1062_vm2, %v5158_v23, 0.0  ;;  %v5164_v4 = vpop.eup %3671  ;;  %v2693_v11 = vsel %vm1062_vm2, %v5168_v38, -inf }
 0x2eb   :  { %2164 = vmax.xlane.f32.xlu2 %v2163_v16  ;;  %3673 = vpow2.f32 %v1157_v52  ;;  %1694 = vadd.xlane.f32.xlu1 %v1693_v39 }
 0x2ec   :  { %3675 = vpow2.f32 %v1661_v56 }
 0x2ed   :  { %3677 = vrcp.f32 %v1161_v24 }
 0x2ee   :  { %v2138_v20 = vpop.xlane.xlu2 %2137  ;;  %v2141_v31 = vpop.xlane.xlu1 %2140 }
 0x2ef   :  { %2161 = vmax.xlane.f32.xlu0 %v2160_v48  ;;  %v2184_v30 = vsub.f32 %v4970_v21, %v2138_v20  ;;  %v1696_v48 = vsel %vm1062_vm2, %v5164_v4, 0.0  ;;  %v2185_v49 = vsub.f32 %v4973_v60, %v2141_v31 }
 0x2f1   :  { %v2200_v45 = vmul.f32 1.442695, %v2184_v30  ;;  %v5170_v16 = vpop.eup %3673  ;;  %v2202_v20 = vmul.f32 1.442695, %v2185_v49  ;;  %v2606_v49 = vpop.f32.mrf.mxu2 }
 0x2f2   :  { %v1605_v52 = vpop.xlane.xlu0 %1604  ;;  %v1204_v24 = vsel %vm1062_vm2, %v5170_v16, 0.0  ;;  %v5180_v56 = vpop.eup %3675 }
 0x2f3   :  { %v1635_v39 = vsub.f32 %v4976_v2, %v1605_v52  ;;  %1697 = vadd.xlane.f32.xlu2 %v1696_v48  ;;  %3679 = vpow2.f32 %v2200_v45  ;;  %2694 = vmax.xlane.f32.xlu1 %v2693_v11  ;;  %5900 = vst [vmem:[#allocation39_spill] sm:$0xff] %v5180_v56  ;;  %v3678_v51 = vpop.eup %3677  ;;  %v1702_v31 = vsel %vm1062_vm2, %v5180_v56, 0.0 }
 0x2f4   :  { %v1223_v60 = vmul.f32 %v3678_v51, %v4964_v28 }
 0x2f5   :  { %v1659_v21 = vmul.f32 1.442695, %v1635_v39 }
 0x2f6   :  { %v1164_v2 = vpop.xlane.xlu2 %1163  ;;  %v1239_v11 = vpack.c.bf16 %v1223_v60, %v1223_v60 }
 0x2f7   :  { %3681 = vpow2.f32 %v1659_v21  ;;  %1205 = vadd.xlane.f32.xlu0 %v1204_v24 }
 0x2f8   :  { %3683 = vrcp.f32 %v1164_v2 }
 0x2f9   :  { %v5182_v52 = vpop.eup %3679  ;;  %3685 = vpow2.f32 %v2202_v20 }
 0x2fa   :  { %v1167_v30 = vpop.xlane.xlu0 %1166  ;;  %5901 = vst [vmem:[#allocation40_spill] sm:$0xff] %v5182_v52  ;;  %v2232_v21 = vsel %vm1062_vm2, %v5182_v52, 0.0  ;;  %v1263_v52 = vunpack.c.l.b16 %v1239_v11 }
 0x2fb   :  { %1703 = vadd.xlane.f32.xlu2 %v1702_v31  ;;  %v5196_v31 = vadd.f32 %v2606_v49, %v4634_v7  ;;  %3687 = vrcp.f32 %v1167_v30 }
 0x2fd   :  { %v5187_v45 = vpop.eup %3681 }
 0x2fe   :  { %5902 = vst [vmem:[#allocation41_spill] sm:$0xff] %v5187_v45  ;;  %v3684_v39 = vpop.eup %3683  ;;  %v1699_v48 = vsel %vm1062_vm2, %v5187_v45, 0.0  ;;  %v1611_v28 = vpop.xlane.xlu2 %1610 }
 0x2ff   :  { %v1224_v24 = vmul.f32 %v3684_v39, %v4987_v33  ;;  %1700 = vadd.xlane.f32.xlu1 %v1699_v48  ;;  %2233 = vadd.xlane.f32.xlu0 %v2232_v21  ;;  %v1637_v2 = vsub.f32 %v5001_v10, %v1611_v28  ;;  %v5198_v56 = vpop.eup %3685  ;;  %v2696_v10 = vsel %vm1062_vm2, %v5196_v31, -inf  ;;  %v5204_v39 = vpop.xlane.xlu1 %1616 }
 0x300   :  { %v2235_v33 = vsel %vm1062_vm2, %v5198_v56, 0.0 }
 0x301   :  { %v1240_v51 = vpack.c.bf16 %v1224_v24, %v1224_v24  ;;  %v1663_v20 = vmul.f32 1.442695, %v1637_v2  ;;  %v3688_v30 = vpop.eup %3687 }
 0x302   :  { %v1170_v36 = vpop.xlane.xlu0 %1169  ;;  %v1225_v49 = vmul.f32 %v3688_v30, %v4992_v0 }
 0x303   :  { %3689 = vrcp.f32 %v1170_v36  ;;  %v1264_v45 = vunpack.c.l.b16 %v1240_v51 }
 0x304   :  { %3691 = vpow2.f32 %v1663_v20  ;;  %v1241_v51 = vpack.c.bf16 %v1225_v49, %v1225_v49 }
 0x305   :  { %v1271_v60 = vpack.c.b16 %v1264_v45, %v1263_v52 }
 0x306   :  { %v2144_v7 = vpop.xlane.xlu2 %2143 }
 0x307   :  { %2236 = vadd.xlane.f32.xlu1 %v2235_v33  ;;  %2697 = vmax.xlane.f32.xlu0 %v2696_v10  ;;  %v2186_v11 = vsub.f32 %v5013_v40, %v2144_v7 }
 0x308   :  { %3459 = vmatmul.msk.bf16.vlgmr.msrb.gmra.mxu0 %vm1062_vm2, %v1271_v60  ;;  %v5220_v60 = vpop.f32.mrf.mxu3 }
 0x309   :  { %v3690_v48 = vpop.eup %3689  ;;  %2376 = vmatpush.bf16.msrb.mxu0 %v4932_v14  ;;  %v2204_v20 = vmul.f32 1.442695, %v2186_v11 }
 0x30a   :  { %v1614_v36 = vpop.xlane.xlu0 %1613  ;;  %v1226_v52 = vmul.f32 %v3690_v48, %v5004_v63  ;;  %v5209_v45 = vpop.eup %3691 }
 0x30b   :  { %v1638_v21 = vsub.f32 %v5016_v61, %v1614_v36  ;;  %v1705_v28 = vsel %vm1062_vm2, %v5209_v45, 0.0 }
 0x30c   :  { %v1242_v2 = vpack.c.bf16 %v1226_v52, %v1226_v52 }
 0x30d   :  { %v1665_v24 = vmul.f32 1.442695, %v1638_v21  ;;  %2377 = vmatpush.bf16.msrb.mxu0 %v4725_v18  ;;  %v1265_v18 = vunpack.c.l.b16 %v1241_v51 }
 0x30e   :  { %v5217_v14 = vpop.xlane.xlu1 %2152  ;;  %v1173_v63 = vpop.xlane.xlu2 %1172  ;;  %v1266_v0 = vunpack.c.l.b16 %v1242_v2 }
 0x30f   :  { %3693 = vpow2.f32 %v1665_v24  ;;  %1706 = vadd.xlane.f32.xlu0 %v1705_v28  ;;  %v2609_v2 = vpop.f32.mrf.mxu2 }
 0x310   :  { %3695 = vpow2.f32 %v2204_v20  ;;  %v1272_v33 = vpack.c.b16 %v1266_v0, %v1265_v18  ;;  %v2123_v36 = vpop.f32.mrf.mxu3 }
 0x311   :  { %2378 = vmatpush.bf16.msrb.mxu0 %v4830_v54  ;;  %3697 = vrcp.f32 %v1173_v63  ;;  %v5240_v11 = vadd.f32 %v2123_v36, %v4825_v53 }
 0x312   :  { %v2147_v61 = vpop.xlane.xlu0 %2146 }
 0x313   :  { %1864 = vrot.lane.b32.xlu2 %v4647_v55, %s4070_s2  ;;  %v2169_v63 = vsel %vm1062_vm2, %v5240_v11, -inf }
 0x315   :  { %v5224_v40 = vpop.eup %3693 }
 0x316   :  { %v1708_v10 = vsel %vm1062_vm2, %v5224_v40, 0.0  ;;  %v1179_v7 = vpop.xlane.xlu1 %1178  ;;  %v1620_v30 = vpop.xlane.xlu2 %1619 }
 0x317   :  { %1709 = vadd.xlane.f32.xlu0 %v1708_v10  ;;  %v5229_v48 = vpop.eup %3695 }
 0x318   :  { %3460 = vmatmul.msk.bf16.gmra.mxu0 %vm1062_vm2, %v1272_v33  ;;  %5903 = vst [vmem:[#allocation42_spill] sm:$0xff] %v5229_v48  ;;  %v2238_v52 = vsel %vm1062_vm2, %v5229_v48, 0.0  ;;  %v3698_v28 = vpop.eup %3697  ;;  %v5246_v33 = vadd.f32 %v2609_v2, %v4664_v9  ;;  %v2611_v2 = vpop.f32.mrf.mxu2 }
 0x319   :  { %v1227_v51 = vmul.f32 %v3698_v28, %v5023_v27  ;;  %v1639_v27 = vsub.f32 %v4990_v44, %v5204_v39  ;;  %v1640_v44 = vsub.f32 %v5039_v46, %v1620_v30 }
 0x31a   :  { %v2150_v54 = vpop.xlane.xlu0 %2149  ;;  %v2699_v28 = vsel %vm1062_vm2, %v5246_v33, -inf }
 0x31e   :  { %v5233_v21 = vpop.xlane.xlu1 %1625  ;;  %v5235_v49 = vpop.xlane.xlu2 %2155 }
 0x31f   :  { %2239 = vadd.xlane.f32.xlu0 %v2238_v52  ;;  %v1243_v52 = vpack.c.bf16 %v1227_v51, %v1227_v51 }
 0x320   :  { %2348 = vrot.lane.b32.xlu1 %v4511_v22, %s4062_s16 }
 0x322   :  { %v1176_v24 = vpop.xlane.xlu0 %1175 }
 0x323   :  { %3699 = vrcp.f32 %v1176_v24  ;;  %v2187_v24 = vsub.f32 %v5029_v29, %v2147_v61  ;;  %v1667_v29 = vmul.f32 1.442695, %v1639_v27  ;;  %v5904_v61 = vld [vmem:[#allocation27_spill] sm:$0xff] }
 0x326   :  { %v1185_v20 = vpop.xlane.xlu1 %1184  ;;  %v1182_v0 = vpop.xlane.xlu2 %1181 }
 0x327   :  { %2170 = vmax.xlane.f32.xlu0 %v2169_v63  ;;  %3701 = vrcp.f32 %v1185_v20  ;;  %v1267_v63 = vunpack.c.l.b16 %v1243_v52  ;;  %v2206_v20 = vmul.f32 1.442695, %v2187_v24  ;;  %v1669_v52 = vmul.f32 1.442695, %v1640_v44 }
 0x328   :  { %3703 = vrcp.f32 %v1182_v0  ;;  %v5257_v0 = vadd.f32 %v2611_v2, %v5904_v61 }
 0x329   :  { %v3700_v18 = vpop.eup %3699  ;;  %3705 = vrcp.f32 %v1179_v7 }
 0x32a   :  { %v5248_v10 = vpop.xlane.xlu0 %1622  ;;  %v1228_v36 = vmul.f32 %v3700_v18, %v5061_v5  ;;  %v2702_v24 = vsel %vm1062_vm2, %v5257_v0, -inf }
 0x32c   :  { %v1244_v53 = vpack.c.bf16 %v1228_v36, %v1228_v36 }
 0x32d   :  { %v3702_v48 = vpop.eup %3701 }
 0x32e   :  { %v1268_v9 = vunpack.c.l.b16 %v1244_v53  ;;  %v1188_v22 = vpop.xlane.xlu2 %1187  ;;  %v3704_v51 = vpop.eup %3703  ;;  %v2188_v53 = vsub.f32 %v5046_v62, %v2150_v54  ;;  %v1231_v18 = vmul.f32 %v3702_v48, %v5071_v42 }
 0x32f   :  { %2700 = vmax.xlane.f32.xlu0 %v2699_v28  ;;  %3707 = vrcp.f32 %v1188_v22  ;;  %v3706_v7 = vpop.eup %3705  ;;  %v1230_v22 = vmul.f32 %v3704_v51, %v5069_v34  ;;  %v5905_v51 = vld [vmem:[#allocation37_spill] sm:$0xff] }
 0x330   :  { %v1273_v5 = vpack.c.b16 %v1268_v9, %v1267_v63  ;;  %3709 = vpow2.f32 %v2206_v20  ;;  %v1229_v46 = vmul.f32 %v3706_v7, %v5041_v8  ;;  %v2208_v30 = vmul.f32 1.442695, %v2188_v53  ;;  %v2126_v20 = vpop.f32.mrf.mxu3 }
 0x331   :  { %3711 = vpow2.f32 %v1667_v29  ;;  %v1247_v27 = vpack.c.bf16 %v1231_v18, %v1231_v18  ;;  %v1246_v9 = vpack.c.bf16 %v1230_v22, %v1230_v22  ;;  %v2189_v29 = vsub.f32 %v5905_v51, %v5217_v14 }
 0x332   :  { %v5260_v39 = vpop.xlane.xlu0 %2158  ;;  %3461 = vmatmul.msk.bf16.gmra.mxu0 %vm1062_vm2, %v1273_v5  ;;  %3713 = vpow2.f32 %v1669_v52  ;;  %v1245_v48 = vpack.c.bf16 %v1229_v46, %v1229_v46 }
 0x333   :  { %3715 = vpow2.f32 %v2208_v30  ;;  %v1348_v5 = vunpack.c.l.b16 %v1247_v27  ;;  %v1270_v61 = vunpack.c.l.b16 %v1246_v9  ;;  %v2210_v14 = vmul.f32 1.442695, %v2189_v29  ;;  %v5906_v9 = vld [vmem:[#allocation34_spill] sm:$0xff]  ;;  %v2614_v29 = vpop.f32.mrf.mxu2 }
 0x334   :  { %v1269_v53 = vunpack.c.l.b16 %v1245_v48  ;;  %v1641_v27 = vsub.f32 %v5074_v1, %v5248_v10 }
 0x335   :  { %v3708_v36 = vpop.eup %3707 }
 0x336   :  { %v1232_v28 = vmul.f32 %v3708_v36, %v5084_v37  ;;  %v1680_v63 = vpop.xlane.xlu2 %1679  ;;  %v5270_v62 = vpop.eup %3709  ;;  %v1274_v36 = vpack.c.b16 %v1270_v61, %v1269_v53  ;;  %v1671_v1 = vmul.f32 1.442695, %v1641_v27 }
 0x337   :  { %2703 = vmax.xlane.f32.xlu0 %v2702_v24  ;;  %v1191_v34 = vpop.xlane.xlu1 %1190  ;;  %v5272_v2 = vpop.eup %3711  ;;  %v2241_v37 = vsel %vm1062_vm2, %v5270_v62, 0.0 }
 0x338   :  { %v1248_v42 = vpack.c.bf16 %v1232_v28, %v1232_v28  ;;  %v1711_v7 = vsel %vm1062_vm2, %v5272_v2, 0.0  ;;  %v5281_v22 = vpop.eup %3713 }
 0x339   :  { %v5283_v52 = vpop.eup %3715  ;;  %v1714_v48 = vsel %vm1062_vm2, %v5281_v22, 0.0 }
 0x33a   :  { %v1677_v54 = vpop.xlane.xlu0 %1676  ;;  %v1349_v8 = vunpack.c.l.b16 %v1248_v42  ;;  %v5292_v42 = vadd.f32 %v5220_v60, %v5906_v9 }
 0x33b   :  { %3717 = vrcp.f32 %v1677_v54 }
 0x33c   :  { %3719 = vrcp.f32 %v1191_v34  ;;  %2242 = vadd.xlane.f32.xlu2 %v2241_v37  ;;  %v1356_v44 = vpack.c.b16 %v1349_v8, %v1348_v5  ;;  %v2128_v34 = vpop.f32.mrf.mxu3 }
 0x33d   :  { %3721 = vrcp.f32 %v1680_v63  ;;  %v2244_v63 = vsel %vm1062_vm2, %v5283_v52, 0.0  ;;  %v5300_v51 = vadd.f32 %v2128_v34, %v4903_v50  ;;  %v2190_v34 = vsub.f32 %v5058_v12, %v5235_v49 }
 0x33e   :  { %3463 = vmatmul.msk.bf16.vlgmr.msrb.gmra.mxu1 %vm1062_vm2, %v1356_v44  ;;  %v1683_v18 = vpop.xlane.xlu2 %1682  ;;  %v2191_v44 = vsub.f32 %v5088_v25, %v5260_v39 }
 0x33f   :  { %1712 = vadd.xlane.f32.xlu0 %v1711_v7  ;;  %v2212_v49 = vmul.f32 1.442695, %v2190_v34 }
 0x341   :  { %v3718_v24 = vpop.eup %3717 }
 0x342   :  { %v1194_v46 = vpop.xlane.xlu0 %1193  ;;  %3462 = vmatmul.msk.bf16.gmra.mxu0 %vm1062_vm2, %v1274_v36  ;;  %v3720_v30 = vpop.eup %3719  ;;  %v1739_v54 = vmul.f32 %v3718_v24, %v5101_v13  ;;  %v2166_v13 = vsel %vm1062_vm2, %v5292_v42, -inf  ;;  %v2175_v24 = vsel %vm1062_vm2, %v5300_v51, -inf }
 0x343   :  { %3723 = vrcp.f32 %v1194_v46  ;;  %v3722_v28 = vpop.eup %3721  ;;  %v1233_v5 = vmul.f32 %v3720_v30, %v5098_v3  ;;  %v1642_v30 = vsub.f32 %v5055_v47, %v5233_v21 }
 0x344   :  { %3725 = vpow2.f32 %v2210_v14  ;;  %2245 = vadd.xlane.f32.xlu2 %v2244_v63  ;;  %v1740_v10 = vmul.f32 %v3722_v28, %v5095_v41  ;;  %v1755_v37 = vpack.c.bf16 %v1739_v54, %v1739_v54  ;;  %v5907_v14 = vld [vmem:[#allocation33_spill] sm:$0xff] }
 0x345   :  { %v1249_v7 = vpack.c.bf16 %v1233_v5, %v1233_v5  ;;  %3727 = vpow2.f32 %v1671_v1  ;;  %v5310_v36 = vadd.f32 %v2126_v20, %v5907_v14  ;;  %v1673_v47 = vmul.f32 1.442695, %v1642_v30 }
 0x346   :  { %v1197_v8 = vpop.xlane.xlu2 %1196  ;;  %v1756_v53 = vpack.c.bf16 %v1740_v10, %v1740_v10  ;;  %v1779_v27 = vunpack.c.l.b16 %v1755_v37  ;;  %v5325_v10 = vadd.f32 %v2614_v29, %v4683_v15 }
 0x347   :  { %1715 = vadd.xlane.f32.xlu0 %v1714_v48  ;;  %v1350_v39 = vunpack.c.l.b16 %v1249_v7  ;;  %v2172_v5 = vsel %vm1062_vm2, %v5310_v36, -inf }
 0x348   :  { %v1780_v20 = vunpack.c.l.b16 %v1756_v53  ;;  %v2705_v29 = vsel %vm1062_vm2, %v5325_v10, -inf }
 0x349   :  { %v3724_v60 = vpop.eup %3723 }
 0x34a   :  { %v5304_v61 = vpop.eup %3725  ;;  %v1686_v3 = vpop.xlane.xlu0 %1685  ;;  %2167 = vmax.xlane.f32.xlu1 %v2166_v13  ;;  %v1234_v41 = vmul.f32 %v3724_v60, %v5113_v26  ;;  %v2214_v26 = vmul.f32 1.442695, %v2191_v44  ;;  %v1787_v21 = vpack.c.b16 %v1780_v20, %v1779_v27  ;;  %v5908_v13 = vld [vmem:[#allocation28_spill] sm:$0xff] }
 0x34b   :  { %3729 = vrcp.f32 %v1686_v3  ;;  %v2247_v25 = vsel %vm1062_vm2, %v5304_v61, 0.0  ;;  %v5320_v48 = vpop.eup %3727 }
 0x34c   :  { %v1250_v46 = vpack.c.bf16 %v1234_v41, %v1234_v41  ;;  %3731 = vrcp.f32 %v1197_v8  ;;  %2176 = vmax.xlane.f32.xlu2 %v2175_v24  ;;  %v1717_v37 = vsel %vm1062_vm2, %v5320_v48, 0.0  ;;  %v2131_v24 = vpop.f32.mrf.mxu3 }
 0x34d   :  { %3733 = vrcp.f32 %v1683_v18  ;;  %v2616_v18 = vpop.f32.mrf.mxu2 }
 0x34e   :  { %v1351_v28 = vunpack.c.l.b16 %v1250_v46  ;;  %v1689_v63 = vpop.xlane.xlu2 %1688  ;;  %3735 = vpow2.f32 %v2214_v26  ;;  %v5332_v44 = vadd.f32 %v2616_v18, %v5908_v13  ;;  %v5909_v18 = vld [vmem:[#allocation29_spill] sm:$0xff] }
 0x34f   :  { %2248 = vadd.xlane.f32.xlu0 %v2247_v25 }
 0x350   :  { %v1357_v54 = vpack.c.b16 %v1351_v28, %v1350_v39  ;;  %v2708_v27 = vsel %vm1062_vm2, %v5332_v44, -inf }
 0x351   :  { %v3730_v1 = vpop.eup %3729 }
 0x352   :  { %v1200_v8 = vpop.xlane.xlu0 %1199  ;;  %2173 = vmax.xlane.f32.xlu1 %v2172_v5  ;;  %3464 = vmatmul.msk.bf16.gmra.mxu1 %vm1062_vm2, %v1357_v54  ;;  %v3732_v60 = vpop.eup %3731  ;;  %v1742_v15 = vmul.f32 %v3730_v1, %v5122_v17 }
 0x353   :  { %3737 = vrcp.f32 %v1200_v8  ;;  %3475 = vmatmul.msk.bf16.vlgmr.msra.gmra.mxu0 %vm1062_vm2, %v1787_v21  ;;  %v3734_v12 = vpop.eup %3733  ;;  %v1235_v3 = vmul.f32 %v3732_v60, %v5119_v35 }
 0x354   :  { %3739 = vpow2.f32 %v1673_v47  ;;  %1718 = vadd.xlane.f32.xlu2 %v1717_v37  ;;  %v1741_v41 = vmul.f32 %v3734_v12, %v5110_v43  ;;  %v5339_v53 = vpop.eup %3735  ;;  %v1758_v30 = vpack.c.bf16 %v1742_v15, %v1742_v15  ;;  %v5910_v15 = vld [vmem:[#allocation35_spill] sm:$0xff] }
 0x355   :  { %3741 = vpow2.f32 %v2212_v49  ;;  %v1251_v26 = vpack.c.bf16 %v1235_v3, %v1235_v3  ;;  %v2253_v43 = vsel %vm1062_vm2, %v5339_v53, 0.0  ;;  %v2619_v20 = vpop.f32.mrf.mxu2  ;;  %v2133_v3 = vpop.f32.mrf.mxu3 }
 0x356   :  { %v1203_v7 = vpop.xlane.xlu2 %1202  ;;  %v1757_v35 = vpack.c.bf16 %v1741_v41, %v1741_v41  ;;  %v1782_v34 = vunpack.c.l.b16 %v1758_v30  ;;  %v5353_v8 = vadd.f32 %v2619_v20, %v5909_v18 }
 0x357   :  { %2706 = vmax.xlane.f32.xlu0 %v2705_v29  ;;  %v1352_v21 = vunpack.c.l.b16 %v1251_v26  ;;  %v5359_v29 = vadd.f32 %v2131_v24, %v5910_v15 }
 0x358   :  { %v1781_v5 = vunpack.c.l.b16 %v1757_v35 }
 0x359   :  { %v3738_v46 = vpop.eup %3737  ;;  %v2178_v35 = vsel %vm1062_vm2, %v5359_v29, -inf }
 0x35a   :  { %v1692_v17 = vpop.xlane.xlu0 %1691  ;;  %2709 = vmax.xlane.f32.xlu1 %v2708_v27  ;;  %v1236_v25 = vmul.f32 %v3738_v46, %v5132_v58  ;;  %v5344_v39 = vpop.eup %3739  ;;  %v1788_v13 = vpack.c.b16 %v1782_v34, %v1781_v5  ;;  %v2711_v27 = vsel %vm1062_vm2, %v5353_v8, -inf }
 0x35b   :  { %3743 = vrcp.f32 %v1692_v17  ;;  %v5348_v54 = vpop.eup %3741  ;;  %v1720_v47 = vsel %vm1062_vm2, %v5344_v39, 0.0  ;;  %v5911_v17 = vld [vmem:[#allocation36_spill] sm:$0xff] }
 0x35c   :  { %v1252_v28 = vpack.c.bf16 %v1236_v25, %v1236_v25  ;;  %2254 = vadd.xlane.f32.xlu2 %v2253_v43  ;;  %3745 = vrcp.f32 %v1689_v63  ;;  %v2250_v37 = vsel %vm1062_vm2, %v5348_v54, 0.0  ;;  %v5367_v25 = vadd.f32 %v2133_v3, %v5911_v17 }
 0x35d   :  { %v2621_v43 = vpop.f32.mrf.mxu2 }
 0x35e   :  { %v1353_v58 = vunpack.c.l.b16 %v1252_v28  ;;  %v2165_v1 = vpop.xlane.xlu2 %2164  ;;  %v1695_v49 = vpop.xlane.xlu1 %1694 }
 0x35f   :  { %1721 = vadd.xlane.f32.xlu0 %v1720_v47  ;;  %v2193_v60 = vsub.f32 %v5149_v32, %v2165_v1  ;;  %v2181_v47 = vsel %vm1062_vm2, %v5367_v25, -inf }
 0x360   :  { %v1358_v12 = vpack.c.b16 %v1353_v58, %v1352_v21 }
 0x361   :  { %v3744_v63 = vpop.eup %3743  ;;  %v2218_v41 = vmul.f32 1.442695, %v2193_v60 }
 0x362   :  { %v2162_v46 = vpop.xlane.xlu0 %2161  ;;  %2251 = vadd.xlane.f32.xlu1 %v2250_v37  ;;  %3465 = vmatmul.msk.bf16.gmra.mxu1 %vm1062_vm2, %v1358_v12  ;;  %v3746_v32 = vpop.eup %3745  ;;  %v1744_v24 = vmul.f32 %v3744_v63, %v5142_v19  ;;  %v5378_v19 = vadd.f32 %v2621_v43, %v4764_v6 }
 0x363   :  { %v2192_v30 = vsub.f32 %v5154_v59, %v2162_v46  ;;  %3476 = vmatmul.msk.bf16.gmra.mxu0 %vm1062_vm2, %v1788_v13  ;;  %3747 = vpow2.f32 %v2218_v41  ;;  %v1743_v59 = vmul.f32 %v3746_v32, %v5129_v57 }
 0x364   :  { %3749 = vrcp.f32 %v1203_v7  ;;  %2712 = vmax.xlane.f32.xlu2 %v2711_v27  ;;  %v1760_v20 = vpack.c.bf16 %v1744_v24, %v1744_v24  ;;  %v2714_v6 = vsel %vm1062_vm2, %v5378_v19, -inf }
 0x365   :  { %v2216_v26 = vmul.f32 1.442695, %v2192_v30  ;;  %v1759_v1 = vpack.c.bf16 %v1743_v59, %v1743_v59 }
 0x366   :  { %v1698_v28 = vpop.xlane.xlu2 %1697  ;;  %v2695_v34 = vpop.xlane.xlu1 %2694  ;;  %v1784_v60 = vunpack.c.l.b16 %v1760_v20 }
 0x367   :  { %2179 = vmax.xlane.f32.xlu0 %v2178_v35  ;;  %3751 = vpow2.f32 %v2216_v26  ;;  %v2741_v7 = vsub.f32 %v5168_v38, %v2695_v34  ;;  %v5912_v38 = vld [vmem:[#allocation38_spill] sm:$0xff]  ;;  %v1783_v13 = vunpack.c.l.b16 %v1759_v1 }
 0x369   :  { %v5375_v21 = vpop.eup %3747  ;;  %v2757_v18 = vmul.f32 1.442695, %v2741_v7  ;;  %v1789_v46 = vpack.c.b16 %v1784_v60, %v1783_v13 }
 0x36a   :  { %v1206_v58 = vpop.xlane.xlu0 %1205  ;;  %2182 = vmax.xlane.f32.xlu1 %v2181_v47  ;;  %v3750_v5 = vpop.eup %3749  ;;  %v2259_v57 = vsel %vm1062_vm2, %v5375_v21, 0.0 }
 0x36b   :  { %3753 = vrcp.f32 %v1206_v58  ;;  %v1237_v37 = vmul.f32 %v3750_v5, %v5912_v38 }
 0x36c   :  { %3755 = vrcp.f32 %v1698_v28  ;;  %2260 = vadd.xlane.f32.xlu2 %v2259_v57 }
 0x36d   :  { %3757 = vrcp.f32 %v1695_v49  ;;  %v5383_v12 = vpop.eup %3751  ;;  %v1253_v24 = vpack.c.bf16 %v1237_v37, %v1237_v37 }
 0x36e   :  { %3759 = vpow2.f32 %v2757_v18  ;;  %v1704_v63 = vpop.xlane.xlu2 %1703  ;;  %v2256_v41 = vsel %vm1062_vm2, %v5383_v12, 0.0 }
 0x36f   :  { %2715 = vmax.xlane.f32.xlu0 %v2714_v6  ;;  %v1354_v20 = vunpack.c.l.b16 %v1253_v24  ;;  %v5913_v6 = vld [vmem:[#allocation41_spill] sm:$0xff] }
 0x371   :  { %v3754_v3 = vpop.eup %3753 }
 0x372   :  { %v3756_v30 = vpop.eup %3755  ;;  %v1701_v32 = vpop.xlane.xlu1 %1700  ;;  %2257 = vadd.xlane.f32.xlu1 %v2256_v41  ;;  %v1238_v27 = vmul.f32 %v3754_v3, %v5170_v16 }
 0x373   :  { %v2234_v49 = vpop.xlane.xlu0 %2233  ;;  %v3758_v26 = vpop.eup %3757  ;;  %3761 = vrcp.f32 %v1701_v32  ;;  %3477 = vmatmul.msk.bf16.gmra.mxu0 %vm1062_vm2, %v1789_v46  ;;  %v1746_v59 = vmul.f32 %v3756_v30, %v5164_v4 }
 0x374   :  { %v5392_v35 = vpop.eup %3759  ;;  %v1254_v43 = vpack.c.bf16 %v1238_v27, %v1238_v27  ;;  %3763 = vrcp.f32 %v1704_v63  ;;  %v1745_v47 = vmul.f32 %v3758_v26, %v5158_v23  ;;  %v5914_v63 = vld [vmem:[#allocation39_spill] sm:$0xff] }
 0x375   :  { %v2789_v28 = vsel %vm1062_vm2, %v5392_v35, 0.0  ;;  %v1762_v5 = vpack.c.bf16 %v1746_v59, %v1746_v59 }
 0x376   :  { %v1355_v34 = vunpack.c.l.b16 %v1254_v43  ;;  %v1865_v16 = vpop.permute.xlu2 %1864  ;;  %v1761_v18 = vpack.c.bf16 %v1745_v47, %v1745_v47  ;;  %v5915_v43 = vld [vmem:[#allocation26_spill] sm:$0xff]  ;;  %v5916_v47 = vld [vmem:[#allocation40_spill] sm:$0xff] }
 0x377   :  { %2790 = vadd.xlane.f32.xlu0 %v2789_v28  ;;  %1895 = vmatpush.bf16.msra.mxu1 %v1865_v16  ;;  %v1786_v37 = vunpack.c.l.b16 %v1762_v5  ;;  %v5917_v5 = vld [vmem:[#allocation23_spill] sm:$0xff] }
 0x378   :  { %v1359_v7 = vpack.c.b16 %v1355_v34, %v1354_v20  ;;  %v1785_v3 = vunpack.c.l.b16 %v1761_v18  ;;  %v5918_v18 = vld [vmem:[#allocation21_spill] sm:$0xff] }
 0x379   :  { %v3762_v58 = vpop.eup %3761 }
 0x37a   :  { %3466 = vmatmul.msk.bf16.gmra.mxu1 %vm1062_vm2, %v1359_v7  ;;  %v3764_v57 = vpop.eup %3763  ;;  %v2237_v4 = vpop.xlane.xlu1 %2236  ;;  %v1747_v38 = vmul.f32 %v3762_v58, %v5913_v6  ;;  %v1790_v46 = vpack.c.b16 %v1786_v37, %v1785_v3  ;;  %v5919_v3 = vld [vmem:[#allocation24_spill] sm:$0xff] }
 0x37b   :  { %v2698_v1 = vpop.xlane.xlu0 %2697  ;;  %v1748_v23 = vmul.f32 %v3764_v57, %v5914_v63  ;;  %3765 = vrcp.f32 %v2237_v4 }
 0x37c   :  { %v2742_v60 = vsub.f32 %v5196_v31, %v2698_v1  ;;  %v1763_v41 = vpack.c.bf16 %v1747_v38, %v1747_v38 }
 0x37d   :  { %v1764_v30 = vpack.c.bf16 %v1748_v23, %v1748_v23 }
 0x37e   :  { %v2759_v13 = vmul.f32 1.442695, %v2742_v60  ;;  %v1852_v24 = vunpack.c.l.b16 %v1763_v41 }
 0x37f   :  { %v1853_v59 = vunpack.c.l.b16 %v1764_v30 }
 0x380   :  { %3767 = vpow2.f32 %v2759_v13 }
 0x381   :  { %3769 = vrcp.f32 %v2234_v49  ;;  %v3766_v27 = vpop.eup %3765  ;;  %v1860_v20 = vpack.c.b16 %v1853_v59, %v1852_v24 }
 0x382   :  { %v2297_v34 = vmul.f32 %v3766_v27, %v5198_v56 }
 0x383   :  { %v1707_v32 = vpop.xlane.xlu0 %1706  ;;  %3478 = vmatmul.msk.bf16.gmra.mxu0 %vm1062_vm2, %v1790_v46 }
 0x384   :  { %3771 = vrcp.f32 %v1707_v32  ;;  %2427 = vrot.lane.b32.xlu2 %v5915_v43, %s4062_s16  ;;  %v2313_v1 = vpack.c.bf16 %v2297_v34, %v2297_v34 }
 0x385   :  { %v1320_v31 = vpop.f32.mrf.mxu0 }
 0x386   :  { %v5403_v26 = vpop.eup %3767  ;;  %1425 = vst.msk [vmem:[#allocation2] sm:$0xff] %vm935_vm0, %v1320_v31  ;;  %v2337_v56 = vunpack.c.l.b16 %v2313_v1  ;;  %v5920_v31 = vld [vmem:[#allocation25_spill] sm:$0xff] }
 0x387   :  { %v2792_v49 = vsel %vm1062_vm2, %v5403_v26, 0.0  ;;  %v3770_v28 = vpop.eup %3769 }
 0x388   :  { %2793 = vadd.xlane.f32.xlu1 %v2792_v49  ;;  %v2296_v16 = vmul.f32 %v3770_v28, %v5916_v47  ;;  %v2673_v49 = vpop.f32.mrf.mxu3  ;;  %v5921_v28 = vld [vmem:[#allocation20_spill] sm:$0xff] }
 0x38a   :  { %3479 = vmatmul.msk.bf16.vlgmr.msra.gmra.mxu1 %vm1062_vm2, %v1860_v20  ;;  %v3772_v58 = vpop.eup %3771  ;;  %v2312_v4 = vpack.c.bf16 %v2296_v16, %v2296_v16 }
 0x38b   :  { %v1710_v7 = vpop.xlane.xlu0 %1709  ;;  %2911 = vrot.lane.b32.xlu0 %v5917_v5, %s4071_s6  ;;  %v1749_v60 = vmul.f32 %v3772_v58, %v5209_v45  ;;  %v5922_v5 = vld [vmem:[#allocation30_spill] sm:$0xff] }
 0x38c   :  { %3773 = vrcp.f32 %v1710_v7  ;;  %2909 = vrot.lane.b32.xlu2 %v5918_v18, %s4071_s6  ;;  %v2336_v38 = vunpack.c.l.b16 %v2312_v4  ;;  %v5435_v1 = vadd.f32 %v2673_v49, %v5922_v5 }
 0x38d   :  { %v1322_v57 = vpop.f32.mrf.mxu0  ;;  %v1765_v37 = vpack.c.bf16 %v1749_v60, %v1749_v60  ;;  %v5923_v60 = vld [vmem:[#allocation42_spill] sm:$0xff] }
 0x38e   :  { %1426 = vst.msk [vmem:[#allocation2 + $0x8] sm:$0xff] %vm935_vm0, %v1322_v57  ;;  %v2344_v41 = vpack.c.b16 %v2337_v56, %v2336_v38 }
 0x38f   :  { %v1854_v32 = vunpack.c.l.b16 %v1765_v37 }
 0x390   :  { %v2675_v57 = vpop.f32.mrf.mxu3 }
 0x392   :  { %v3774_v6 = vpop.eup %3773  ;;  %v2349_v63 = vpop.permute.xlu1 %2348 }
 0x393   :  { %v1750_v13 = vmul.f32 %v3774_v6, %v5224_v40  ;;  %v2240_v23 = vpop.xlane.xlu0 %2239  ;;  %2379 = vmatpush.bf16.msrb.mxu0 %v2349_v63  ;;  %2423 = vrot.lane.b32.xlu0 %v5919_v3, %s4062_s16  ;;  %v2717_v6 = vsel %vm1062_vm2, %v5435_v1, -inf  ;;  %v5924_v63 = vld [vmem:[#allocation31_spill] sm:$0xff] }
 0x394   :  { %3775 = vrcp.f32 %v2240_v23  ;;  %v5443_v23 = vadd.f32 %v2675_v57, %v5924_v63 }
 0x395   :  { %v1766_v46 = vpack.c.bf16 %v1750_v13, %v1750_v13  ;;  %v1325_v30 = vpop.f32.mrf.mxu0 }
 0x396   :  { %1427 = vst.msk [vmem:[#allocation2 + $0x10] sm:$0xff] %vm935_vm0, %v1325_v30  ;;  %3491 = vmatmul.msk.bf16.vlgmr.msrb.gmra.mxu0 %vm1062_vm2, %v2344_v41  ;;  %v5925_v30 = vld [vmem:[#allocation22_spill] sm:$0xff] }
 0x397   :  { %v1855_v27 = vunpack.c.l.b16 %v1766_v46 }
 0x399   :  { %v1861_v45 = vpack.c.b16 %v1855_v27, %v1854_v32 }
 0x39a   :  { %v3776_v58 = vpop.eup %3775 }
 0x39b   :  { %v2171_v24 = vpop.xlane.xlu0 %2170  ;;  %3480 = vmatmul.msk.bf16.gmra.mxu1 %vm1062_vm2, %v1861_v45  ;;  %v2298_v56 = vmul.f32 %v3776_v58, %v5923_v60 }
 0x39c   :  { %v2195_v34 = vsub.f32 %v5240_v11, %v2171_v24 }
 0x39d   :  { %v1327_v40 = vpop.f32.mrf.mxu0  ;;  %v2314_v41 = vpack.c.bf16 %v2298_v56, %v2298_v56 }
 0x39e   :  { %1428 = vst.msk [vmem:[#allocation2 + $0x18] sm:$0xff] %vm935_vm0, %v1327_v40  ;;  %v2222_v16 = vmul.f32 1.442695, %v2195_v34  ;;  %v2678_v40 = vpop.f32.mrf.mxu3 }
 0x3a1   :  { %2425 = vrot.lane.b32.xlu1 %v5920_v31, %s4062_s16 }
 0x3a3   :  { %v2701_v59 = vpop.xlane.xlu0 %2700 }
 0x3a4   :  { %v2743_v18 = vsub.f32 %v5246_v33, %v2701_v59  ;;  %v2338_v59 = vunpack.c.l.b16 %v2314_v41 }
 0x3a6   :  { %v2761_v38 = vmul.f32 1.442695, %v2743_v18  ;;  %v2680_v41 = vpop.f32.mrf.mxu3 }
 0x3a9   :  { %2907 = vrot.lane.b32.xlu1 %v5921_v28, %s4071_s6 }
 0x3ab   :  { %v2704_v20 = vpop.xlane.xlu0 %2703 }
 0x3ac   :  { %v2744_v11 = vsub.f32 %v5257_v0, %v2704_v20 }
 0x3ae   :  { %v2763_v46 = vmul.f32 1.442695, %v2744_v11 }
 0x3af   :  { %v1330_v47 = vpop.f32.mrf.mxu0  ;;  %v2243_v7 = vpop.xlane.xlu2 %2242 }
 0x3b0   :  { %1429 = vst.msk [vmem:[#allocation2 + $0x20] sm:$0xff] %vm935_vm0, %v1330_v47  ;;  %3777 = vrcp.f32 %v2243_v7 }
 0x3b1   :  { %2421 = vrot.lane.b32.xlu1 %v4647_v55, %s4062_s16  ;;  %3779 = vpow2.f32 %v2222_v16 }
 0x3b3   :  { %v1713_v4 = vpop.xlane.xlu0 %1712 }
 0x3b4   :  { %3781 = vrcp.f32 %v1713_v4 }
 0x3b5   :  { %2718 = vmax.xlane.f32.xlu2 %v2717_v6  ;;  %3783 = vpow2.f32 %v2761_v38 }
 0x3b6   :  { %v3778_v37 = vpop.eup %3777 }
 0x3b7   :  { %v1332_v13 = vpop.f32.mrf.mxu0  ;;  %v2299_v33 = vmul.f32 %v3778_v37, %v5270_v62  ;;  %v2246_v0 = vpop.xlane.xlu2 %2245  ;;  %v2720_v62 = vsel %vm1062_vm2, %v5443_v23, -inf }
 0x3b8   :  { %1430 = vst.msk [vmem:[#allocation2 + $0x28] sm:$0xff] %vm935_vm0, %v1332_v13  ;;  %v5449_v32 = vpop.eup %3779 }
 0x3b9   :  { %2905 = vrot.lane.b32.xlu1 %v5925_v30, %s4071_s6  ;;  %v2315_v27 = vpack.c.bf16 %v2299_v33, %v2299_v33  ;;  %v2265_v34 = vsel %vm1062_vm2, %v5449_v32, 0.0 }
 0x3ba   :  { %v3782_v24 = vpop.eup %3781 }
 0x3bb   :  { %v1716_v45 = vpop.xlane.xlu0 %1715  ;;  %v2339_v49 = vunpack.c.l.b16 %v2315_v27  ;;  %v1405_v28 = vpop.f32.mrf.mxu1  ;;  %v1751_v47 = vmul.f32 %v3782_v24, %v5272_v2 }
 0x3bc   :  { %3785 = vrcp.f32 %v1716_v45  ;;  %1433 = vst.msk [vmem:[#allocation2 + $0x40] sm:$0xff] %vm935_vm0, %v1405_v28  ;;  %v5459_v58 = vpop.eup %3783  ;;  %v5926_v28 = vld [vmem:[#allocation32_spill] sm:$0xff] }
 0x3bd   :  { %3787 = vpow2.f32 %v2763_v46  ;;  %v5454_v20 = vpop.xlane.xlu1 %2167  ;;  %2721 = vmax.xlane.f32.xlu0 %v2720_v62  ;;  %2266 = vadd.xlane.f32.xlu2 %v2265_v34  ;;  %v2345_v16 = vpack.c.b16 %v2339_v49, %v2338_v59  ;;  %v1767_v4 = vpack.c.bf16 %v1751_v47, %v1751_v47  ;;  %v2795_v37 = vsel %vm1062_vm2, %v5459_v58, 0.0 }
 0x3be   :  { %3789 = vrcp.f32 %v2246_v0  ;;  %v5475_v0 = vadd.f32 %v2678_v40, %v5906_v9  ;;  %v5479_v62 = vadd.f32 %v2680_v41, %v5926_v28 }
 0x3bf   :  { %v1335_v7 = vpop.f32.mrf.mxu0  ;;  %3492 = vmatmul.msk.bf16.gmra.mxu0 %vm1062_vm2, %v2345_v16  ;;  %v2177_v5 = vpop.xlane.xlu2 %2176  ;;  %v1856_v46 = vunpack.c.l.b16 %v1767_v4  ;;  %v2194_v4 = vsub.f32 %v5292_v42, %v5454_v20 }
 0x3c0   :  { %1431 = vst.msk [vmem:[#allocation2 + $0x30] sm:$0xff] %vm935_vm0, %v1335_v7  ;;  %v2197_v6 = vsub.f32 %v5300_v51, %v2177_v5  ;;  %v2726_v16 = vsel %vm1062_vm2, %v5479_v62, -inf }
 0x3c2   :  { %v3786_v57 = vpop.eup %3785  ;;  %v2226_v27 = vmul.f32 1.442695, %v2197_v6 }
 0x3c3   :  { %v5463_v18 = vpop.eup %3787  ;;  %v1752_v60 = vmul.f32 %v3786_v57, %v5281_v22  ;;  %v2249_v56 = vpop.xlane.xlu0 %2248 }
 0x3c4   :  { %v3790_v11 = vpop.eup %3789  ;;  %3791 = vrcp.f32 %v2249_v56  ;;  %v1407_v38 = vpop.f32.mrf.mxu1  ;;  %v2798_v63 = vsel %vm1062_vm2, %v5463_v18, 0.0 }
 0x3c5   :  { %v1768_v2 = vpack.c.bf16 %v1752_v60, %v1752_v60  ;;  %1434 = vst.msk [vmem:[#allocation2 + $0x48] sm:$0xff] %vm935_vm0, %v1407_v38  ;;  %v2174_v13 = vpop.xlane.xlu1 %2173  ;;  %2796 = vadd.xlane.f32.xlu0 %v2795_v37  ;;  %v2300_v22 = vmul.f32 %v3790_v11, %v5283_v52  ;;  %2799 = vadd.xlane.f32.xlu2 %v2798_v63  ;;  %v2220_v37 = vmul.f32 1.442695, %v2194_v4  ;;  %v2683_v63 = vpop.f32.mrf.mxu3 }
 0x3c6   :  { %v2196_v30 = vsub.f32 %v5310_v36, %v2174_v13  ;;  %v2723_v36 = vsel %vm1062_vm2, %v5475_v0, -inf }
 0x3c7   :  { %v1857_v33 = vunpack.c.l.b16 %v1768_v2  ;;  %v1337_v51 = vpop.f32.mrf.mxu0  ;;  %v1719_v24 = vpop.xlane.xlu2 %1718  ;;  %v2316_v34 = vpack.c.bf16 %v2300_v22, %v2300_v22 }
 0x3c8   :  { %v2224_v45 = vmul.f32 1.442695, %v2196_v30  ;;  %1432 = vst.msk [vmem:[#allocation2 + $0x38] sm:$0xff] %vm935_vm0, %v1337_v51 }
 0x3c9   :  { %v1862_v59 = vpack.c.b16 %v1857_v33, %v1856_v46  ;;  %v2340_v7 = vunpack.c.l.b16 %v2316_v34 }
 0x3ca   :  { %v3792_v49 = vpop.eup %3791  ;;  %3793 = vpow2.f32 %v2224_v45  ;;  %v5506_v45 = vadd.f32 %v2683_v63, %v5907_v14 }
 0x3cb   :  { %v2301_v52 = vmul.f32 %v3792_v49, %v5304_v61  ;;  %v2707_v47 = vpop.xlane.xlu0 %2706  ;;  %3481 = vmatmul.msk.bf16.gmra.mxu1 %vm1062_vm2, %v1862_v59  ;;  %3795 = vpow2.f32 %v2226_v27 }
 0x3cc   :  { %3797 = vrcp.f32 %v1719_v24  ;;  %v2745_v30 = vsub.f32 %v5325_v10, %v2707_v47 }
 0x3cd   :  { %v2317_v9 = vpack.c.bf16 %v2301_v52, %v2301_v52  ;;  %v2710_v40 = vpop.xlane.xlu1 %2709  ;;  %2724 = vmax.xlane.f32.xlu0 %v2723_v36  ;;  %2727 = vmax.xlane.f32.xlu2 %v2726_v16 }
 0x3ce   :  { %v2746_v57 = vsub.f32 %v5332_v44, %v2710_v40  ;;  %v2765_v52 = vmul.f32 1.442695, %v2745_v30 }
 0x3cf   :  { %v2341_v5 = vunpack.c.l.b16 %v2317_v9  ;;  %v1410_v61 = vpop.f32.mrf.mxu1  ;;  %v2255_v56 = vpop.xlane.xlu2 %2254 }
 0x3d0   :  { %v2767_v60 = vmul.f32 1.442695, %v2746_v57  ;;  %1435 = vst.msk [vmem:[#allocation2 + $0x50] sm:$0xff] %vm935_vm0, %v1410_v61  ;;  %v5491_v2 = vpop.eup %3793  ;;  %3799 = vrcp.f32 %v2255_v56  ;;  %v2685_v61 = vpop.f32.mrf.mxu3 }
 0x3d1   :  { %v2346_v11 = vpack.c.b16 %v2341_v5, %v2340_v7  ;;  %v5493_v6 = vpop.eup %3795  ;;  %v2268_v42 = vsel %vm1062_vm2, %v5491_v2, 0.0 }
 0x3d2   :  { %3801 = vpow2.f32 %v2767_v60  ;;  %v3798_v44 = vpop.eup %3797  ;;  %v2271_v13 = vsel %vm1062_vm2, %v5493_v6, 0.0 }
 0x3d3   :  { %v1722_v38 = vpop.xlane.xlu0 %1721  ;;  %3493 = vmatmul.msk.bf16.gmra.mxu0 %vm1062_vm2, %v2346_v11  ;;  %v1753_v41 = vmul.f32 %v3798_v44, %v5320_v48 }
 0x3d4   :  { %3803 = vrcp.f32 %v1722_v38 }
 0x3d5   :  { %2269 = vadd.xlane.f32.xlu0 %v2268_v42  ;;  %v2252_v20 = vpop.xlane.xlu1 %2251  ;;  %2272 = vadd.xlane.f32.xlu2 %v2271_v13  ;;  %v1769_v59 = vpack.c.bf16 %v1753_v41, %v1753_v41 }
 0x3d6   :  { %3805 = vrcp.f32 %v2252_v20  ;;  %v3800_v46 = vpop.eup %3799 }
 0x3d7   :  { %v1412_v22 = vpop.f32.mrf.mxu1  ;;  %3807 = vpow2.f32 %v2220_v37  ;;  %v2713_v51 = vpop.xlane.xlu2 %2712  ;;  %v2303_v24 = vmul.f32 %v3800_v46, %v5339_v53  ;;  %v2729_v53 = vsel %vm1062_vm2, %v5506_v45, -inf }
 0x3d8   :  { %v5501_v33 = vpop.eup %3801  ;;  %1436 = vst.msk [vmem:[#allocation2 + $0x58] sm:$0xff] %vm935_vm0, %v1412_v22  ;;  %v2747_v22 = vsub.f32 %v5353_v8, %v2713_v51 }
 0x3d9   :  { %v2804_v10 = vsel %vm1062_vm2, %v5501_v33, 0.0  ;;  %v2319_v47 = vpack.c.bf16 %v2303_v24, %v2303_v24  ;;  %v2688_v24 = vpop.f32.mrf.mxu3 }
 0x3da   :  { %v3804_v27 = vpop.eup %3803  ;;  %v5545_v8 = vadd.f32 %v2688_v24, %v5910_v15 }
 0x3db   :  { %v1754_v48 = vmul.f32 %v3804_v27, %v5344_v39  ;;  %v2180_v49 = vpop.xlane.xlu0 %2179  ;;  %v1858_v39 = vunpack.c.l.b16 %v1769_v59  ;;  %v2343_v56 = vunpack.c.l.b16 %v2319_v47  ;;  %v2769_v59 = vmul.f32 1.442695, %v2747_v22 }
 0x3dc   :  { %v2198_v28 = vsub.f32 %v5359_v29, %v2180_v49  ;;  %v3806_v34 = vpop.eup %3805  ;;  %v5542_v49 = vadd.f32 %v2685_v61, %v4903_v50 }
 0x3dd   :  { %v1770_v9 = vpack.c.bf16 %v1754_v48, %v1754_v48  ;;  %v2302_v36 = vmul.f32 %v3806_v34, %v5348_v54  ;;  %2805 = vadd.xlane.f32.xlu0 %v2804_v10  ;;  %v2183_v14 = vpop.xlane.xlu1 %2182  ;;  %v5516_v16 = vpop.eup %3807  ;;  %2730 = vmax.xlane.f32.xlu2 %v2729_v53  ;;  %v2735_v34 = vsel %vm1062_vm2, %v5545_v8, -inf }
 0x3de   :  { %v2228_v40 = vmul.f32 1.442695, %v2198_v28  ;;  %v2199_v29 = vsub.f32 %v5367_v25, %v2183_v14  ;;  %v2262_v38 = vsel %vm1062_vm2, %v5516_v16, 0.0  ;;  %v2732_v28 = vsel %vm1062_vm2, %v5542_v49, -inf }
 0x3df   :  { %v1859_v7 = vunpack.c.l.b16 %v1770_v9  ;;  %v2318_v5 = vpack.c.bf16 %v2302_v36, %v2302_v36  ;;  %v1415_v57 = vpop.f32.mrf.mxu1  ;;  %v2261_v54 = vpop.xlane.xlu2 %2260 }
 0x3e0   :  { %3809 = vpow2.f32 %v2228_v40  ;;  %v2230_v4 = vmul.f32 1.442695, %v2199_v29  ;;  %1437 = vst.msk [vmem:[#allocation2 + $0x60] sm:$0xff] %vm935_vm0, %v1415_v57 }
 0x3e1   :  { %3811 = vpow2.f32 %v2765_v52  ;;  %v1863_v60 = vpack.c.b16 %v1859_v7, %v1858_v39  ;;  %v2342_v11 = vunpack.c.l.b16 %v2318_v5  ;;  %v2690_v10 = vpop.f32.mrf.mxu3 }
 0x3e2   :  { %3813 = vpow2.f32 %v2230_v4  ;;  %v5559_v47 = vadd.f32 %v2690_v10, %v5911_v17  ;;  %v5564_v17 = vpop.f32.mrf.mxu0 }
 0x3e3   :  { %v2716_v44 = vpop.xlane.xlu0 %2715  ;;  %2263 = vadd.xlane.f32.xlu1 %v2262_v38  ;;  %3482 = vmatmul.msk.bf16.gmra.mxu1 %vm1062_vm2, %v1863_v60  ;;  %v2347_v37 = vpack.c.b16 %v2343_v56, %v2342_v11 }
 0x3e4   :  { %v2748_v25 = vsub.f32 %v5378_v19, %v2716_v44  ;;  %v2738_v53 = vsel %vm1062_vm2, %v5559_v47, -inf }
 0x3e5   :  { %3494 = vmatmul.msk.bf16.gmra.mxu0 %vm1062_vm2, %v2347_v37  ;;  %v2258_v39 = vpop.xlane.xlu1 %2257 }
 0x3e6   :  { %v5524_v42 = vpop.eup %3809  ;;  %v2771_v20 = vmul.f32 1.442695, %v2748_v25 }
 0x3e7   :  { %v5527_v13 = vpop.eup %3811  ;;  %v2274_v63 = vsel %vm1062_vm2, %v5524_v42, 0.0  ;;  %v1417_v41 = vpop.f32.mrf.mxu1 }
 0x3e8   :  { %3815 = vpow2.f32 %v2771_v20  ;;  %2275 = vadd.xlane.f32.xlu0 %v2274_v63  ;;  %v5531_v46 = vpop.eup %3813  ;;  %1438 = vst.msk [vmem:[#allocation2 + $0x68] sm:$0xff] %vm935_vm0, %v1417_v41  ;;  %v2428_v19 = vpop.permute.xlu2 %2427  ;;  %v2801_v30 = vsel %vm1062_vm2, %v5527_v13, 0.0 }
 0x3e9   :  { %2449 = vmatpush.bf16.msrb.mxu1 %v2428_v19  ;;  %v2277_v27 = vsel %vm1062_vm2, %v5531_v46, 0.0  ;;  %3817 = vpow2.f32 %v2769_v59 }
 0x3ea   :  { %2278 = vadd.xlane.f32.xlu2 %v2277_v27  ;;  %3819 = vrcp.f32 %v2258_v39  ;;  %v5570_v25 = vpop.f32.mrf.mxu0 }
 0x3eb   :  { %2802 = vadd.xlane.f32.xlu1 %v2801_v30  ;;  %v2791_v52 = vpop.xlane.xlu0 %2790  ;;  %3821 = vrcp.f32 %v2261_v54 }
 0x3ee   :  { %v5539_v48 = vpop.eup %3815 }
 0x3ef   :  { %v2810_v51 = vsel %vm1062_vm2, %v5539_v48, 0.0  ;;  %v5553_v9 = vpop.eup %3817 }
 0x3f0   :  { %2811 = vadd.xlane.f32.xlu0 %v2810_v51  ;;  %v2807_v15 = vsel %vm1062_vm2, %v5553_v9, 0.0  ;;  %v2910_v14 = vpop.permute.xlu2 %2909  ;;  %v3820_v5 = vpop.eup %3819 }
 0x3f1   :  { %v3822_v61 = vpop.eup %3821  ;;  %v2304_v4 = vmul.f32 %v3820_v5, %v5383_v12 }
 0x3f2   :  { %2736 = vmax.xlane.f32.xlu2 %v2735_v34  ;;  %v2305_v60 = vmul.f32 %v3822_v61, %v5375_v21  ;;  %v5575_v30 = vpop.f32.mrf.mxu0 }
 0x3f3   :  { %2733 = vmax.xlane.f32.xlu1 %v2732_v28  ;;  %v2320_v54 = vpack.c.bf16 %v2304_v4, %v2304_v4 }
 0x3f4   :  { %v2321_v38 = vpack.c.bf16 %v2305_v60, %v2305_v60 }
 0x3f5   :  { %v2409_v37 = vunpack.c.l.b16 %v2320_v54 }
 0x3f6   :  { %v2410_v63 = vunpack.c.l.b16 %v2321_v38 }
 0x3f7   :  { %v1420_v50 = vpop.f32.mrf.mxu1 }
 0x3f8   :  { %1439 = vst.msk [vmem:[#allocation2 + $0x70] sm:$0xff] %vm935_vm0, %v1420_v50  ;;  %v2417_v21 = vpack.c.b16 %v2410_v63, %v2409_v37 }
 0x3fa   :  { %v5580_v50 = vpop.f32.mrf.mxu0 }
 0x3fb   :  { %2808 = vadd.xlane.f32.xlu1 %v2807_v15  ;;  %v2794_v7 = vpop.xlane.xlu1 %2793 }
 0x3fc   :  { %3823 = vrcp.f32 %v2794_v7 }
 0x3fd   :  { %v2912_v36 = vpop.permute.xlu0 %2911  ;;  %3825 = vrcp.f32 %v2791_v52 }
 0x3fe   :  { %2933 = vmatpush.bf16.msra.mxu0 %v2912_v36 }
 0x3ff   :  { %v1422_v40 = vpop.f32.mrf.mxu1 }
 0x400   :  { %1440 = vst.msk [vmem:[#allocation2 + $0x78] sm:$0xff] %vm935_vm0, %v1422_v40  ;;  %vm1981_vm0 = vcmask 523520  }
 0x402   :  { %2934 = vmatpush.bf16.msra.mxu0 %v2910_v14  ;;  %v3824_v11 = vpop.eup %3823 }
 0x403   :  { %2739 = vmax.xlane.f32.xlu1 %v2738_v53  ;;  %v3826_v44 = vpop.eup %3825  ;;  %v2854_v20 = vmul.f32 %v3824_v11, %v5403_v26  ;;  %v5590_v53 = vpop.f32.mrf.mxu0 }
 0x404   :  { %v2853_v12 = vmul.f32 %v3826_v44, %v5392_v35 }
 0x405   :  { %v2424_v57 = vpop.permute.xlu0 %2423  ;;  %v2870_v22 = vpack.c.bf16 %v2854_v20, %v2854_v20 }
 0x406   :  { %v2869_v19 = vpack.c.bf16 %v2853_v12, %v2853_v12 }
 0x408   :  { %v2893_v24 = vunpack.c.l.b16 %v2869_v19 }
 0x40b   :  { %v5595_v38 = vpop.f32.mrf.mxu0 }
 0x413   :  { %v2426_v29 = vpop.permute.xlu1 %2425 }
 0x414   :  { %2450 = vmatpush.bf16.msrb.mxu1 %v2426_v29 }
 0x418   :  { %2451 = vmatpush.bf16.msrb.mxu1 %v2424_v57 }
 0x41b   :  { %v2908_v56 = vpop.permute.xlu1 %2907 }
 0x41c   :  { %2984 = vrot.lane.b32.xlu1 %v5915_v43, %s4071_s6  ;;  %2935 = vmatpush.bf16.msra.mxu0 %v2908_v56  ;;  %v2894_v43 = vunpack.c.l.b16 %v2870_v22 }
 0x41e   :  { %v2901_v26 = vpack.c.b16 %v2894_v43, %v2893_v24 }
 0x423   :  { %v2422_v41 = vpop.permute.xlu1 %2421 }
 0x424   :  { %2452 = vmatpush.bf16.msrb.mxu1 %v2422_v41 }
 0x427   :  { %3495 = vmatmul.msk.bf16.vlgmr.msrb.gmra.mxu1 %vm1062_vm2, %v2417_v21 }
 0x428   :  { %v2719_v27 = vpop.xlane.xlu2 %2718 }
 0x429   :  { %v2749_v59 = vsub.f32 %v5435_v1, %v2719_v27 }
 0x42b   :  { %v2906_v51 = vpop.permute.xlu1 %2905  ;;  %v2773_v28 = vmul.f32 1.442695, %v2749_v59 }
 0x42c   :  { %2936 = vmatpush.bf16.msra.mxu0 %v2906_v51 }
 0x42d   :  { %3827 = vpow2.f32 %v2773_v28 }
 0x42f   :  { %3507 = vmatmul.msk.bf16.vlgmr.msra.gmra.mxu0 %vm1062_vm2, %v2901_v26 }
 0x430   :  { %v2722_v35 = vpop.xlane.xlu0 %2721  ;;  %v2267_v52 = vpop.xlane.xlu2 %2266 }
 0x431   :  { %v2750_v34 = vsub.f32 %v5443_v23, %v2722_v35 }
 0x433   :  { %v2775_v15 = vmul.f32 1.442695, %v2750_v34  ;;  %v5582_v10 = vpop.eup %3827 }
 0x434   :  { %v2813_v1 = vsel %vm1062_vm2, %v5582_v10, 0.0 }
 0x435   :  { %3829 = vpow2.f32 %v2775_v15  ;;  %2814 = vadd.xlane.f32.xlu0 %v2813_v1 }
 0x438   :  { %v2797_v36 = vpop.xlane.xlu0 %2796  ;;  %v2800_v40 = vpop.xlane.xlu2 %2799 }
 0x439   :  { %3831 = vrcp.f32 %v2797_v36 }
 0x43a   :  { %3833 = vrcp.f32 %v2800_v40 }
 0x43b   :  { %v5586_v14 = vpop.eup %3829 }
 0x43c   :  { %v2816_v23 = vsel %vm1062_vm2, %v5586_v14, 0.0 }
 0x43d   :  { %2817 = vadd.xlane.f32.xlu2 %v2816_v23 }
 0x43f   :  { %v3832_v39 = vpop.eup %3831 }
 0x440   :  { %v3834_v7 = vpop.eup %3833  ;;  %v2855_v29 = vmul.f32 %v3832_v39, %v5459_v58  ;;  %v2725_v5 = vpop.xlane.xlu0 %2724 }
 0x441   :  { %v2856_v57 = vmul.f32 %v3834_v7, %v5463_v18  ;;  %v2751_v61 = vsub.f32 %v5475_v0, %v2725_v5  ;;  %v2728_v37 = vpop.xlane.xlu2 %2727  ;;  %v5604_v0 = vpop.f32.mrf.mxu0 }
 0x442   :  { %v2871_v4 = vpack.c.bf16 %v2855_v29, %v2855_v29 }
 0x443   :  { %v2872_v60 = vpack.c.bf16 %v2856_v57, %v2856_v57  ;;  %v2777_v56 = vmul.f32 1.442695, %v2751_v61 }
 0x444   :  { %v2895_v54 = vunpack.c.l.b16 %v2871_v4 }
 0x445   :  { %v2896_v11 = vunpack.c.l.b16 %v2872_v60  ;;  %3835 = vpow2.f32 %v2777_v56  ;;  %v2752_v60 = vsub.f32 %v5479_v62, %v2728_v37 }
 0x446   :  { %3837 = vrcp.f32 %v2267_v52 }
 0x447   :  { %v2902_v44 = vpack.c.b16 %v2896_v11, %v2895_v54 }
 0x448   :  { %v2270_v20 = vpop.xlane.xlu0 %2269 }
 0x449   :  { %3508 = vmatmul.msk.bf16.gmra.mxu0 %vm1062_vm2, %v2902_v44  ;;  %2982 = vrot.lane.b32.xlu0 %v5920_v31, %s4071_s6  ;;  %v2273_v63 = vpop.xlane.xlu2 %2272  ;;  %v5611_v22 = vpop.f32.mrf.mxu0 }
 0x44b   :  { %v5600_v58 = vpop.eup %3835 }
 0x44c   :  { %v2819_v18 = vsel %vm1062_vm2, %v5600_v58, 0.0  ;;  %v3838_v21 = vpop.eup %3837 }
 0x44d   :  { %2820 = vadd.xlane.f32.xlu1 %v2819_v18  ;;  %v2307_v31 = vmul.f32 %v3838_v21, %v5449_v32 }
 0x44f   :  { %v2323_v51 = vpack.c.bf16 %v2307_v31, %v2307_v31 }
 0x450   :  { %v2806_v12 = vpop.xlane.xlu0 %2805 }
 0x451   :  { %2978 = vrot.lane.b32.xlu0 %v4647_v55, %s4071_s6  ;;  %v2731_v43 = vpop.xlane.xlu2 %2730  ;;  %v2412_v28 = vunpack.c.l.b16 %v2323_v51  ;;  %v5615_v32 = vpop.f32.mrf.mxu0 }
 0x452   :  { %v2753_v11 = vsub.f32 %v5506_v45, %v2731_v43 }
 0x454   :  { %v2781_v37 = vmul.f32 1.442695, %v2753_v11 }
 0x455   :  { %2980 = vrot.lane.b32.xlu2 %v5919_v3, %s4071_s6 }
 0x456   :  { %v2264_v41 = vpop.xlane.xlu1 %2263 }
 0x457   :  { %3839 = vrcp.f32 %v2264_v41 }
 0x458   :  { %3841 = vrcp.f32 %v2806_v12 }
 0x459   :  { %3843 = vrcp.f32 %v2270_v20  ;;  %v2779_v20 = vmul.f32 1.442695, %v2752_v60 }
 0x45b   :  { %v2276_v19 = vpop.xlane.xlu0 %2275 }
 0x45d   :  { %v3840_v27 = vpop.eup %3839  ;;  %v2279_v15 = vpop.xlane.xlu2 %2278 }
 0x45e   :  { %v2803_v24 = vpop.xlane.xlu1 %2802  ;;  %v3842_v59 = vpop.eup %3841  ;;  %v2306_v55 = vmul.f32 %v3840_v27, %v5516_v16 }
 0x45f   :  { %3845 = vrcp.f32 %v2803_v24  ;;  %v2858_v3 = vmul.f32 %v3842_v59, %v5501_v33  ;;  %v3844_v34 = vpop.eup %3843 }
 0x460   :  { %3847 = vrcp.f32 %v2273_v63  ;;  %v2322_v26 = vpack.c.bf16 %v2306_v55, %v2306_v55  ;;  %v2308_v33 = vmul.f32 %v3844_v34, %v5491_v2 }
 0x461   :  { %v2874_v40 = vpack.c.bf16 %v2858_v3, %v2858_v3 }
 0x462   :  { %v2411_v35 = vunpack.c.l.b16 %v2322_v26 }
 0x463   :  { %v2812_v39 = vpop.xlane.xlu0 %2811  ;;  %v2898_v61 = vunpack.c.l.b16 %v2874_v40 }
 0x464   :  { %v2418_v1 = vpack.c.b16 %v2412_v28, %v2411_v35  ;;  %3849 = vrcp.f32 %v2812_v39 }
 0x465   :  { %v3846_v52 = vpop.eup %3845 }
 0x466   :  { %v3848_v36 = vpop.eup %3847  ;;  %v2857_v23 = vmul.f32 %v3846_v52, %v5527_v13  ;;  %v2734_v7 = vpop.xlane.xlu1 %2733  ;;  %3496 = vmatmul.msk.bf16.gmra.mxu1 %vm1062_vm2, %v2418_v1  ;;  %v2324_v13 = vpack.c.bf16 %v2308_v33, %v2308_v33 }
 0x467   :  { %v2754_v16 = vsub.f32 %v5542_v49, %v2734_v7  ;;  %v2309_v5 = vmul.f32 %v3848_v36, %v5493_v6  ;;  %v5624_v49 = vpop.f32.mrf.mxu0  ;;  %v2737_v6 = vpop.xlane.xlu2 %2736 }
 0x468   :  { %v2873_v29 = vpack.c.bf16 %v2857_v23, %v2857_v23  ;;  %v2413_v63 = vunpack.c.l.b16 %v2324_v13  ;;  %v2755_v41 = vsub.f32 %v5545_v8, %v2737_v6 }
 0x469   :  { %v2783_v57 = vmul.f32 1.442695, %v2754_v16  ;;  %v2325_v54 = vpack.c.bf16 %v2309_v5, %v2309_v5  ;;  %v1897_v5 = vpop.f32.mrf.mxu1 }
 0x46a   :  { %v2897_v4 = vunpack.c.l.b16 %v2873_v29  ;;  %v3850_v2 = vpop.eup %3849 }
 0x46b   :  { %3851 = vpow2.f32 %v2783_v57  ;;  %v2414_v62 = vunpack.c.l.b16 %v2325_v54  ;;  %v2860_v12 = vmul.f32 %v3850_v2, %v5539_v48 }
 0x46c   :  { %v2903_v56 = vpack.c.b16 %v2898_v61, %v2897_v4 }
 0x46d   :  { %v2419_v31 = vpack.c.b16 %v2414_v62, %v2413_v63  ;;  %v2876_v24 = vpack.c.bf16 %v2860_v12, %v2860_v12 }
 0x46e   :  { %v2809_v44 = vpop.xlane.xlu1 %2808  ;;  %3509 = vmatmul.msk.bf16.gmra.mxu0 %vm1062_vm2, %v2903_v56 }
 0x46f   :  { %3853 = vrcp.f32 %v2809_v44  ;;  %v5633_v27 = vpop.f32.mrf.mxu0  ;;  %v2900_v35 = vunpack.c.l.b16 %v2876_v24 }
 0x470   :  { %3855 = vrcp.f32 %v2279_v15 }
 0x471   :  { %v5627_v18 = vpop.eup %3851  ;;  %3857 = vrcp.f32 %v2276_v19  ;;  %v2785_v19 = vmul.f32 1.442695, %v2755_v41  ;;  %v5660_v4 = vpop.f32.mrf.mxu1 }
 0x472   :  { %v2828_v45 = vsel %vm1062_vm2, %v5627_v18, 0.0  ;;  %3859 = vpow2.f32 %v2779_v20 }
 0x473   :  { %2829 = vadd.xlane.f32.xlu1 %v2828_v45  ;;  %3861 = vpow2.f32 %v2781_v37 }
 0x474   :  { %3863 = vpow2.f32 %v2785_v19 }
 0x475   :  { %v3854_v21 = vpop.eup %3853 }
 0x476   :  { %v3856_v43 = vpop.eup %3855  ;;  %v2859_v59 = vmul.f32 %v3854_v21, %v5553_v9  ;;  %v2740_v51 = vpop.xlane.xlu1 %2739  ;;  %3497 = vmatmul.msk.bf16.gmra.mxu1 %vm1062_vm2, %v2419_v31 }
 0x477   :  { %v2756_v48 = vsub.f32 %v5559_v47, %v2740_v51  ;;  %v3858_v55 = vpop.eup %3857  ;;  %v2311_v8 = vmul.f32 %v3856_v43, %v5531_v46  ;;  %v2388_v40 = vpop.f32.mrf.mxu0  ;;  %v3594_v51 = vld [vmem:[#allocation12 + $0x38] sm:$0xff] }
 0x478   :  { %v2875_v26 = vpack.c.bf16 %v2859_v59, %v2859_v59  ;;  %v5638_v3 = vpop.eup %3859  ;;  %v2310_v15 = vmul.f32 %v3858_v55, %v5524_v42  ;;  %3204 = vmatpush.bf16.msra.mxu2 %v3594_v51 }
 0x479   :  { %v2787_v28 = vmul.f32 1.442695, %v2756_v48  ;;  %v5641_v52 = vpop.eup %3861  ;;  %v2822_v9 = vsel %vm1062_vm2, %v5638_v3, 0.0  ;;  %v2327_v1 = vpack.c.bf16 %v2311_v8, %v2311_v8  ;;  %v1902_v13 = vpop.f32.mrf.mxu1  ;;  %v3593_v48 = vld [vmem:[#allocation12 + $0x30] sm:$0xff]  ;;  %v3592_v8 = vld [vmem:[#allocation12 + $0x28] sm:$0xff] }
 0x47a   :  { %v2899_v34 = vunpack.c.l.b16 %v2875_v26  ;;  %v2825_v46 = vsel %vm1062_vm2, %v5641_v52, 0.0  ;;  %v2326_v36 = vpack.c.bf16 %v2310_v15, %v2310_v15  ;;  %v5649_v23 = vpop.eup %3863 }
 0x47b   :  { %3865 = vpow2.f32 %v2787_v28  ;;  %2823 = vadd.xlane.f32.xlu0 %v2822_v9  ;;  %v2416_v39 = vunpack.c.l.b16 %v2327_v1  ;;  %v2831_v16 = vsel %vm1062_vm2, %v5649_v23, 0.0  ;;  %v3591_v9 = vld [vmem:[#allocation12 + $0x20] sm:$0xff] }
 0x47c   :  { %v2904_v47 = vpack.c.b16 %v2900_v35, %v2899_v34  ;;  %v2415_v7 = vunpack.c.l.b16 %v2326_v36  ;;  %3205 = vmatpush.bf16.msra.mxu2 %v3593_v48 }
 0x47e   :  { %3510 = vmatmul.msk.bf16.gmra.mxu0 %vm1062_vm2, %v2904_v47  ;;  %2826 = vadd.xlane.f32.xlu2 %v2825_v46  ;;  %v2420_v29 = vpack.c.b16 %v2416_v39, %v2415_v7 }
 0x47f   :  { %v2391_v57 = vpop.f32.mrf.mxu0 }
 0x480   :  { %3206 = vmatpush.bf16.msra.mxu2 %v3592_v8 }
 0x481   :  { %v5651_v42 = vpop.eup %3865  ;;  %v5670_v11 = vpop.f32.mrf.mxu1 }
 0x482   :  { %v2834_v33 = vsel %vm1062_vm2, %v5651_v42, 0.0 }
 0x483   :  { %2832 = vadd.xlane.f32.xlu0 %v2831_v16 }
 0x484   :  { %3207 = vmatpush.bf16.msra.mxu2 %v3591_v9 }
 0x486   :  { %3498 = vmatmul.msk.bf16.gmra.mxu1 %vm1062_vm2, %v2420_v29  ;;  %2835 = vadd.xlane.f32.xlu2 %v2834_v33 }
 0x487   :  { %v2393_v60 = vpop.f32.mrf.mxu0 }
 0x489   :  { %v5675_v44 = vpop.f32.mrf.mxu1 }
 0x48c   :  { %1933 = vrot.lane.b32.xlu1 %v5564_v17, %s4071_s6 }
 0x48e   :  { %v2985_v61 = vpop.permute.xlu1 %2984 }
 0x48f   :  { %3006 = vmatpush.bf16.msra.mxu1 %v2985_v61  ;;  %v5664_v56 = vpop.f32.mrf.mxu0 }
 0x491   :  { %v5681_v20 = vpop.f32.mrf.mxu1 }
 0x497   :  { %1935 = vrot.lane.b32.xlu0 %v5570_v25, %s4071_s6  ;;  %v2398_v54 = vpop.f32.mrf.mxu0 }
 0x49e   :  { %2490 = vrot.lane.b32.xlu2 %v5615_v32, %s4062_s16 }
 0x49f   :  { %2492 = vrot.lane.b32.xlu0 %v5624_v49, %s4062_s16 }
 0x4a7   :  { %1937 = vrot.lane.b32.xlu0 %v5575_v30, %s4071_s6 }
 0x4a8   :  { %v2815_v25 = vpop.xlane.xlu0 %2814 }
 0x4ac   :  { %v2938_v17 = vpop.f32.mrf.mxu0 }
 0x4ad   :  { %3047 = vrot.lane.b32.xlu1 %v2938_v17, %s4070_s2 }
 0x4af   :  { %2496 = vrot.lane.b32.xlu0 %v2388_v40, %s4062_s16 }
 0x4b0   :  { %v2818_v2 = vpop.xlane.xlu2 %2817 }
 0x4b1   :  { %3867 = vrcp.f32 %v2818_v2 }
 0x4b2   :  { %3869 = vrcp.f32 %v2815_v25  ;;  %v3587_v25 = vld [vmem:[#allocation12] sm:$0xff] }
 0x4b4   :  { %v2940_v32 = vpop.f32.mrf.mxu0 }
 0x4b5   :  { %1939 = vrot.lane.b32.xlu1 %v5580_v50, %s4071_s6  ;;  %3049 = vrot.lane.b32.xlu2 %v2940_v32, %s4070_s2  ;;  %v5689_v50 = vpop.f32.mrf.mxu1 }
 0x4b7   :  { %v3868_v49 = vpop.eup %3867  ;;  %1941 = vrot.lane.b32.xlu0 %v5590_v53, %s4071_s6 }
 0x4b8   :  { %v3870_v30 = vpop.eup %3869  ;;  %v2862_v6 = vmul.f32 %v3868_v49, %v5586_v14  ;;  %v2981_v45 = vpop.permute.xlu2 %2980 }
 0x4b9   :  { %v2861_v63 = vmul.f32 %v3870_v30, %v5582_v10 }
 0x4ba   :  { %v2878_v37 = vpack.c.bf16 %v2862_v6, %v2862_v6 }
 0x4bb   :  { %v2983_v62 = vpop.permute.xlu0 %2982  ;;  %v2877_v12 = vpack.c.bf16 %v2861_v63, %v2861_v63 }
 0x4bc   :  { %3007 = vmatpush.bf16.msra.mxu1 %v2983_v62  ;;  %v2967_v41 = vunpack.c.l.b16 %v2878_v37 }
 0x4bd   :  { %2494 = vrot.lane.b32.xlu2 %v5633_v27, %s4062_s16  ;;  %v2966_v53 = vunpack.c.l.b16 %v2877_v12  ;;  %v5696_v10 = vpop.f32.mrf.mxu1 }
 0x4bf   :  { %2500 = vrot.lane.b32.xlu0 %v2393_v60, %s4062_s16  ;;  %v2974_v14 = vpack.c.b16 %v2967_v41, %v2966_v53  ;;  %v3588_v60 = vld [vmem:[#allocation12 + $0x8] sm:$0xff] }
 0x4c0   :  { %3008 = vmatpush.bf16.msra.mxu1 %v2981_v45  ;;  %v2821_v59 = vpop.xlane.xlu1 %2820 }
 0x4c1   :  { %3871 = vrcp.f32 %v2821_v59 }
 0x4c3   :  { %v2979_v21 = vpop.permute.xlu0 %2978 }
 0x4c4   :  { %3009 = vmatpush.bf16.msra.mxu1 %v2979_v21 }
 0x4c5   :  { %v5702_v27 = vpop.f32.mrf.mxu1 }
 0x4c6   :  { %v2943_v31 = vpop.f32.mrf.mxu0 }
 0x4c7   :  { %3051 = vrot.lane.b32.xlu1 %v2943_v31, %s4070_s2  ;;  %1945 = vrot.lane.b32.xlu0 %v5604_v0, %s4071_s6  ;;  %v3872_v26 = vpop.eup %3871 }
 0x4c8   :  { %3511 = vmatmul.msk.bf16.vlgmr.msra.gmra.mxu1 %vm1062_vm2, %v2974_v14  ;;  %v2863_v34 = vmul.f32 %v3872_v26, %v5600_v58  ;;  %v3590_v58 = vld [vmem:[#allocation12 + $0x18] sm:$0xff] }
 0x4c9   :  { %3208 = vmatpush.bf16.msra.mxu2 %v3590_v58 }
 0x4ca   :  { %v2879_v46 = vpack.c.bf16 %v2863_v34, %v2863_v34 }
 0x4cd   :  { %v2456_v24 = vpop.f32.mrf.mxu1 }
 0x4ce   :  { %v2945_v43 = vpop.f32.mrf.mxu0 }
 0x4cf   :  { %1943 = vrot.lane.b32.xlu1 %v5595_v38, %s4071_s6  ;;  %3053 = vrot.lane.b32.xlu2 %v2945_v43, %s4070_s2 }
 0x4d0   :  { %2504 = vrot.lane.b32.xlu0 %v2398_v54, %s4062_s16 }
 0x4d7   :  { %2498 = vrot.lane.b32.xlu2 %v2391_v57, %s4062_s16 }
 0x4d8   :  { %1949 = vrot.lane.b32.xlu0 %v1897_v5, %s4071_s6 }
 0x4e0   :  { %2508 = vrot.lane.b32.xlu0 %v2456_v24, %s4062_s16 }
 0x4e3   :  { %v5707_v0 = vpop.f32.mrf.mxu1 }
 0x4e6   :  { %v2830_v47 = vpop.xlane.xlu1 %2829 }
 0x4e8   :  { %1953 = vrot.lane.b32.xlu0 %v1902_v13, %s4071_s6 }
 0x4eb   :  { %v2948_v38 = vpop.f32.mrf.mxu0  ;;  %v2461_v19 = vpop.f32.mrf.mxu1 }
 0x4ec   :  { %3055 = vrot.lane.b32.xlu1 %v2948_v38, %s4070_s2 }
 0x4ee   :  { %v2824_v55 = vpop.xlane.xlu0 %2823 }
 0x4ef   :  { %3873 = vrcp.f32 %v2824_v55 }
 0x4f0   :  { %2512 = vrot.lane.b32.xlu0 %v2461_v19, %s4062_s16 }
 0x4f1   :  { %v2827_v28 = vpop.xlane.xlu2 %2826 }
 0x4f2   :  { %3875 = vrcp.f32 %v2827_v28 }
 0x4f3   :  { %v2950_v35 = vpop.f32.mrf.mxu0  ;;  %v5713_v15 = vpop.f32.mrf.mxu1  ;;  %3877 = vrcp.f32 %v2830_v47 }
 0x4f4   :  { %1947 = vrot.lane.b32.xlu1 %v5611_v22, %s4071_s6  ;;  %3057 = vrot.lane.b32.xlu2 %v2950_v35, %s4070_s2  ;;  %v2968_v22 = vunpack.c.l.b16 %v2879_v46 }
 0x4f5   :  { %v3874_v1 = vpop.eup %3873 }
 0x4f6   :  { %v2864_v36 = vmul.f32 %v3874_v1, %v5638_v3  ;;  %v3589_v3 = vld [vmem:[#allocation12 + $0x10] sm:$0xff] }
 0x4f7   :  { %3209 = vmatpush.bf16.msra.mxu2 %v3589_v3 }
 0x4f8   :  { %1957 = vrot.lane.b32.xlu0 %v5675_v44, %s4071_s6  ;;  %v2880_v40 = vpack.c.bf16 %v2864_v36, %v2864_v36  ;;  %v3876_v57 = vpop.eup %3875 }
 0x4f9   :  { %v2836_v39 = vpop.xlane.xlu2 %2835  ;;  %v3878_v61 = vpop.eup %3877  ;;  %v2865_v13 = vmul.f32 %v3876_v57, %v5641_v52 }
 0x4fa   :  { %v2969_v16 = vunpack.c.l.b16 %v2880_v40  ;;  %v2866_v44 = vmul.f32 %v3878_v61, %v5627_v18  ;;  %3879 = vrcp.f32 %v2836_v39 }
 0x4fb   :  { %v2953_v7 = vpop.f32.mrf.mxu0  ;;  %v2466_v29 = vpop.f32.mrf.mxu1  ;;  %3210 = vmatpush.bf16.msra.mxu2 %v3588_v60  ;;  %v2881_v2 = vpack.c.bf16 %v2865_v13, %v2865_v13 }
 0x4fc   :  { %3059 = vrot.lane.b32.xlu1 %v2953_v7, %s4070_s2  ;;  %2502 = vrot.lane.b32.xlu2 %v5664_v56, %s4062_s16  ;;  %v2975_v5 = vpack.c.b16 %v2969_v16, %v2968_v22  ;;  %v2833_v56 = vpop.xlane.xlu0 %2832  ;;  %v2882_v49 = vpack.c.bf16 %v2866_v44, %v2866_v44 }
 0x4fd   :  { %v2970_v52 = vunpack.c.l.b16 %v2881_v2  ;;  %3881 = vrcp.f32 %v2833_v56 }
 0x4fe   :  { %v1934_v33 = vpop.permute.xlu1 %1933  ;;  %3512 = vmatmul.msk.bf16.gmra.mxu1 %vm1062_vm2, %v2975_v5  ;;  %v2971_v18 = vunpack.c.l.b16 %v2882_v49 }
 0x4ff   :  { %1982 = vst.msk [vmem:[#allocation2] sm:$0xff] %vm1981_vm0, %v1934_v33  ;;  %3211 = vmatpush.bf16.msra.mxu2 %v3587_v25 }
 0x500   :  { %2516 = vrot.lane.b32.xlu0 %v2466_v29, %s4062_s16  ;;  %v3880_v6 = vpop.eup %3879 }
 0x501   :  { %v2491_v54 = vpop.permute.xlu2 %2490  ;;  %v2868_v37 = vmul.f32 %v3880_v6, %v5651_v42 }
 0x502   :  { %2539 = vst.msk [vmem:[#allocation2] sm:$0xff] %vm2538_vm4, %v2491_v54 }
 0x503   :  { %v2955_v17 = vpop.f32.mrf.mxu0  ;;  %v5733_v32 = vpop.f32.mrf.mxu1  ;;  %v2884_v41 = vpack.c.bf16 %v2868_v37, %v2868_v37 }
 0x504   :  { %1951 = vrot.lane.b32.xlu1 %v5660_v4, %s4071_s6  ;;  %3061 = vrot.lane.b32.xlu2 %v2955_v17, %s4070_s2  ;;  %v2976_v4 = vpack.c.b16 %v2971_v18, %v2970_v52  ;;  %v3882_v62 = vpop.eup %3881 }
 0x505   :  { %v2867_v45 = vmul.f32 %v3882_v62, %v5649_v23  ;;  %v2973_v21 = vunpack.c.l.b16 %v2884_v41 }
 0x507   :  { %v2883_v53 = vpack.c.bf16 %v2867_v45, %v2867_v45 }
 0x508   :  { %1961 = vrot.lane.b32.xlu0 %v5689_v50, %s4071_s6 }
 0x509   :  { %v1936_v30 = vpop.permute.xlu0 %1935  ;;  %v2972_v31 = vunpack.c.l.b16 %v2883_v53 }
 0x50a   :  { %1983 = vst.msk [vmem:[#allocation2 + $0x8] sm:$0xff] %vm1981_vm0, %v1936_v30 }
 0x50b   :  { %v2471_v63 = vpop.f32.mrf.mxu1  ;;  %v2977_v42 = vpack.c.b16 %v2973_v21, %v2972_v31 }
 0x50c   :  { %2506 = vrot.lane.b32.xlu2 %v5702_v27, %s4062_s16 }
 0x50e   :  { %3513 = vmatmul.msk.bf16.gmra.mxu1 %vm1062_vm2, %v2976_v4 }
 0x50f   :  { %v3050_v50 = vpop.permute.xlu2 %3049 }
 0x510   :  { %2520 = vrot.lane.b32.xlu0 %v2471_v63, %s4062_s16 }
 0x511   :  { %v2493_v12 = vpop.permute.xlu0 %2492 }
 0x512   :  { %2540 = vst.msk [vmem:[#allocation2 + $0x8] sm:$0xff] %vm2538_vm4, %v2493_v12 }
 0x513   :  { %3097 = vst.msk [vmem:[#allocation2 + $0x8] sm:$0xff] %vm3095_vm5, %v3050_v50 }
 0x517   :  { %v2495_v43 = vpop.permute.xlu2 %2494 }
 0x519   :  { %v1938_v14 = vpop.permute.xlu0 %1937 }
 0x51a   :  { %1984 = vst.msk [vmem:[#allocation2 + $0x10] sm:$0xff] %vm1981_vm0, %v1938_v14  ;;  %v3113_v38 = vld [vmem:[#allocation2 + $0x8] sm:$0xff] }
 0x51b   :  { %2541 = vst.msk [vmem:[#allocation2 + $0x10] sm:$0xff] %vm2538_vm4, %v2495_v43 }
 0x51e   :  { %3514 = vmatmul.msk.bf16.gmra.mxu1 %vm1062_vm2, %v2977_v42 }
 0x51f   :  { %v3048_v27 = vpop.permute.xlu1 %3047 }
 0x520   :  { %3096 = vst.msk [vmem:[#allocation2] sm:$0xff] %vm3095_vm5, %v3048_v27 }
 0x521   :  { %v2497_v23 = vpop.permute.xlu0 %2496 }
 0x527   :  { %v1940_v24 = vpop.permute.xlu1 %1939  ;;  %v3112_v59 = vld [vmem:[#allocation2] sm:$0xff] }
 0x528   :  { %1985 = vst.msk [vmem:[#allocation2 + $0x18] sm:$0xff] %vm1981_vm0, %v1940_v24  ;;  %v3128_v51 = vpack.c.bf16 %v3113_v38, %v3112_v59 }
 0x529   :  { %2542 = vst.msk [vmem:[#allocation2 + $0x18] sm:$0xff] %vm2538_vm4, %v2497_v23  ;;  %v3054_v19 = vpop.permute.xlu2 %3053  ;;  %v1942_v48 = vpop.permute.xlu0 %1941 }
 0x52a   :  { %3212 = vmatmul.bf16.vlgmr.msra.gmra.mxu2 %v3128_v51  ;;  %3099 = vst.msk [vmem:[#allocation2 + $0x18] sm:$0xff] %vm3095_vm5, %v3054_v19 }
 0x52b   :  { %1986 = vst.msk [vmem:[#allocation2 + $0x20] sm:$0xff] %vm1981_vm0, %v1942_v48 }
 0x531   :  { %v2499_v55 = vpop.permute.xlu2 %2498  ;;  %v2501_v26 = vpop.permute.xlu0 %2500  ;;  %v3115_v9 = vld [vmem:[#allocation2 + $0x18] sm:$0xff] }
 0x532   :  { %2543 = vst.msk [vmem:[#allocation2 + $0x20] sm:$0xff] %vm2538_vm4, %v2499_v55 }
 0x539   :  { %v3052_v8 = vpop.permute.xlu1 %3051  ;;  %v1946_v28 = vpop.permute.xlu0 %1945 }
 0x53a   :  { %3098 = vst.msk [vmem:[#allocation2 + $0x10] sm:$0xff] %vm3095_vm5, %v3052_v8 }
 0x53b   :  { %1988 = vst.msk [vmem:[#allocation2 + $0x30] sm:$0xff] %vm1981_vm0, %v1946_v28 }
 0x541   :  { %v1944_v35 = vpop.permute.xlu1 %1943  ;;  %v3114_v34 = vld [vmem:[#allocation2 + $0x10] sm:$0xff] }
 0x542   :  { %1987 = vst.msk [vmem:[#allocation2 + $0x28] sm:$0xff] %vm1981_vm0, %v1944_v35  ;;  %v2505_v47 = vpop.permute.xlu0 %2504  ;;  %v3129_v1 = vpack.c.bf16 %v3115_v9, %v3114_v34 }
 0x543   :  { %2544 = vst.msk [vmem:[#allocation2 + $0x28] sm:$0xff] %vm2538_vm4, %v2501_v26 }
 0x544   :  { %3217 = vmatmul.bf16.gmra.mxu2 %v3129_v1 }
 0x545   :  { %v3011_v46 = vpop.f32.mrf.mxu1 }
 0x546   :  { %3063 = vrot.lane.b32.xlu1 %v3011_v46, %s4070_s2 }
 0x54a   :  { %v1950_v36 = vpop.permute.xlu0 %1949 }
 0x54b   :  { %1990 = vst.msk [vmem:[#allocation2 + $0x40] sm:$0xff] %vm1981_vm0, %v1950_v36 }
 0x54d   :  { %v3013_v58 = vpop.f32.mrf.mxu1 }
 0x54e   :  { %v3058_v40 = vpop.permute.xlu2 %3057  ;;  %1955 = vrot.lane.b32.xlu1 %v5670_v11, %s4071_s6  ;;  %3065 = vrot.lane.b32.xlu2 %v3013_v58, %s4070_s2 }
 0x54f   :  { %3101 = vst.msk [vmem:[#allocation2 + $0x28] sm:$0xff] %vm3095_vm5, %v3058_v40 }
 0x552   :  { %v2509_v39 = vpop.permute.xlu0 %2508 }
 0x556   :  { %v2503_v7 = vpop.permute.xlu2 %2502  ;;  %2510 = vrot.lane.b32.xlu2 %v5707_v0, %s4062_s16  ;;  %v3117_v11 = vld [vmem:[#allocation2 + $0x28] sm:$0xff] }
 0x557   :  { %2545 = vst.msk [vmem:[#allocation2 + $0x30] sm:$0xff] %vm2538_vm4, %v2503_v7 }
 0x55a   :  { %v1954_v22 = vpop.permute.xlu0 %1953 }
 0x55b   :  { %1992 = vst.msk [vmem:[#allocation2 + $0x50] sm:$0xff] %vm1981_vm0, %v1954_v22 }
 0x55e   :  { %v3056_v16 = vpop.permute.xlu1 %3055  ;;  %v3062_v29 = vpop.permute.xlu2 %3061 }
 0x55f   :  { %3100 = vst.msk [vmem:[#allocation2 + $0x20] sm:$0xff] %vm3095_vm5, %v3056_v16 }
 0x562   :  { %v2513_v3 = vpop.permute.xlu0 %2512 }
 0x566   :  { %v1948_v33 = vpop.permute.xlu1 %1947  ;;  %v3116_v5 = vld [vmem:[#allocation2 + $0x20] sm:$0xff]  ;;  %v2507_v57 = vpop.permute.xlu2 %2506 }
 0x567   :  { %1989 = vst.msk [vmem:[#allocation2 + $0x38] sm:$0xff] %vm1981_vm0, %v1948_v33  ;;  %v3130_v61 = vpack.c.bf16 %v3117_v11, %v3116_v5 }
 0x568   :  { %2546 = vst.msk [vmem:[#allocation2 + $0x38] sm:$0xff] %vm2538_vm4, %v2505_v47 }
 0x569   :  { %3103 = vst.msk [vmem:[#allocation2 + $0x38] sm:$0xff] %vm3095_vm5, %v3062_v29  ;;  %3222 = vmatmul.bf16.gmra.mxu2 %v3130_v61 }
 0x56a   :  { %2547 = vst.msk [vmem:[#allocation2 + $0x40] sm:$0xff] %vm2538_vm4, %v2507_v57  ;;  %v1958_v0 = vpop.permute.xlu0 %1957 }
 0x56b   :  { %1994 = vst.msk [vmem:[#allocation2 + $0x60] sm:$0xff] %vm1981_vm0, %v1958_v0 }
 0x56e   :  { %v3060_v60 = vpop.permute.xlu1 %3059 }
 0x56f   :  { %3102 = vst.msk [vmem:[#allocation2 + $0x30] sm:$0xff] %vm3095_vm5, %v3060_v60 }
 0x570   :  { %v3119_v17 = vld [vmem:[#allocation2 + $0x38] sm:$0xff] }
 0x572   :  { %v5776_v13 = vpop.permute.xlu0 %2516 }
 0x576   :  { %v1952_v54 = vpop.permute.xlu1 %1951  ;;  %v3118_v56 = vld [vmem:[#allocation2 + $0x30] sm:$0xff] }
 0x577   :  { %1991 = vst.msk [vmem:[#allocation2 + $0x48] sm:$0xff] %vm1981_vm0, %v1952_v54  ;;  %v3131_v44 = vpack.c.bf16 %v3119_v17, %v3118_v56 }
 0x578   :  { %2548 = vst.msk [vmem:[#allocation2 + $0x48] sm:$0xff] %vm2538_vm4, %v2509_v39 }
 0x579   :  { %3227 = vmatmul.bf16.gmra.mxu2 %v3131_v44 }
 0x57a   :  { %v1962_v25 = vpop.permute.xlu0 %1961 }
 0x57b   :  { %1996 = vst.msk [vmem:[#allocation2 + $0x70] sm:$0xff] %vm1981_vm0, %v1962_v25  ;;  %v3016_v2 = vpop.f32.mrf.mxu1 }
 0x57c   :  { %3067 = vrot.lane.b32.xlu1 %v3016_v2, %s4070_s2 }
 0x582   :  { %v2521_v58 = vpop.permute.xlu0 %2520 }
 0x583   :  { %v3018_v49 = vpop.f32.mrf.mxu1 }
 0x584   :  { %1959 = vrot.lane.b32.xlu1 %v5681_v20, %s4071_s6  ;;  %3069 = vrot.lane.b32.xlu2 %v3018_v49, %s4070_s2 }
 0x58b   :  { %v3021_v52 = vpop.f32.mrf.mxu1 }
 0x58c   :  { %2514 = vrot.lane.b32.xlu2 %v5713_v15, %s4062_s16  ;;  %3071 = vrot.lane.b32.xlu1 %v3021_v52, %s4070_s2  ;;  %v5799_v15 = vld [vmem:[%s5849_s12] ss:$0 sm:$0xff]  ;;  %s4073_s12 = smov [#allocation14]  }
 0x593   :  { %v3023_v30 = vpop.f32.mrf.mxu1 }
 0x594   :  { %1963 = vrot.lane.b32.xlu1 %v5696_v10, %s4071_s6  ;;  %3073 = vrot.lane.b32.xlu2 %v3023_v30, %s4070_s2 }
 0x59b   :  { %v3026_v18 = vpop.f32.mrf.mxu1 }
 0x59c   :  { %2518 = vrot.lane.b32.xlu2 %v5733_v32, %s4062_s16  ;;  %3075 = vrot.lane.b32.xlu1 %v3026_v18, %s4070_s2  ;;  %s3273_s16 = sshll.u32 %s4073_s12, 4  ;;  %s3274_s16 = int_to_ptr.vmem [resolvable:$true] %s3273_s16 }
 0x5a3   :  { %v3028_v20 = vpop.f32.mrf.mxu1 }
 0x5a4   :  { %3077 = vrot.lane.b32.xlu2 %v3028_v20, %s4070_s2 }
 0x5a8   :  { %v3066_v4 = vpop.permute.xlu2 %3065 }
 0x5a9   :  { %3105 = vst.msk [vmem:[#allocation2 + $0x48] sm:$0xff] %vm3095_vm5, %v3066_v4 }
 0x5ad   :  { %v3213_v10 = vpop.f32.mrf.mxu2 }
 0x5ae   :  { %v3214_v6 = vadd.f32 %v5799_v15, %v3213_v10 }
 0x5b0   :  { %3253 = vst [vmem:[#allocation14] sm:$0xff] %v3214_v6  ;;  %v2511_v63 = vpop.permute.xlu2 %2510  ;;  %v3121_v45 = vld [vmem:[#allocation2 + $0x48] sm:$0xff] }
 0x5b1   :  { %2549 = vst.msk [vmem:[#allocation2 + $0x50] sm:$0xff] %vm2538_vm4, %v2511_v63 }
 0x5b5   :  { %v3215_v32 = vpop.f32.mrf.mxu2 }
 0x5b6   :  { %v3216_v62 = vadd.f32 %v5799_v15, %v3215_v32 }
 0x5b8   :  { %3254 = vst [vmem:[#allocation14 + $0x8] sm:$0xff] %v3216_v62  ;;  %v3064_v37 = vpop.permute.xlu1 %3063 }
 0x5b9   :  { %3104 = vst.msk [vmem:[#allocation2 + $0x40] sm:$0xff] %vm3095_vm5, %v3064_v37 }
 0x5c0   :  { %v1956_v50 = vpop.permute.xlu1 %1955  ;;  %v3120_v12 = vld [vmem:[#allocation2 + $0x40] sm:$0xff] }
 0x5c1   :  { %1993 = vst.msk [vmem:[#allocation2 + $0x58] sm:$0xff] %vm1981_vm0, %v1956_v50  ;;  %v3132_v41 = vpack.c.bf16 %v3121_v45, %v3120_v12 }
 0x5c2   :  { %2550 = vst.msk [vmem:[#allocation2 + $0x58] sm:$0xff] %vm2538_vm4, %v2513_v3 }
 0x5c3   :  { %3232 = vmatmul.bf16.gmra.mxu2 %v3132_v41 }
 0x5c7   :  { %v3218_v53 = vpop.f32.mrf.mxu2 }
 0x5c8   :  { %v3219_v21 = vadd.f32 %v5799_v15, %v3218_v53 }
 0x5ca   :  { %3255 = vst [vmem:[#allocation14 + $0x10] sm:$0xff] %v3219_v21 }
 0x5cf   :  { %v3220_v14 = vpop.f32.mrf.mxu2 }
 0x5d0   :  { %v3221_v31 = vadd.f32 %v5799_v15, %v3220_v14 }
 0x5d2   :  { %3256 = vst [vmem:[#allocation14 + $0x18] sm:$0xff] %v3221_v31 }
 0x5de   :  { %v3070_v43 = vpop.permute.xlu2 %3069 }
 0x5df   :  { %3107 = vst.msk [vmem:[#allocation2 + $0x58] sm:$0xff] %vm3095_vm5, %v3070_v43 }
 0x5e6   :  { %v2515_v42 = vpop.permute.xlu2 %2514  ;;  %v3123_v55 = vld [vmem:[#allocation2 + $0x58] sm:$0xff] }
 0x5e7   :  { %2551 = vst.msk [vmem:[#allocation2 + $0x60] sm:$0xff] %vm2538_vm4, %v2515_v42 }
 0x5ec   :  { %v3223_v27 = vpop.f32.mrf.mxu2 }
 0x5ed   :  { %v3224_v23 = vadd.f32 %v5799_v15, %v3223_v27 }
 0x5ee   :  { %v3068_v24 = vpop.permute.xlu1 %3067  ;;  %v3074_v59 = vpop.permute.xlu2 %3073 }
 0x5ef   :  { %3257 = vst [vmem:[#allocation14 + $0x20] sm:$0xff] %v3224_v23 }
 0x5f0   :  { %3106 = vst.msk [vmem:[#allocation2 + $0x50] sm:$0xff] %vm3095_vm5, %v3068_v24 }
 0x5f4   :  { %v3225_v38 = vpop.f32.mrf.mxu2 }
 0x5f5   :  { %v3226_v51 = vadd.f32 %v5799_v15, %v3225_v38 }
 0x5f6   :  { %v1960_v19 = vpop.permute.xlu1 %1959  ;;  %v2519_v26 = vpop.permute.xlu2 %2518 }
 0x5f7   :  { %3258 = vst [vmem:[#allocation14 + $0x28] sm:$0xff] %v3226_v51  ;;  %v3122_v48 = vld [vmem:[#allocation2 + $0x50] sm:$0xff] }
 0x5f8   :  { %1995 = vst.msk [vmem:[#allocation2 + $0x68] sm:$0xff] %vm1981_vm0, %v1960_v19  ;;  %v3133_v8 = vpack.c.bf16 %v3123_v55, %v3122_v48 }
 0x5f9   :  { %2552 = vst.msk [vmem:[#allocation2 + $0x68] sm:$0xff] %vm2538_vm4, %v5776_v13 }
 0x5fa   :  { %3109 = vst.msk [vmem:[#allocation2 + $0x68] sm:$0xff] %vm3095_vm5, %v3074_v59  ;;  %3237 = vmatmul.bf16.gmra.mxu2 %v3133_v8 }
 0x5fb   :  { %2553 = vst.msk [vmem:[#allocation2 + $0x70] sm:$0xff] %vm2538_vm4, %v2519_v26 }
 0x5fc   :  { %v3228_v28 = vpop.f32.mrf.mxu2 }
 0x5fd   :  { %v3229_v35 = vadd.f32 %v5799_v15, %v3228_v28 }
 0x5fe   :  { %v3072_v34 = vpop.permute.xlu1 %3071  ;;  %v3078_v39 = vpop.permute.xlu2 %3077 }
 0x5ff   :  { %3259 = vst [vmem:[#allocation14 + $0x30] sm:$0xff] %v3229_v35 }
 0x600   :  { %3108 = vst.msk [vmem:[#allocation2 + $0x60] sm:$0xff] %vm3095_vm5, %v3072_v34 }
 0x601   :  { %v3125_v36 = vld [vmem:[#allocation2 + $0x68] sm:$0xff] }
 0x604   :  { %v3230_v9 = vpop.f32.mrf.mxu2 }
 0x605   :  { %v3231_v47 = vadd.f32 %v5799_v15, %v3230_v9 }
 0x606   :  { %v1964_v1 = vpop.permute.xlu1 %1963 }
 0x607   :  { %3260 = vst [vmem:[#allocation14 + $0x38] sm:$0xff] %v3231_v47  ;;  %v3124_v46 = vld [vmem:[#allocation2 + $0x60] sm:$0xff] }
 0x608   :  { %1997 = vst.msk [vmem:[#allocation2 + $0x78] sm:$0xff] %vm1981_vm0, %v1964_v1  ;;  %v3134_v40 = vpack.c.bf16 %v3125_v36, %v3124_v46 }
 0x609   :  { %2554 = vst.msk [vmem:[#allocation2 + $0x78] sm:$0xff] %vm2538_vm4, %v2521_v58 }
 0x60a   :  { %3111 = vst.msk [vmem:[#allocation2 + $0x78] sm:$0xff] %vm3095_vm5, %v3078_v39  ;;  %3242 = vmatmul.bf16.gmra.mxu2 %v3134_v40 }
 0x60e   :  { %v3076_v7 = vpop.permute.xlu1 %3075 }
 0x60f   :  { %3110 = vst.msk [vmem:[#allocation2 + $0x70] sm:$0xff] %vm3095_vm5, %v3076_v7 }
 0x611   :  { %v3127_v16 = vld [vmem:[#allocation2 + $0x78] sm:$0xff] }
 0x616   :  { %v3126_v22 = vld [vmem:[#allocation2 + $0x70] sm:$0xff] }
 0x617   :  { %v3135_v29 = vpack.c.bf16 %v3127_v16, %v3126_v22 }
 0x61a   :  { %3247 = vmatmul.bf16.gmra.mxu2 %v3135_v29 }
 0x646   :  { %v3233_v3 = vpop.f32.mrf.mxu2 }
 0x647   :  { %v3234_v33 = vadd.f32 %v5799_v15, %v3233_v3 }
 0x649   :  { %3261 = vst [vmem:[#allocation14 + $0x40] sm:$0xff] %v3234_v33 }
 0x64e   :  { %v3235_v5 = vpop.f32.mrf.mxu2 }
 0x64f   :  { %v3236_v11 = vadd.f32 %v5799_v15, %v3235_v5 }
 0x651   :  { %3262 = vst [vmem:[#allocation14 + $0x48] sm:$0xff] %v3236_v11 }
 0x67d   :  { %v3238_v57 = vpop.f32.mrf.mxu2 }
 0x67e   :  { %v3239_v61 = vadd.f32 %v5799_v15, %v3238_v57 }
 0x680   :  { %3263 = vst [vmem:[#allocation14 + $0x50] sm:$0xff] %v3239_v61 }
 0x685   :  { %v3240_v0 = vpop.f32.mrf.mxu2 }
 0x686   :  { %v3241_v60 = vadd.f32 %v5799_v15, %v3240_v0 }
 0x688   :  { %3264 = vst [vmem:[#allocation14 + $0x58] sm:$0xff] %v3241_v60 }
 0x68d   :  { %v3243_v13 = vpop.f32.mrf.mxu2 }
 0x68e   :  { %v3244_v54 = vadd.f32 %v5799_v15, %v3243_v13 }
 0x690   :  { %3265 = vst [vmem:[#allocation14 + $0x60] sm:$0xff] %v3244_v54 }
 0x695   :  { %v3245_v56 = vpop.f32.mrf.mxu2 }
 0x696   :  { %v3246_v17 = vadd.f32 %v5799_v15, %v3245_v56 }
 0x698   :  { %3266 = vst [vmem:[#allocation14 + $0x68] sm:$0xff] %v3246_v17 }
 0x69d   :  { %v3248_v44 = vpop.f32.mrf.mxu2 }
 0x69e   :  { %v3249_v25 = vadd.f32 %v5799_v15, %v3248_v44 }
 0x6a0   :  { %3267 = vst [vmem:[#allocation14 + $0x70] sm:$0xff] %v3249_v25 }
 0x6a5   :  { %v3250_v2 = vpop.f32.mrf.mxu2 }
 0x6a6   :  { %v3251_v49 = vadd.f32 %v5799_v15, %v3250_v2 }
 0x6a8   :  { %3268 = vst [vmem:[#allocation14 + $0x78] sm:$0xff] %v3251_v49 }
 0x6a9   :  { %3281 = dma.vmem_to_hbm [thread:$0]  %s3274_s16, 2048, %s3276_s1, [#allocation5], %s4074_s7, %s4074_s7, %s4075_s22  }
 0x6aa   :  { %4059 = dma.done.wait [#allocation5], 2048  }
 0x6ab   :  { %4060 = vsyncadd [#allocation5], 4294965248 }
 0x6ac   :  { %3286 = vsyncpa [#allocation4], 1 }
 0x6ad   :  { %3287 = vsyncpa [#allocation7], 1 }
 0x6ae   :  { %3288 = vsyncpa [#allocation10], 1 }
 0x6af   :  { %3289 = vsyncpa [#allocation13], 1 }
 0x6b0   :  { %3290 = vsyncpa [#allocation5], 1 }

</bundles_post_ra>
